<compile_context>
chip_gen: v5e
topology: v5e:2x2
jax: 0.10.0
libtpu: 0.0.40
codegen_flags: <defaults>
</compile_context>

<pallas_src>
import functools
import numpy as np
import jax
import jax.numpy as jnp
from jax import lax
from jax.experimental import pallas as pl
from jax.experimental.pallas import tpu as pltpu


# ---------------------------------------------------------------------------
# Fused Pallas kernel: one batch image per grid step, everything VMEM-resident.
# ---------------------------------------------------------------------------
def _fcn_fused_kernel(x_ref, w1_ref, b1_ref, w2_ref, b2_ref,
                      wfc_ref, bfc_ref, wsc_ref, bsc_ref,
                      sel1_ref, sel2_ref, up_op_ref,
                      score_ref, up_ref,
                      im1, p1, im2, p2,
                      *, H, W, Wp, Cin, C1, C2, NC):
    f32 = jnp.float32
    H2, W2 = H // 2, W // 2
    H4, W4 = H // 4, W // 4
    n1 = H * Wp                      # flat conv1-output extent (row stride Wp)
    n2 = H2 * Wp                     # flat conv2-output extent

    # ---- conv1 (3x3, pad 1) + ReLU : deep-K im2col + ONE matmul -------------
    xv = x_ref[0]                                           # (Cin, (H+3)*Wp), pre-padded
    for di in range(3):
        for dj in range(3):
            t = di * 3 + dj
            off = di * Wp + dj
            im1[t * Cin:(t + 1) * Cin, :] = xv[:, off:off + n1]
    h1 = jnp.maximum(
        jnp.dot(w1_ref[...], im1[...], preferred_element_type=f32) + b1_ref[...],
        0.0)                                                # (C1, n1)

    # ---- maxpool 2x2 #1: whole-image pair maxes + per-row selection matmul --
    p1[...] = jnp.zeros_like(p1)                            # zero pad border for conv2
    mv = jnp.maximum(h1[:, :n1 - Wp], h1[:, Wp:])           # vertical pair max
    mc = jnp.maximum(mv[:, :-1], mv[:, 1:])                 # horizontal pair max
    sel1 = sel1_ref[...]                                    # (W, W2) even-col selector
    for i2 in range(H2):
        row = mc[:, (2 * i2) * Wp:(2 * i2) * Wp + W]        # lane-aligned slice
        p1[:, (i2 + 1) * Wp + 1:(i2 + 1) * Wp + 1 + W2] = jnp.dot(
            row, sel1, preferred_element_type=f32)          # one bulk row store

    # ---- conv2 (3x3, pad 1) + ReLU : deep-K im2col + ONE matmul -------------
    pv = p1[...]
    for di in range(3):
        for dj in range(3):
            t = di * 3 + dj
            off = di * Wp + dj
            im2[t * C1:(t + 1) * C1, :] = pv[:, off:off + n2]
    h2 = jnp.maximum(
        jnp.dot(w2_ref[...], im2[...], preferred_element_type=f32) + b2_ref[...],
        0.0)                                                # (C2, n2)

    # ---- maxpool 2x2 #2 -> dense (C2, H4*W4) ---------------------------------
    mv2 = jnp.maximum(h2[:, :n2 - Wp], h2[:, Wp:])
    mc2 = jnp.maximum(mv2[:, :-1], mv2[:, 1:])
    sel2 = sel2_ref[...]                                    # (W2, W4)
    for i4 in range(H4):
        row = mc2[:, (2 * i4) * Wp:(2 * i4) * Wp + W2]
        p2[:, i4 * W4:(i4 + 1) * W4] = jnp.dot(row, sel2, preferred_element_type=f32)

    # ---- classifier_fc (1x1 conv) + ReLU -------------------------------------
    f = jnp.maximum(
        jnp.dot(wfc_ref[...], p2[...], preferred_element_type=f32) + bfc_ref[...],
        0.0)                                                # (Cfc, H4*W4)

    # ---- score (1x1 conv), lane-dense store ----------------------------------
    s = jnp.dot(wsc_ref[...], f, preferred_element_type=f32) + bsc_ref[...]
    score_ref[0] = s                                        # (NC, H4*W4)

    # ---- upscore: all classes at once, single matmul, lane-dense store -------
    up_ref[0] = jnp.dot(s, up_op_ref[...], preferred_element_type=f32)  # (NC, H*W)


# ---------------------------------------------------------------------------
# Host-side wrapper
# ---------------------------------------------------------------------------
def _bilinear_matrix(out_size, in_size):
    """1-D factor of nn.Upsample(mode='bilinear', align_corners=False)."""
    m = np.zeros((out_size, in_size), dtype=np.float32)
    scale = in_size / out_size
    for o in range(out_size):
        src = max((o + 0.5) * scale - 0.5, 0.0)
        i0 = min(int(np.floor(src)), in_size - 1)
        i1 = min(i0 + 1, in_size - 1)
        lam = src - i0
        m[o, i0] += 1.0 - lam
        m[o, i1] += lam
    return m


def _even_selector(n_in, n_out):
    s = np.zeros((n_in, n_out), dtype=np.float32)
    s[np.arange(n_out) * 2, np.arange(n_out)] = 1.0
    return s


def fcn_forward(x_nchw, params):
    N, Cin, H, W = x_nchw.shape
    assert H % 4 == 0 and W % 4 == 0, "synthetic backbone pools twice by 2"
    C1 = params["conv1_w"].shape[-1]
    C2 = params["conv2_w"].shape[-1]
    Cfc = params["fc_w"].shape[-1]
    NC = params["score_w"].shape[-1]
    H2, W2, H4, W4 = H // 2, W // 2, H // 4, W // 4

    # lane-aligned row stride for the padded, channel-major flat activations
    Wp = max(128, ((W + 2 + 127) // 128) * 128)
    Lp1 = (H + 3) * Wp            # input pad buffer (extra slack row for tap slices)
    Lp2 = (H2 + 3) * Wp           # pool1 pad buffer

    # --- host-side layout plumbing (tiny, XLA-fused; no compute hoisted) -----
    xpad = jnp.zeros((N, Cin, H + 3, Wp), jnp.float32)
    xpad = xpad.at[:, :, 1:H + 1, 1:W + 1].set(x_nchw.astype(jnp.float32))
    xpad = xpad.reshape(N, Cin, Lp1)

    # conv weights re-laid out to (Cout, 9*Cin), tap-major K (matches im2col rows)
    w1 = jnp.transpose(params["conv1_w"], (0, 1, 3, 2)).reshape(9, C1, Cin)
    w1 = jnp.transpose(w1, (1, 0, 2)).reshape(C1, 9 * Cin)
    w2 = jnp.transpose(params["conv2_w"], (0, 1, 3, 2)).reshape(9, C2, C1)
    w2 = jnp.transpose(w2, (1, 0, 2)).reshape(C2, 9 * C1)
    b1 = params["conv1_b"].reshape(C1, 1)
    b2 = params["conv2_b"].reshape(C2, 1)
    wfc = params["fc_w"].T
    bfc = params["fc_b"].reshape(Cfc, 1)
    wsc = params["score_w"].T
    bsc = params["score_b"].reshape(NC, 1)

    # pooling even-column selectors and the dense separable-bilinear operator
    sel1 = jnp.asarray(_even_selector(W, W2))
    sel2 = jnp.asarray(_even_selector(W2, W4))
    uh = _bilinear_matrix(H, H4)                      # (H, H4)
    uw = _bilinear_matrix(W, W4)                      # (W, W4)
    up_op = jnp.asarray(np.einsum("hk,wl->klhw", uh, uw).reshape(H4 * W4, H * W))

    kernel = functools.partial(_fcn_fused_kernel, H=H, W=W, Wp=Wp,
                               Cin=Cin, C1=C1, C2=C2, NC=NC)

    score_flat, up_flat = pl.pallas_call(
        kernel,
        out_shape=(jax.ShapeDtypeStruct((N, NC, H4 * W4), jnp.float32),
                   jax.ShapeDtypeStruct((N, NC, H * W), jnp.float32)),
        grid=(N,),
        in_specs=[
            pl.BlockSpec((1, Cin, Lp1), lambda n: (n, 0, 0)),     # padded input (per image)
            pl.BlockSpec((C1, 9 * Cin), lambda n: (0, 0)),        # conv1 fused weights
            pl.BlockSpec((C1, 1), lambda n: (0, 0)),
            pl.BlockSpec((C2, 9 * C1), lambda n: (0, 0)),         # conv2 fused weights
            pl.BlockSpec((C2, 1), lambda n: (0, 0)),
            pl.BlockSpec((Cfc, C2), lambda n: (0, 0)),            # fc^T
            pl.BlockSpec((Cfc, 1), lambda n: (0, 0)),
            pl.BlockSpec((NC, Cfc), lambda n: (0, 0)),            # score^T
            pl.BlockSpec((NC, 1), lambda n: (0, 0)),
            pl.BlockSpec((W, W2), lambda n: (0, 0)),              # even-col selector 1
            pl.BlockSpec((W2, W4), lambda n: (0, 0)),             # even-col selector 2
            pl.BlockSpec((H4 * W4, H * W), lambda n: (0, 0)),     # bilinear operator
        ],
        out_specs=(
            pl.BlockSpec((1, NC, H4 * W4), lambda n: (n, 0, 0)),
            pl.BlockSpec((1, NC, H * W), lambda n: (n, 0, 0)),
        ),
        scratch_shapes=[
            pltpu.VMEM((9 * Cin, H * Wp), jnp.float32),    # im2col for conv1
            pltpu.VMEM((C1, Lp2), jnp.float32),            # padded pool1 output
            pltpu.VMEM((9 * C1, H2 * Wp), jnp.float32),    # im2col for conv2
            pltpu.VMEM((C2, H4 * W4), jnp.float32),        # pool2 output (dense)
        ],
        compiler_params=pltpu.CompilerParams(
            dimension_semantics=("parallel",),
            vmem_limit_bytes=32 * 1024 * 1024),
    )(xpad, w1, b1, w2, b2, wfc, bfc, wsc, bsc, sel1, sel2, up_op)

    score = score_flat.reshape(N, NC, H4, W4)      # free minor-dim splits
    up = up_flat.reshape(N, NC, H, W)
    return score, up


# ---------------------------------------------------------------------------
# Pure-JAX reference of the same synthetic FCN (correctness sanity check)
# ---------------------------------------------------------------------------
def fcn_reference(x_nchw, params):
    N, Cin, H, W = x_nchw.shape
    H4, W4 = H // 4, W // 4
    x = jnp.transpose(x_nchw, (0, 2, 3, 1))

    def conv3x3(x, w, b):
        y = lax.conv_general_dilated(x, w, (1, 1), "SAME",
                                     dimension_numbers=("NHWC", "HWIO", "NHWC"))
        return jax.nn.relu(y + b)

    def pool(x):
        return lax.reduce_window(x, -jnp.inf, lax.max,
                                 (1, 2, 2, 1), (1, 2, 2, 1), "VALID")

    h = pool(conv3x3(x, params["conv1_w"], params["conv1_b"]))
    h = pool(conv3x3(h, params["conv2_w"], params["conv2_b"]))
    f = jax.nn.relu(jnp.einsum("nhwc,cd->nhwd", h, params["fc_w"]) + params["fc_b"])
    s = jnp.einsum("nhwc,cd->nhwd", f, params["score_w"]) + params["score_b"]
    uh = jnp.asarray(_bilinear_matrix(H, H4))
    uw = jnp.asarray(_bilinear_matrix(W, W4))
    up = jnp.einsum("oh,nhwc->nowc", uh, s)
    up = jnp.einsum("pw,nowc->nopc", uw, up)
    return jnp.transpose(s, (0, 3, 1, 2)), jnp.transpose(up, (0, 3, 1, 2))


# ---------------------------------------------------------------------------
# Synthetic parameters (the real backbone is checkpoint-defined)
# ---------------------------------------------------------------------------
def init_params(key, cin=4, c1=8, c2=16, cfc=32, num_classes=5):
    ks = jax.random.split(key, 8)
    s = 0.1
    return {
        "conv1_w": jax.random.normal(ks[0], (3, 3, cin, c1), jnp.float32) * s,
        "conv1_b": jax.random.normal(ks[1], (c1,), jnp.float32) * s,
        "conv2_w": jax.random.normal(ks[2], (3, 3, c1, c2), jnp.float32) * s,
        "conv2_b": jax.random.normal(ks[3], (c2,), jnp.float32) * s,
        "fc_w":    jax.random.normal(ks[4], (c2, cfc), jnp.float32) * s,
        "fc_b":    jax.random.normal(ks[5], (cfc,), jnp.float32) * s,
        "score_w": jax.random.normal(ks[6], (cfc, num_classes), jnp.float32) * s,
        "score_b": jax.random.normal(ks[7], (num_classes,), jnp.float32) * s,
    }


if __name__ == "__main__":
    key = jax.random.PRNGKey(0)
    pkey, xkey = jax.random.split(key)
    params = init_params(pkey)

    x = jax.random.normal(xkey, (2, 4, 16, 16), jnp.float32)   # NCHW input

    score, upsample = jax.jit(fcn_forward)(x, params)
    jax.block_until_ready((score, upsample))

    assert score.shape == (2, 5, 4, 4), score.shape
    assert upsample.shape == (2, 5, 16, 16), upsample.shape

    # sanity check against the pure-JAX reference (loose tol: MXU default precision)
    score_r, up_r = fcn_reference(x, params)
    assert jnp.allclose(score, score_r, rtol=2e-2, atol=2e-2), \
        float(jnp.max(jnp.abs(score - score_r)))
    assert jnp.allclose(upsample, up_r, rtol=2e-2, atol=2e-2), \
        float(jnp.max(jnp.abs(upsample - up_r)))

    print("KERNEL_OK")
</pallas_src>

<mosaic_0001>
module attributes {stable_mosaic.version = 11 : i64} {
  func.func @_fcn_fused_kernel(%arg0: i32, %arg1: memref<1x4x2432xf32, #tpu.memory_space<vmem>>, %arg2: memref<8x36xf32, #tpu.memory_space<vmem>>, %arg3: memref<8x1xf32, #tpu.memory_space<vmem>>, %arg4: memref<16x72xf32, #tpu.memory_space<vmem>>, %arg5: memref<16x1xf32, #tpu.memory_space<vmem>>, %arg6: memref<32x16xf32, #tpu.memory_space<vmem>>, %arg7: memref<32x1xf32, #tpu.memory_space<vmem>>, %arg8: memref<5x32xf32, #tpu.memory_space<vmem>>, %arg9: memref<5x1xf32, #tpu.memory_space<vmem>>, %arg10: memref<16x8xf32, #tpu.memory_space<vmem>>, %arg11: memref<8x4xf32, #tpu.memory_space<vmem>>, %arg12: memref<16x256xf32, #tpu.memory_space<vmem>>, %arg13: memref<1x5x16xf32, #tpu.memory_space<vmem>>, %arg14: memref<1x5x256xf32, #tpu.memory_space<vmem>>, %arg15: memref<36x2048xf32, #tpu.memory_space<vmem>>, %arg16: memref<8x1408xf32, #tpu.memory_space<vmem>>, %arg17: memref<72x1024xf32, #tpu.memory_space<vmem>>, %arg18: memref<16x16xf32, #tpu.memory_space<vmem>>) attributes {dimension_semantics = [#tpu.dimension_semantics<parallel>], iteration_bounds = array<i64: 2>, scalar_prefetch = 0 : i64, scratch_operands = 4 : i64, tpu.core_type = #tpu.core_type<tc>, window_params = [{transform_indices = @transform_0, window_bounds = array<i64: 1, 4, 2432>}, {pipeline_mode = #tpu.pipeline_mode<synchronous>, transform_indices = @transform_1, window_bounds = array<i64: 8, 36>}, {pipeline_mode = #tpu.pipeline_mode<synchronous>, transform_indices = @transform_2, window_bounds = array<i64: 8, 1>}, {pipeline_mode = #tpu.pipeline_mode<synchronous>, transform_indices = @transform_3, window_bounds = array<i64: 16, 72>}, {pipeline_mode = #tpu.pipeline_mode<synchronous>, transform_indices = @transform_4, window_bounds = array<i64: 16, 1>}, {pipeline_mode = #tpu.pipeline_mode<synchronous>, transform_indices = @transform_5, window_bounds = array<i64: 32, 16>}, {pipeline_mode = #tpu.pipeline_mode<synchronous>, transform_indices = @transform_6, window_bounds = array<i64: 32, 1>}, {pipeline_mode = #tpu.pipeline_mode<synchronous>, transform_indices = @transform_7, window_bounds = array<i64: 5, 32>}, {pipeline_mode = #tpu.pipeline_mode<synchronous>, transform_indices = @transform_8, window_bounds = array<i64: 5, 1>}, {pipeline_mode = #tpu.pipeline_mode<synchronous>, transform_indices = @transform_9, window_bounds = array<i64: 16, 8>}, {pipeline_mode = #tpu.pipeline_mode<synchronous>, transform_indices = @transform_10, window_bounds = array<i64: 8, 4>}, {pipeline_mode = #tpu.pipeline_mode<synchronous>, transform_indices = @transform_11, window_bounds = array<i64: 16, 256>}, {transform_indices = @transform_12, window_bounds = array<i64: 1, 5, 16>}, {transform_indices = @transform_13, window_bounds = array<i64: 1, 5, 256>}]} {
    %c0 = arith.constant 0 : index
    %c0_0 = arith.constant 0 : index
    %c0_1 = arith.constant 0 : index
    %0 = vector.load %arg1[%c0, %c0_0, %c0_1] : memref<1x4x2432xf32, #tpu.memory_space<vmem>>, vector<1x4x2432xf32>
    %1 = vector.shape_cast %0 : vector<1x4x2432xf32> to vector<4x2432xf32>
    %2 = vector.extract_strided_slice %1 {offsets = [0, 0], sizes = [4, 2048], strides = [1, 1]} : vector<4x2432xf32> to vector<4x2048xf32>
    %c0_2 = arith.constant 0 : index
    %c0_3 = arith.constant 0 : index
    %3 = vector.load %arg15[%c0_2, %c0_3] : memref<36x2048xf32, #tpu.memory_space<vmem>>, vector<4x2048xf32>
    tpu.vector_store %arg15[%c0_2, %c0_3], %2 {strides = array<i32>} : memref<36x2048xf32, #tpu.memory_space<vmem>>, vector<4x2048xf32>,
    %4 = vector.extract_strided_slice %1 {offsets = [0, 1], sizes = [4, 2048], strides = [1, 1]} : vector<4x2432xf32> to vector<4x2048xf32>
    %c4 = arith.constant 4 : index
    %c0_4 = arith.constant 0 : index
    %5 = vector.load %arg15[%c4, %c0_4] : memref<36x2048xf32, #tpu.memory_space<vmem>>, vector<4x2048xf32>
    tpu.vector_store %arg15[%c4, %c0_4], %4 {strides = array<i32>} : memref<36x2048xf32, #tpu.memory_space<vmem>>, vector<4x2048xf32>,
    %6 = vector.extract_strided_slice %1 {offsets = [0, 2], sizes = [4, 2048], strides = [1, 1]} : vector<4x2432xf32> to vector<4x2048xf32>
    %c8 = arith.constant 8 : index
    %c0_5 = arith.constant 0 : index
    %7 = vector.load %arg15[%c8, %c0_5] : memref<36x2048xf32, #tpu.memory_space<vmem>>, vector<4x2048xf32>
    tpu.vector_store %arg15[%c8, %c0_5], %6 {strides = array<i32>} : memref<36x2048xf32, #tpu.memory_space<vmem>>, vector<4x2048xf32>,
    %8 = vector.extract_strided_slice %1 {offsets = [0, 128], sizes = [4, 2048], strides = [1, 1]} : vector<4x2432xf32> to vector<4x2048xf32>
    %c12 = arith.constant 12 : index
    %c0_6 = arith.constant 0 : index
    %9 = vector.load %arg15[%c12, %c0_6] : memref<36x2048xf32, #tpu.memory_space<vmem>>, vector<4x2048xf32>
    tpu.vector_store %arg15[%c12, %c0_6], %8 {strides = array<i32>} : memref<36x2048xf32, #tpu.memory_space<vmem>>, vector<4x2048xf32>,
    %10 = vector.extract_strided_slice %1 {offsets = [0, 129], sizes = [4, 2048], strides = [1, 1]} : vector<4x2432xf32> to vector<4x2048xf32>
    %c16 = arith.constant 16 : index
    %c0_7 = arith.constant 0 : index
    %11 = vector.load %arg15[%c16, %c0_7] : memref<36x2048xf32, #tpu.memory_space<vmem>>, vector<4x2048xf32>
    tpu.vector_store %arg15[%c16, %c0_7], %10 {strides = array<i32>} : memref<36x2048xf32, #tpu.memory_space<vmem>>, vector<4x2048xf32>,
    %12 = vector.extract_strided_slice %1 {offsets = [0, 130], sizes = [4, 2048], strides = [1, 1]} : vector<4x2432xf32> to vector<4x2048xf32>
    %c20 = arith.constant 20 : index
    %c0_8 = arith.constant 0 : index
    %13 = vector.load %arg15[%c20, %c0_8] : memref<36x2048xf32, #tpu.memory_space<vmem>>, vector<4x2048xf32>
    tpu.vector_store %arg15[%c20, %c0_8], %12 {strides = array<i32>} : memref<36x2048xf32, #tpu.memory_space<vmem>>, vector<4x2048xf32>,
    %14 = vector.extract_strided_slice %1 {offsets = [0, 256], sizes = [4, 2048], strides = [1, 1]} : vector<4x2432xf32> to vector<4x2048xf32>
    %c24 = arith.constant 24 : index
    %c0_9 = arith.constant 0 : index
    %15 = vector.load %arg15[%c24, %c0_9] : memref<36x2048xf32, #tpu.memory_space<vmem>>, vector<4x2048xf32>
    tpu.vector_store %arg15[%c24, %c0_9], %14 {strides = array<i32>} : memref<36x2048xf32, #tpu.memory_space<vmem>>, vector<4x2048xf32>,
    %16 = vector.extract_strided_slice %1 {offsets = [0, 257], sizes = [4, 2048], strides = [1, 1]} : vector<4x2432xf32> to vector<4x2048xf32>
    %c28 = arith.constant 28 : index
    %c0_10 = arith.constant 0 : index
    %17 = vector.load %arg15[%c28, %c0_10] : memref<36x2048xf32, #tpu.memory_space<vmem>>, vector<4x2048xf32>
    tpu.vector_store %arg15[%c28, %c0_10], %16 {strides = array<i32>} : memref<36x2048xf32, #tpu.memory_space<vmem>>, vector<4x2048xf32>,
    %18 = vector.extract_strided_slice %1 {offsets = [0, 258], sizes = [4, 2048], strides = [1, 1]} : vector<4x2432xf32> to vector<4x2048xf32>
    %c32 = arith.constant 32 : index
    %c0_11 = arith.constant 0 : index
    %19 = vector.load %arg15[%c32, %c0_11] : memref<36x2048xf32, #tpu.memory_space<vmem>>, vector<4x2048xf32>
    tpu.vector_store %arg15[%c32, %c0_11], %18 {strides = array<i32>} : memref<36x2048xf32, #tpu.memory_space<vmem>>, vector<4x2048xf32>,
    %c0_12 = arith.constant 0 : index
    %c0_13 = arith.constant 0 : index
    %20 = vector.load %arg2[%c0_12, %c0_13] : memref<8x36xf32, #tpu.memory_space<vmem>>, vector<8x36xf32>
    %c0_14 = arith.constant 0 : index
    %c0_15 = arith.constant 0 : index
    %21 = vector.load %arg15[%c0_14, %c0_15] : memref<36x2048xf32, #tpu.memory_space<vmem>>, vector<36x2048xf32>
    %cst = arith.constant dense<0.000000e+00> : vector<8x2048xf32>
    %22 = tpu.matmul %20, %21, %cst {dimension_numbers = #tpu.dot_dimension_numbers<[1], [0], [0], [1], [0, 0, 1, 1], [], []>} : vector<8x36xf32>, vector<36x2048xf32>, vector<8x2048xf32> -> vector<8x2048xf32>
    %c0_16 = arith.constant 0 : index
    %c0_17 = arith.constant 0 : index
    %23 = vector.load %arg3[%c0_16, %c0_17] : memref<8x1xf32, #tpu.memory_space<vmem>>, vector<8x1xf32>
    %24 = vector.broadcast %23 : vector<8x1xf32> to vector<8x2048xf32>
    %25 = arith.addf %22, %24 : vector<8x2048xf32>
    %cst_18 = arith.constant 0.000000e+00 : f32
    %26 = vector.broadcast %cst_18 : f32 to vector<8x2048xf32>
    %27 = arith.maximumf %25, %26 : vector<8x2048xf32>
    %cst_19 = arith.constant 0.000000e+00 : f32
    %28 = vector.broadcast %cst_19 : f32 to vector<8x1408xf32>
    %c0_20 = arith.constant 0 : index
    %c0_21 = arith.constant 0 : index
    %29 = vector.load %arg16[%c0_20, %c0_21] : memref<8x1408xf32, #tpu.memory_space<vmem>>, vector<8x1408xf32>
    tpu.vector_store %arg16[%c0_20, %c0_21], %28 {strides = array<i32>} : memref<8x1408xf32, #tpu.memory_space<vmem>>, vector<8x1408xf32>,
    %30 = vector.extract_strided_slice %27 {offsets = [0, 0], sizes = [8, 1920], strides = [1, 1]} : vector<8x2048xf32> to vector<8x1920xf32>
    %31 = vector.extract_strided_slice %27 {offsets = [0, 128], sizes = [8, 1920], strides = [1, 1]} : vector<8x2048xf32> to vector<8x1920xf32>
    %32 = arith.maximumf %30, %31 : vector<8x1920xf32>
    %33 = vector.extract_strided_slice %32 {offsets = [0, 0], sizes = [8, 1919], strides = [1, 1]} : vector<8x1920xf32> to vector<8x1919xf32>
    %34 = vector.extract_strided_slice %32 {offsets = [0, 1], sizes = [8, 1919], strides = [1, 1]} : vector<8x1920xf32> to vector<8x1919xf32>
    %35 = arith.maximumf %33, %34 : vector<8x1919xf32>
    %c0_22 = arith.constant 0 : index
    %c0_23 = arith.constant 0 : index
    %36 = vector.load %arg10[%c0_22, %c0_23] : memref<16x8xf32, #tpu.memory_space<vmem>>, vector<16x8xf32>
    %37 = vector.extract_strided_slice %35 {offsets = [0, 0], sizes = [8, 16], strides = [1, 1]} : vector<8x1919xf32> to vector<8x16xf32>
    %cst_24 = arith.constant dense<0.000000e+00> : vector<8x8xf32>
    %38 = tpu.matmul %37, %36, %cst_24 {dimension_numbers = #tpu.dot_dimension_numbers<[1], [0], [0], [1], [0, 0, 1, 1], [], []>} : vector<8x16xf32>, vector<16x8xf32>, vector<8x8xf32> -> vector<8x8xf32>
    %c0_25 = arith.constant 0 : index
    %c129 = arith.constant 129 : index
    %39 = vector.load %arg16[%c0_25, %c129] : memref<8x1408xf32, #tpu.memory_space<vmem>>, vector<8x8xf32>
    tpu.vector_store %arg16[%c0_25, %c129], %38 {strides = array<i32>} : memref<8x1408xf32, #tpu.memory_space<vmem>>, vector<8x8xf32>,
    %40 = vector.extract_strided_slice %35 {offsets = [0, 256], sizes = [8, 16], strides = [1, 1]} : vector<8x1919xf32> to vector<8x16xf32>
    %cst_26 = arith.constant dense<0.000000e+00> : vector<8x8xf32>
    %41 = tpu.matmul %40, %36, %cst_26 {dimension_numbers = #tpu.dot_dimension_numbers<[1], [0], [0], [1], [0, 0, 1, 1], [], []>} : vector<8x16xf32>, vector<16x8xf32>, vector<8x8xf32> -> vector<8x8xf32>
    %c0_27 = arith.constant 0 : index
    %c257 = arith.constant 257 : index
    %42 = vector.load %arg16[%c0_27, %c257] : memref<8x1408xf32, #tpu.memory_space<vmem>>, vector<8x8xf32>
    tpu.vector_store %arg16[%c0_27, %c257], %41 {strides = array<i32>} : memref<8x1408xf32, #tpu.memory_space<vmem>>, vector<8x8xf32>,
    %43 = vector.extract_strided_slice %35 {offsets = [0, 512], sizes = [8, 16], strides = [1, 1]} : vector<8x1919xf32> to vector<8x16xf32>
    %cst_28 = arith.constant dense<0.000000e+00> : vector<8x8xf32>
    %44 = tpu.matmul %43, %36, %cst_28 {dimension_numbers = #tpu.dot_dimension_numbers<[1], [0], [0], [1], [0, 0, 1, 1], [], []>} : vector<8x16xf32>, vector<16x8xf32>, vector<8x8xf32> -> vector<8x8xf32>
    %c0_29 = arith.constant 0 : index
    %c385 = arith.constant 385 : index
    %45 = vector.load %arg16[%c0_29, %c385] : memref<8x1408xf32, #tpu.memory_space<vmem>>, vector<8x8xf32>
    tpu.vector_store %arg16[%c0_29, %c385], %44 {strides = array<i32>} : memref<8x1408xf32, #tpu.memory_space<vmem>>, vector<8x8xf32>,
    %46 = vector.extract_strided_slice %35 {offsets = [0, 768], sizes = [8, 16], strides = [1, 1]} : vector<8x1919xf32> to vector<8x16xf32>
    %cst_30 = arith.constant dense<0.000000e+00> : vector<8x8xf32>
    %47 = tpu.matmul %46, %36, %cst_30 {dimension_numbers = #tpu.dot_dimension_numbers<[1], [0], [0], [1], [0, 0, 1, 1], [], []>} : vector<8x16xf32>, vector<16x8xf32>, vector<8x8xf32> -> vector<8x8xf32>
    %c0_31 = arith.constant 0 : index
    %c513 = arith.constant 513 : index
    %48 = vector.load %arg16[%c0_31, %c513] : memref<8x1408xf32, #tpu.memory_space<vmem>>, vector<8x8xf32>
    tpu.vector_store %arg16[%c0_31, %c513], %47 {strides = array<i32>} : memref<8x1408xf32, #tpu.memory_space<vmem>>, vector<8x8xf32>,
    %49 = vector.extract_strided_slice %35 {offsets = [0, 1024], sizes = [8, 16], strides = [1, 1]} : vector<8x1919xf32> to vector<8x16xf32>
    %cst_32 = arith.constant dense<0.000000e+00> : vector<8x8xf32>
    %50 = tpu.matmul %49, %36, %cst_32 {dimension_numbers = #tpu.dot_dimension_numbers<[1], [0], [0], [1], [0, 0, 1, 1], [], []>} : vector<8x16xf32>, vector<16x8xf32>, vector<8x8xf32> -> vector<8x8xf32>
    %c0_33 = arith.constant 0 : index
    %c641 = arith.constant 641 : index
    %51 = vector.load %arg16[%c0_33, %c641] : memref<8x1408xf32, #tpu.memory_space<vmem>>, vector<8x8xf32>
    tpu.vector_store %arg16[%c0_33, %c641], %50 {strides = array<i32>} : memref<8x1408xf32, #tpu.memory_space<vmem>>, vector<8x8xf32>,
    %52 = vector.extract_strided_slice %35 {offsets = [0, 1280], sizes = [8, 16], strides = [1, 1]} : vector<8x1919xf32> to vector<8x16xf32>
    %cst_34 = arith.constant dense<0.000000e+00> : vector<8x8xf32>
    %53 = tpu.matmul %52, %36, %cst_34 {dimension_numbers = #tpu.dot_dimension_numbers<[1], [0], [0], [1], [0, 0, 1, 1], [], []>} : vector<8x16xf32>, vector<16x8xf32>, vector<8x8xf32> -> vector<8x8xf32>
    %c0_35 = arith.constant 0 : index
    %c769 = arith.constant 769 : index
    %54 = vector.load %arg16[%c0_35, %c769] : memref<8x1408xf32, #tpu.memory_space<vmem>>, vector<8x8xf32>
    tpu.vector_store %arg16[%c0_35, %c769], %53 {strides = array<i32>} : memref<8x1408xf32, #tpu.memory_space<vmem>>, vector<8x8xf32>,
    %55 = vector.extract_strided_slice %35 {offsets = [0, 1536], sizes = [8, 16], strides = [1, 1]} : vector<8x1919xf32> to vector<8x16xf32>
    %cst_36 = arith.constant dense<0.000000e+00> : vector<8x8xf32>
    %56 = tpu.matmul %55, %36, %cst_36 {dimension_numbers = #tpu.dot_dimension_numbers<[1], [0], [0], [1], [0, 0, 1, 1], [], []>} : vector<8x16xf32>, vector<16x8xf32>, vector<8x8xf32> -> vector<8x8xf32>
    %c0_37 = arith.constant 0 : index
    %c897 = arith.constant 897 : index
    %57 = vector.load %arg16[%c0_37, %c897] : memref<8x1408xf32, #tpu.memory_space<vmem>>, vector<8x8xf32>
    tpu.vector_store %arg16[%c0_37, %c897], %56 {strides = array<i32>} : memref<8x1408xf32, #tpu.memory_space<vmem>>, vector<8x8xf32>,
    %58 = vector.extract_strided_slice %35 {offsets = [0, 1792], sizes = [8, 16], strides = [1, 1]} : vector<8x1919xf32> to vector<8x16xf32>
    %cst_38 = arith.constant dense<0.000000e+00> : vector<8x8xf32>
    %59 = tpu.matmul %58, %36, %cst_38 {dimension_numbers = #tpu.dot_dimension_numbers<[1], [0], [0], [1], [0, 0, 1, 1], [], []>} : vector<8x16xf32>, vector<16x8xf32>, vector<8x8xf32> -> vector<8x8xf32>
    %c0_39 = arith.constant 0 : index
    %c1025 = arith.constant 1025 : index
    %60 = vector.load %arg16[%c0_39, %c1025] : memref<8x1408xf32, #tpu.memory_space<vmem>>, vector<8x8xf32>
    tpu.vector_store %arg16[%c0_39, %c1025], %59 {strides = array<i32>} : memref<8x1408xf32, #tpu.memory_space<vmem>>, vector<8x8xf32>,
    %c0_40 = arith.constant 0 : index
    %c0_41 = arith.constant 0 : index
    %61 = vector.load %arg16[%c0_40, %c0_41] : memref<8x1408xf32, #tpu.memory_space<vmem>>, vector<8x1408xf32>
    %62 = vector.extract_strided_slice %61 {offsets = [0, 0], sizes = [8, 1024], strides = [1, 1]} : vector<8x1408xf32> to vector<8x1024xf32>
    %c0_42 = arith.constant 0 : index
    %c0_43 = arith.constant 0 : index
    %63 = vector.load %arg17[%c0_42, %c0_43] : memref<72x1024xf32, #tpu.memory_space<vmem>>, vector<8x1024xf32>
    tpu.vector_store %arg17[%c0_42, %c0_43], %62 {strides = array<i32>} : memref<72x1024xf32, #tpu.memory_space<vmem>>, vector<8x1024xf32>,
    %64 = vector.extract_strided_slice %61 {offsets = [0, 1], sizes = [8, 1024], strides = [1, 1]} : vector<8x1408xf32> to vector<8x1024xf32>
    %c8_44 = arith.constant 8 : index
    %c0_45 = arith.constant 0 : index
    %65 = vector.load %arg17[%c8_44, %c0_45] : memref<72x1024xf32, #tpu.memory_space<vmem>>, vector<8x1024xf32>
    tpu.vector_store %arg17[%c8_44, %c0_45], %64 {strides = array<i32>} : memref<72x1024xf32, #tpu.memory_space<vmem>>, vector<8x1024xf32>,
    %66 = vector.extract_strided_slice %61 {offsets = [0, 2], sizes = [8, 1024], strides = [1, 1]} : vector<8x1408xf32> to vector<8x1024xf32>
    %c16_46 = arith.constant 16 : index
    %c0_47 = arith.constant 0 : index
    %67 = vector.load %arg17[%c16_46, %c0_47] : memref<72x1024xf32, #tpu.memory_space<vmem>>, vector<8x1024xf32>
    tpu.vector_store %arg17[%c16_46, %c0_47], %66 {strides = array<i32>} : memref<72x1024xf32, #tpu.memory_space<vmem>>, vector<8x1024xf32>,
    %68 = vector.extract_strided_slice %61 {offsets = [0, 128], sizes = [8, 1024], strides = [1, 1]} : vector<8x1408xf32> to vector<8x1024xf32>
    %c24_48 = arith.constant 24 : index
    %c0_49 = arith.constant 0 : index
    %69 = vector.load %arg17[%c24_48, %c0_49] : memref<72x1024xf32, #tpu.memory_space<vmem>>, vector<8x1024xf32>
    tpu.vector_store %arg17[%c24_48, %c0_49], %68 {strides = array<i32>} : memref<72x1024xf32, #tpu.memory_space<vmem>>, vector<8x1024xf32>,
    %70 = vector.extract_strided_slice %61 {offsets = [0, 129], sizes = [8, 1024], strides = [1, 1]} : vector<8x1408xf32> to vector<8x1024xf32>
    %c32_50 = arith.constant 32 : index
    %c0_51 = arith.constant 0 : index
    %71 = vector.load %arg17[%c32_50, %c0_51] : memref<72x1024xf32, #tpu.memory_space<vmem>>, vector<8x1024xf32>
    tpu.vector_store %arg17[%c32_50, %c0_51], %70 {strides = array<i32>} : memref<72x1024xf32, #tpu.memory_space<vmem>>, vector<8x1024xf32>,
    %72 = vector.extract_strided_slice %61 {offsets = [0, 130], sizes = [8, 1024], strides = [1, 1]} : vector<8x1408xf32> to vector<8x1024xf32>
    %c40 = arith.constant 40 : index
    %c0_52 = arith.constant 0 : index
    %73 = vector.load %arg17[%c40, %c0_52] : memref<72x1024xf32, #tpu.memory_space<vmem>>, vector<8x1024xf32>
    tpu.vector_store %arg17[%c40, %c0_52], %72 {strides = array<i32>} : memref<72x1024xf32, #tpu.memory_space<vmem>>, vector<8x1024xf32>,
    %74 = vector.extract_strided_slice %61 {offsets = [0, 256], sizes = [8, 1024], strides = [1, 1]} : vector<8x1408xf32> to vector<8x1024xf32>
    %c48 = arith.constant 48 : index
    %c0_53 = arith.constant 0 : index
    %75 = vector.load %arg17[%c48, %c0_53] : memref<72x1024xf32, #tpu.memory_space<vmem>>, vector<8x1024xf32>
    tpu.vector_store %arg17[%c48, %c0_53], %74 {strides = array<i32>} : memref<72x1024xf32, #tpu.memory_space<vmem>>, vector<8x1024xf32>,
    %76 = vector.extract_strided_slice %61 {offsets = [0, 257], sizes = [8, 1024], strides = [1, 1]} : vector<8x1408xf32> to vector<8x1024xf32>
    %c56 = arith.constant 56 : index
    %c0_54 = arith.constant 0 : index
    %77 = vector.load %arg17[%c56, %c0_54] : memref<72x1024xf32, #tpu.memory_space<vmem>>, vector<8x1024xf32>
    tpu.vector_store %arg17[%c56, %c0_54], %76 {strides = array<i32>} : memref<72x1024xf32, #tpu.memory_space<vmem>>, vector<8x1024xf32>,
    %78 = vector.extract_strided_slice %61 {offsets = [0, 258], sizes = [8, 1024], strides = [1, 1]} : vector<8x1408xf32> to vector<8x1024xf32>
    %c64 = arith.constant 64 : index
    %c0_55 = arith.constant 0 : index
    %79 = vector.load %arg17[%c64, %c0_55] : memref<72x1024xf32, #tpu.memory_space<vmem>>, vector<8x1024xf32>
    tpu.vector_store %arg17[%c64, %c0_55], %78 {strides = array<i32>} : memref<72x1024xf32, #tpu.memory_space<vmem>>, vector<8x1024xf32>,
    %c0_56 = arith.constant 0 : index
    %c0_57 = arith.constant 0 : index
    %80 = vector.load %arg4[%c0_56, %c0_57] : memref<16x72xf32, #tpu.memory_space<vmem>>, vector<16x72xf32>
    %c0_58 = arith.constant 0 : index
    %c0_59 = arith.constant 0 : index
    %81 = vector.load %arg17[%c0_58, %c0_59] : memref<72x1024xf32, #tpu.memory_space<vmem>>, vector<72x1024xf32>
    %cst_60 = arith.constant dense<0.000000e+00> : vector<16x1024xf32>
    %82 = tpu.matmul %80, %81, %cst_60 {dimension_numbers = #tpu.dot_dimension_numbers<[1], [0], [0], [1], [0, 0, 1, 1], [], []>} : vector<16x72xf32>, vector<72x1024xf32>, vector<16x1024xf32> -> vector<16x1024xf32>
    %c0_61 = arith.constant 0 : index
    %c0_62 = arith.constant 0 : index
    %83 = vector.load %arg5[%c0_61, %c0_62] : memref<16x1xf32, #tpu.memory_space<vmem>>, vector<16x1xf32>
    %84 = vector.broadcast %83 : vector<16x1xf32> to vector<16x1024xf32>
    %85 = arith.addf %82, %84 : vector<16x1024xf32>
    %cst_63 = arith.constant 0.000000e+00 : f32
    %86 = vector.broadcast %cst_63 : f32 to vector<16x1024xf32>
    %87 = arith.maximumf %85, %86 : vector<16x1024xf32>
    %88 = vector.extract_strided_slice %87 {offsets = [0, 0], sizes = [16, 896], strides = [1, 1]} : vector<16x1024xf32> to vector<16x896xf32>
    %89 = vector.extract_strided_slice %87 {offsets = [0, 128], sizes = [16, 896], strides = [1, 1]} : vector<16x1024xf32> to vector<16x896xf32>
    %90 = arith.maximumf %88, %89 : vector<16x896xf32>
    %91 = vector.extract_strided_slice %90 {offsets = [0, 0], sizes = [16, 895], strides = [1, 1]} : vector<16x896xf32> to vector<16x895xf32>
    %92 = vector.extract_strided_slice %90 {offsets = [0, 1], sizes = [16, 895], strides = [1, 1]} : vector<16x896xf32> to vector<16x895xf32>
    %93 = arith.maximumf %91, %92 : vector<16x895xf32>
    %c0_64 = arith.constant 0 : index
    %c0_65 = arith.constant 0 : index
    %94 = vector.load %arg11[%c0_64, %c0_65] : memref<8x4xf32, #tpu.memory_space<vmem>>, vector<8x4xf32>
    %95 = vector.extract_strided_slice %93 {offsets = [0, 0], sizes = [16, 8], strides = [1, 1]} : vector<16x895xf32> to vector<16x8xf32>
    %cst_66 = arith.constant dense<0.000000e+00> : vector<16x4xf32>
    %96 = tpu.matmul %95, %94, %cst_66 {dimension_numbers = #tpu.dot_dimension_numbers<[1], [0], [0], [1], [0, 0, 1, 1], [], []>} : vector<16x8xf32>, vector<8x4xf32>, vector<16x4xf32> -> vector<16x4xf32>
    %c0_67 = arith.constant 0 : index
    %c0_68 = arith.constant 0 : index
    %97 = vector.load %arg18[%c0_67, %c0_68] : memref<16x16xf32, #tpu.memory_space<vmem>>, vector<16x4xf32>
    tpu.vector_store %arg18[%c0_67, %c0_68], %96 {strides = array<i32>} : memref<16x16xf32, #tpu.memory_space<vmem>>, vector<16x4xf32>,
    %98 = vector.extract_strided_slice %93 {offsets = [0, 256], sizes = [16, 8], strides = [1, 1]} : vector<16x895xf32> to vector<16x8xf32>
    %cst_69 = arith.constant dense<0.000000e+00> : vector<16x4xf32>
    %99 = tpu.matmul %98, %94, %cst_69 {dimension_numbers = #tpu.dot_dimension_numbers<[1], [0], [0], [1], [0, 0, 1, 1], [], []>} : vector<16x8xf32>, vector<8x4xf32>, vector<16x4xf32> -> vector<16x4xf32>
    %c0_70 = arith.constant 0 : index
    %c4_71 = arith.constant 4 : index
    %100 = vector.load %arg18[%c0_70, %c4_71] : memref<16x16xf32, #tpu.memory_space<vmem>>, vector<16x4xf32>
    tpu.vector_store %arg18[%c0_70, %c4_71], %99 {strides = array<i32>} : memref<16x16xf32, #tpu.memory_space<vmem>>, vector<16x4xf32>,
    %101 = vector.extract_strided_slice %93 {offsets = [0, 512], sizes = [16, 8], strides = [1, 1]} : vector<16x895xf32> to vector<16x8xf32>
    %cst_72 = arith.constant dense<0.000000e+00> : vector<16x4xf32>
    %102 = tpu.matmul %101, %94, %cst_72 {dimension_numbers = #tpu.dot_dimension_numbers<[1], [0], [0], [1], [0, 0, 1, 1], [], []>} : vector<16x8xf32>, vector<8x4xf32>, vector<16x4xf32> -> vector<16x4xf32>
    %c0_73 = arith.constant 0 : index
    %c8_74 = arith.constant 8 : index
    %103 = vector.load %arg18[%c0_73, %c8_74] : memref<16x16xf32, #tpu.memory_space<vmem>>, vector<16x4xf32>
    tpu.vector_store %arg18[%c0_73, %c8_74], %102 {strides = array<i32>} : memref<16x16xf32, #tpu.memory_space<vmem>>, vector<16x4xf32>,
    %104 = vector.extract_strided_slice %93 {offsets = [0, 768], sizes = [16, 8], strides = [1, 1]} : vector<16x895xf32> to vector<16x8xf32>
    %cst_75 = arith.constant dense<0.000000e+00> : vector<16x4xf32>
    %105 = tpu.matmul %104, %94, %cst_75 {dimension_numbers = #tpu.dot_dimension_numbers<[1], [0], [0], [1], [0, 0, 1, 1], [], []>} : vector<16x8xf32>, vector<8x4xf32>, vector<16x4xf32> -> vector<16x4xf32>
    %c0_76 = arith.constant 0 : index
    %c12_77 = arith.constant 12 : index
    %106 = vector.load %arg18[%c0_76, %c12_77] : memref<16x16xf32, #tpu.memory_space<vmem>>, vector<16x4xf32>
    tpu.vector_store %arg18[%c0_76, %c12_77], %105 {strides = array<i32>} : memref<16x16xf32, #tpu.memory_space<vmem>>, vector<16x4xf32>,
    %c0_78 = arith.constant 0 : index
    %c0_79 = arith.constant 0 : index
    %107 = vector.load %arg6[%c0_78, %c0_79] : memref<32x16xf32, #tpu.memory_space<vmem>>, vector<32x16xf32>
    %c0_80 = arith.constant 0 : index
    %c0_81 = arith.constant 0 : index
    %108 = vector.load %arg18[%c0_80, %c0_81] : memref<16x16xf32, #tpu.memory_space<vmem>>, vector<16x16xf32>
    %cst_82 = arith.constant dense<0.000000e+00> : vector<32x16xf32>
    %109 = tpu.matmul %107, %108, %cst_82 {dimension_numbers = #tpu.dot_dimension_numbers<[1], [0], [0], [1], [0, 0, 1, 1], [], []>} : vector<32x16xf32>, vector<16x16xf32>, vector<32x16xf32> -> vector<32x16xf32>
    %c0_83 = arith.constant 0 : index
    %c0_84 = arith.constant 0 : index
    %110 = vector.load %arg7[%c0_83, %c0_84] : memref<32x1xf32, #tpu.memory_space<vmem>>, vector<32x1xf32>
    %111 = vector.broadcast %110 : vector<32x1xf32> to vector<32x16xf32>
    %112 = arith.addf %109, %111 : vector<32x16xf32>
    %cst_85 = arith.constant 0.000000e+00 : f32
    %113 = vector.broadcast %cst_85 : f32 to vector<32x16xf32>
    %114 = arith.maximumf %112, %113 : vector<32x16xf32>
    %c0_86 = arith.constant 0 : index
    %c0_87 = arith.constant 0 : index
    %115 = vector.load %arg8[%c0_86, %c0_87] : memref<5x32xf32, #tpu.memory_space<vmem>>, vector<5x32xf32>
    %cst_88 = arith.constant dense<0.000000e+00> : vector<5x16xf32>
    %116 = tpu.matmul %115, %114, %cst_88 {dimension_numbers = #tpu.dot_dimension_numbers<[1], [0], [0], [1], [0, 0, 1, 1], [], []>} : vector<5x32xf32>, vector<32x16xf32>, vector<5x16xf32> -> vector<5x16xf32>
    %c0_89 = arith.constant 0 : index
    %c0_90 = arith.constant 0 : index
    %117 = vector.load %arg9[%c0_89, %c0_90] : memref<5x1xf32, #tpu.memory_space<vmem>>, vector<5x1xf32>
    %118 = vector.broadcast %117 : vector<5x1xf32> to vector<5x16xf32>
    %119 = arith.addf %116, %118 : vector<5x16xf32>
    %c0_91 = arith.constant 0 : index
    %c0_92 = arith.constant 0 : index
    %c0_93 = arith.constant 0 : index
    %120 = vector.load %arg13[%c0_91, %c0_92, %c0_93] : memref<1x5x16xf32, #tpu.memory_space<vmem>>, vector<1x5x16xf32>
    %121 = vector.shape_cast %120 : vector<1x5x16xf32> to vector<5x16xf32>
    %122 = vector.shape_cast %119 : vector<5x16xf32> to vector<1x5x16xf32>
    tpu.vector_store %arg13[%c0_91, %c0_92, %c0_93], %122 {strides = array<i32>} : memref<1x5x16xf32, #tpu.memory_space<vmem>>, vector<1x5x16xf32>,
    %c0_94 = arith.constant 0 : index
    %c0_95 = arith.constant 0 : index
    %123 = vector.load %arg12[%c0_94, %c0_95] : memref<16x256xf32, #tpu.memory_space<vmem>>, vector<16x256xf32>
    %cst_96 = arith.constant dense<0.000000e+00> : vector<5x256xf32>
    %124 = tpu.matmul %119, %123, %cst_96 {dimension_numbers = #tpu.dot_dimension_numbers<[1], [0], [0], [1], [0, 0, 1, 1], [], []>} : vector<5x16xf32>, vector<16x256xf32>, vector<5x256xf32> -> vector<5x256xf32>
    %c0_97 = arith.constant 0 : index
    %c0_98 = arith.constant 0 : index
    %c0_99 = arith.constant 0 : index
    %125 = vector.load %arg14[%c0_97, %c0_98, %c0_99] : memref<1x5x256xf32, #tpu.memory_space<vmem>>, vector<1x5x256xf32>
    %126 = vector.shape_cast %125 : vector<1x5x256xf32> to vector<5x256xf32>
    %127 = vector.shape_cast %124 : vector<5x256xf32> to vector<1x5x256xf32>
    tpu.vector_store %arg14[%c0_97, %c0_98, %c0_99], %127 {strides = array<i32>} : memref<1x5x256xf32, #tpu.memory_space<vmem>>, vector<1x5x256xf32>,
    return
  }
  func.func @transform_0(%arg0: i32) -> (i32, i32, i32) {
    %c0_i32 = arith.constant 0 : i32
    %c0_i32_0 = arith.constant 0 : i32
    %c0_i32_1 = arith.constant 0 : i32
    return %arg0, %c0_i32, %c0_i32_0 : i32, i32, i32
  }
  func.func @transform_1(%arg0: i32) -> (i32, i32) {
    %c0_i32 = arith.constant 0 : i32
    %c0_i32_0 = arith.constant 0 : i32
    %c0_i32_1 = arith.constant 0 : i32
    return %c0_i32, %c0_i32_0 : i32, i32
  }
  func.func @transform_2(%arg0: i32) -> (i32, i32) {
    %c0_i32 = arith.constant 0 : i32
    %c0_i32_0 = arith.constant 0 : i32
    %c0_i32_1 = arith.constant 0 : i32
    return %c0_i32, %c0_i32_0 : i32, i32
  }
  func.func @transform_3(%arg0: i32) -> (i32, i32) {
    %c0_i32 = arith.constant 0 : i32
    %c0_i32_0 = arith.constant 0 : i32
    %c0_i32_1 = arith.constant 0 : i32
    return %c0_i32, %c0_i32_0 : i32, i32
  }
  func.func @transform_4(%arg0: i32) -> (i32, i32) {
    %c0_i32 = arith.constant 0 : i32
    %c0_i32_0 = arith.constant 0 : i32
    %c0_i32_1 = arith.constant 0 : i32
    return %c0_i32, %c0_i32_0 : i32, i32
  }
  func.func @transform_5(%arg0: i32) -> (i32, i32) {
    %c0_i32 = arith.constant 0 : i32
    %c0_i32_0 = arith.constant 0 : i32
    %c0_i32_1 = arith.constant 0 : i32
    return %c0_i32, %c0_i32_0 : i32, i32
  }
  func.func @transform_6(%arg0: i32) -> (i32, i32) {
    %c0_i32 = arith.constant 0 : i32
    %c0_i32_0 = arith.constant 0 : i32
    %c0_i32_1 = arith.constant 0 : i32
    return %c0_i32, %c0_i32_0 : i32, i32
  }
  func.func @transform_7(%arg0: i32) -> (i32, i32) {
    %c0_i32 = arith.constant 0 : i32
    %c0_i32_0 = arith.constant 0 : i32
    %c0_i32_1 = arith.constant 0 : i32
    return %c0_i32, %c0_i32_0 : i32, i32
  }
  func.func @transform_8(%arg0: i32) -> (i32, i32) {
    %c0_i32 = arith.constant 0 : i32
    %c0_i32_0 = arith.constant 0 : i32
    %c0_i32_1 = arith.constant 0 : i32
    return %c0_i32, %c0_i32_0 : i32, i32
  }
  func.func @transform_9(%arg0: i32) -> (i32, i32) {
    %c0_i32 = arith.constant 0 : i32
    %c0_i32_0 = arith.constant 0 : i32
    %c0_i32_1 = arith.constant 0 : i32
    return %c0_i32, %c0_i32_0 : i32, i32
  }
  func.func @transform_10(%arg0: i32) -> (i32, i32) {
    %c0_i32 = arith.constant 0 : i32
    %c0_i32_0 = arith.constant 0 : i32
    %c0_i32_1 = arith.constant 0 : i32
    return %c0_i32, %c0_i32_0 : i32, i32
  }
  func.func @transform_11(%arg0: i32) -> (i32, i32) {
    %c0_i32 = arith.constant 0 : i32
    %c0_i32_0 = arith.constant 0 : i32
    %c0_i32_1 = arith.constant 0 : i32
    return %c0_i32, %c0_i32_0 : i32, i32
  }
  func.func @transform_12(%arg0: i32) -> (i32, i32, i32) {
    %c0_i32 = arith.constant 0 : i32
    %c0_i32_0 = arith.constant 0 : i32
    %c0_i32_1 = arith.constant 0 : i32
    return %arg0, %c0_i32, %c0_i32_0 : i32, i32, i32
  }
  func.func @transform_13(%arg0: i32) -> (i32, i32, i32) {
    %c0_i32 = arith.constant 0 : i32
    %c0_i32_0 = arith.constant 0 : i32
    %c0_i32_1 = arith.constant 0 : i32
    return %arg0, %c0_i32, %c0_i32_0 : i32, i32, i32
  }
}

</mosaic_0001>

<bundles_post_ra>
// kernel: fcn_forward.1
= control target key start
LH: loop header
LB: loop body
LE: loop exit
PB: predicated region body
PF: predicated region fallthrough
CT: control target
= control target key end

     0   :  { %s3305_s25 = smov 0   ;;  %s4274_s0 = inlined_call_operand.vmem [shape: f32[2,4,2432], index: 0, kind: input, shape index: {}]   ;;  %s4275_s1 = inlined_call_operand.vmem [shape: f32[8,36], index: 1, kind: input, shape index: {}]   ;;  %s4276_s2 = inlined_call_operand.vmem [shape: f32[8,1], index: 2, kind: input, shape index: {}]   ;;  %s4277_s3 = inlined_call_operand.vmem [shape: f32[16,72], index: 3, kind: input, shape index: {}]   ;;  %s4278_s4 = inlined_call_operand.vmem [shape: f32[16,1], index: 4, kind: input, shape index: {}]   ;;  %s4279_s5 = inlined_call_operand.vmem [shape: f32[32,16], index: 5, kind: input, shape index: {}]   ;;  %s4280_s6 = inlined_call_operand.vmem [shape: f32[32,1], index: 6, kind: input, shape index: {}]   ;;  %s4281_s7 = inlined_call_operand.vmem [shape: f32[5,32], index: 7, kind: input, shape index: {}]   ;;  %s4282_s8 = inlined_call_operand.vmem [shape: f32[5,1], index: 8, kind: input, shape index: {}]   ;;  %s4283_s9 = inlined_call_operand.vmem [shape: f32[16,8], index: 9, kind: input, shape index: {}]   ;;  %s4284_s10 = inlined_call_operand.vmem [shape: f32[8,4], index: 10, kind: input, shape index: {}]   ;;  %s4285_s11 = inlined_call_operand.vmem [shape: f32[16,256], index: 11, kind: input, shape index: {}]   ;;  %s4286_s12 = inlined_call_operand.vmem [shape: f32[2,5,16], index: 12, kind: output, shape index: {0}]   ;;  %s4287_s13 = inlined_call_operand.vmem [shape: f32[2,5,256], index: 13, kind: output, shape index: {1}]  }
   0x1 LB: > { %s3066_s26 = sadd.s32 4294967295, %s3225_s25   ;;  %p3070_p0 = scmp.ge.s32.totalorder %s3225_s25, 1  ;;  %s3225_s25 = sphi %s3305_s25, %s24_s25  }
   0x2   : > { %p390_p1 = scmp.lt.s32.totalorder %s3225_s25, 3 }
   0x4   : > { %p391_p2 = pnand %p3070_p0, %p390_p1 }
   0x5   : > { %p438_p3 = scmp.lt.s32.totalorder (!%p391_p2), %s3066_s26, 1  ;;  %s3227_s14 = smov (!%p391_p2), 127  }
   0x6   : > { %394 = sbr.rel (%p391_p2) target bundleno = 2067 (0x813), region = 68  ;;  %s3228_s15 = smov (!%p391_p2), 126  }
   0x7   : > { %s3230_s24 = smov (!%p391_p2), 1   ;;  %s3233_s21 = smov (!%p391_p2), 8  }
   0x8   : > { %s3234_s22 = smov (!%p391_p2), 12  }
   0xb   : > { %s4289_s26 = smov (!%p438_p3, %s3066_s26), 1  ;;  %vm594_vm0 = vcmask 1039360   ;;  %vm706_vm1 = vcmask 1031168   ;;  %vm1413_vm2 = vcmask 1043456   ;;  %vm1409_vm3 = vcmask 293888  }
   0xc   : > { %s3149_s27 = smul.u32 76, %s4289_s26  ;;  %vm1894_vm4 = vcmask 130048   ;;  %vm1922_vm5 = vcmask 72712   ;;  %vm2384_vm6 = vcmask 588800   ;;  %vm2670_vm7 = vcmask 64512  }
   0xd   : > { %vm2700_vm8 = vcmask 31744   ;;  %vm2740_vm9 = vcmask 64544   ;;  %vm2780_vm10 = vcmask 97344   ;;  %vm2820_vm11 = vcmask 130144  }
   0xe   : > { %s3319_s30 = scalar_lea.vmem %s4274_s0, %s3149_s27  ;;  %vm2905_vm12 = vcmask 261120   ;;  %vm2929_vm13 = vcmask 126976   ;;  %s3148_s27 = sshll.u32 %s4289_s26, 4 }
   0xf   : > { %v3322_v0 = vld [vmem:[%s3319_s30] sm:$0xff]  ;;  %v3326_v1 = vld [vmem:[%s3319_s30 + $0x10] sm:$0xff]  ;;  %v3329_v2 = vld [vmem:[%s3319_s30 + $0x8] sm:$0xff] }
  0x10   : > { %470 = vst [vmem:[#allocation1] ss:$2 sm:$0xff] %v3322_v0  ;;  %v3333_v3 = vld [vmem:[%s3319_s30 + $0x18] sm:$0xff]  ;;  %v3338_v4 = vld [vmem:[%s3319_s30 + $0x20] sm:$0xff]  ;;  %v3342_v7 = vld [vmem:[%s3319_s30 + $0x30] sm:$0xff] }
  0x11   : > { %474 = vst [vmem:[#allocation1 + $0x20] ss:$2 sm:$0xff] %v3326_v1  ;;  %v3346_v11 = vld [vmem:[%s3319_s30 + $0x28] sm:$0xff]  ;;  %v3355_v22 = vld [vmem:[%s3319_s30 + $0x38] sm:$0xff]  ;;  %v3379_v35 = vld [vmem:[%s3319_s30 + $0x40] sm:$0xff] }
  0x12   : > { %472 = vst [vmem:[#allocation1 + $0x10] ss:$2 sm:$0xff] %v3329_v2 }
  0x13   : > { %476 = vst [vmem:[#allocation1 + $0x30] ss:$2 sm:$0xff] %v3333_v3 }
  0x17   : > { %v477_v5 = vld.sshfl [vmem:[#allocation1] sm:$0xff pattern:$0x75316420]  ;;  %v478_v6 = vld.sshfl [vmem:[#allocation1 + $0x8] sm:$0xff pattern:$0x75316420] }
  0x18   : > { %485 = vst [vmem:[#allocation1] ss:$2 sm:$0xff] %v3338_v4  ;;  %v481_v8 = vld.sshfl [vmem:[#allocation1 + $0x20] sm:$0xff pattern:$0x75316420] }
  0x19   : > { %513 = vst [vmem:[#allocation2 + $0xc8] sm:$0xf] %v477_v5  ;;  %v482_v9 = vld.sshfl [vmem:[#allocation1 + $0x28] sm:$0xff pattern:$0x75316420] }
  0x1a   : > { %514 = vst [vmem:[#allocation2 + $0x8] sm:$0xf] %v478_v6  ;;  %v479_v10 = vld.sshfl [vmem:[#allocation1 + $0x10] sm:$0xff pattern:$0x75316420] }
  0x1b   : > { %487 = vst [vmem:[#allocation1 + $0x20] ss:$2 sm:$0xff] %v3342_v7  ;;  %v480_v12 = vld.sshfl [vmem:[#allocation1 + $0x18] sm:$0xff pattern:$0x75316420] }
  0x1c   : > { %517 = vst [vmem:[#allocation2 + $0xe8] sm:$0xf] %v481_v8  ;;  %v483_v20 = vld.sshfl [vmem:[#allocation1 + $0x30] sm:$0xff pattern:$0x75316420] }
  0x1d   : > { %518 = vst [vmem:[#allocation2 + $0xf0] sm:$0xf] %v482_v9  ;;  %v484_v23 = vld.sshfl [vmem:[#allocation1 + $0x38] sm:$0xff pattern:$0x75316420] }
  0x1e   : > { %486 = vst [vmem:[#allocation1 + $0x10] ss:$2 sm:$0xff] %v3346_v11 }
  0x1f   : > { %v489_v13 = vld.sshfl [vmem:[#allocation1] sm:$0xff pattern:$0x75316420]  ;;  %v490_v14 = vld.sshfl [vmem:[#allocation1 + $0x8] sm:$0xff pattern:$0x75316420] }
  0x20   : > { %531 = vst [vmem:[#allocation1 + $0x1] ss:$2 sm:$0xff] %v3322_v0 }
  0x21   : > { %521 = vst [vmem:[#allocation2 + $0xd8] sm:$0xf] %v489_v13 }
  0x22   : > { %522 = vst [vmem:[#allocation2 + $0x148] sm:$0xf] %v490_v14  ;;  %v493_v15 = vld.sshfl [vmem:[#allocation1 + $0x20] sm:$0xff pattern:$0x75316420] }
  0x23   : > { %v494_v16 = vld.sshfl [vmem:[#allocation1 + $0x28] sm:$0xff pattern:$0x75316420]  ;;  %525 = vst [vmem:[#allocation2 + $0x220] sm:$0xf] %v493_v15 }
  0x24   : > { %535 = vst [vmem:[#allocation1 + $0x21] ss:$2 sm:$0xff] %v3326_v1 }
  0x25   : > { %526 = vst [vmem:[#allocation2 + $0xc0] sm:$0xf] %v494_v16  ;;  %v491_v17 = vld.sshfl [vmem:[#allocation1 + $0x10] sm:$0xff pattern:$0x75316420] }
  0x26   : > { %v492_v18 = vld.sshfl [vmem:[#allocation1 + $0x18] sm:$0xff pattern:$0x75316420]  ;;  %515 = vst [vmem:[#allocation2 + $0x40] sm:$0xf] %v479_v10 }
  0x27   : > { %v538_v19 = vld.sshfl [vmem:[#allocation1] sm:$0xff pattern:$0x75316420]  ;;  %533 = vst [vmem:[#allocation1 + $0x11] ss:$2 sm:$0xff] %v3329_v2 }
  0x28   : > { %560 = vrot.lane.b32.xlu2 %v538_v19, %s3227_s14  ;;  %516 = vst [vmem:[#allocation2 + $0x28] sm:$0xf] %v480_v12  ;;  %v539_v21 = vld.sshfl [vmem:[#allocation1 + $0x8] sm:$0xff pattern:$0x75316420] }
  0x29   : > { %523 = vst [vmem:[#allocation2 + $0x158] sm:$0xf] %v491_v17  ;;  %562 = vrot.lane.b32.xlu0 %v539_v21, %s3227_s14 }
  0x2a   : > { %524 = vst [vmem:[#allocation2 + $0x108] sm:$0xf] %v492_v18 }
  0x2b   : > { %v543_v24 = vld.sshfl [vmem:[#allocation1 + $0x28] sm:$0xff pattern:$0x75316420]  ;;  %546 = vst [vmem:[#allocation1 + $0x1] ss:$2 sm:$0xff] %v3338_v4 }
  0x2c   : > { %570 = vrot.lane.b32.xlu1 %v543_v24, %s3227_s14  ;;  %v542_v25 = vld.sshfl [vmem:[#allocation1 + $0x20] sm:$0xff pattern:$0x75316420]  ;;  %488 = vst [vmem:[#allocation1 + $0x30] ss:$2 sm:$0xff] %v3355_v22 }
  0x2d   : > { %548 = vst [vmem:[#allocation1 + $0x21] ss:$2 sm:$0xff] %v3342_v7 }
  0x2e   : > { %v540_v26 = vld.sshfl [vmem:[#allocation1 + $0x10] sm:$0xff pattern:$0x75316420]  ;;  %v541_v27 = vld.sshfl [vmem:[#allocation1 + $0x18] sm:$0xff pattern:$0x75316420] }
  0x2f   : > { %547 = vst [vmem:[#allocation1 + $0x11] ss:$2 sm:$0xff] %v3346_v11 }
  0x30   : > { %564 = vrot.lane.b32.xlu2 %v540_v26, %s3227_s14  ;;  %519 = vst [vmem:[#allocation2 + $0x70] sm:$0xf] %v483_v20 }
  0x31   : > { %566 = vrot.lane.b32.xlu0 %v541_v27, %s3227_s14  ;;  %520 = vst [vmem:[#allocation2 + $0x120] sm:$0xf] %v484_v23 }
  0x32   : > { %v3374_v34 = vld.sshfl [vmem:[#allocation1] sm:$0xff pattern:$0x75316420]  ;;  %v3381_v36 = vld.sshfl [vmem:[#allocation1 + $0x8] sm:$0xff pattern:$0x75316420] }
  0x33   : > { %v495_v28 = vld.sshfl [vmem:[#allocation1 + $0x30] sm:$0xff pattern:$0x75316420]  ;;  %v496_v31 = vld.sshfl [vmem:[#allocation1 + $0x38] sm:$0xff pattern:$0x75316420] }
  0x34   : > { %v3364_v29 = vld.sshfl [vmem:[#allocation1 + $0x20] sm:$0xff pattern:$0x75316420]  ;;  %v3366_v30 = vld.sshfl [vmem:[#allocation1 + $0x28] sm:$0xff pattern:$0x75316420] }
  0x35   : > { %647 = vst [vmem:[#allocation1 + $0x20] ss:$2 sm:$0xff] %v3326_v1 }
  0x36   : > { %v3369_v32 = vld.sshfl [vmem:[#allocation1 + $0x10] sm:$0xff pattern:$0x75316420]  ;;  %v3371_v33 = vld.sshfl [vmem:[#allocation1 + $0x18] sm:$0xff pattern:$0x75316420] }
  0x37   : > { %645 = vst [vmem:[#allocation1 + $0x10] ss:$2 sm:$0xff] %v3329_v2 }
  0x38   : > { %568 = vrot.lane.b32.xlu2 %v542_v25, %s3227_s14  ;;  %537 = vst [vmem:[#allocation1 + $0x31] ss:$2 sm:$0xff] %v3333_v3 }
  0x39   : > { %527 = vst [vmem:[#allocation2 + $0x140] sm:$0xf] %v495_v28 }
  0x3a   : > { %528 = vst [vmem:[#allocation2 + $0x200] sm:$0xf] %v496_v31 }
  0x3b   : > { %558 = vst [vmem:[#allocation1 + $0x1] ss:$2 sm:$0xff] %v3379_v35 }
  0x3c   : > { %v654_v37 = vld.sshfl [vmem:[#allocation1 + $0x20] sm:$0xff pattern:$0x75316420]  ;;  %v655_v38 = vld.sshfl [vmem:[#allocation1 + $0x28] sm:$0xff pattern:$0x75316420] }
  0x3d   : > { %660 = vst [vmem:[#allocation1 + $0x20] ss:$2 sm:$0xff] %v3342_v7 }
  0x3e   : > { %v652_v39 = vld.sshfl [vmem:[#allocation1 + $0x10] sm:$0xff pattern:$0x75316420]  ;;  %v653_v40 = vld.sshfl [vmem:[#allocation1 + $0x18] sm:$0xff pattern:$0x75316420] }
  0x3f   : > { %676 = vrot.lane.b32.xlu1 %v652_v39, %s3228_s15  ;;  %v544_v41 = vld.sshfl [vmem:[#allocation1 + $0x30] sm:$0xff pattern:$0x75316420]  ;;  %v545_v42 = vld.sshfl [vmem:[#allocation1 + $0x38] sm:$0xff pattern:$0x75316420] }
  0x40   : > { %572 = vrot.lane.b32.xlu2 %v544_v41, %s3227_s14  ;;  %549 = vst [vmem:[#allocation1 + $0x31] ss:$2 sm:$0xff] %v3355_v22  ;;  %574 = vrot.lane.b32.xlu0 %v545_v42, %s3227_s14 }
  0x41   : > { %659 = vst [vmem:[#allocation1 + $0x10] ss:$2 sm:$0xff] %v3346_v11 }
  0x42   : > { %v3390_v43 = vld.sshfl [vmem:[#allocation1] sm:$0xff pattern:$0x75316420] }
  0x43   : > { %643 = vst [vmem:[#allocation1] ss:$2 sm:$0xff] %v3322_v0 }
  0x44   : > { %v3393_v44 = vld.sshfl [vmem:[#allocation1 + $0x20] sm:$0xff pattern:$0x75316420]  ;;  %v3395_v45 = vld.sshfl [vmem:[#allocation1 + $0x28] sm:$0xff pattern:$0x75316420] }
  0x45   : > { %760 = vst [vmem:[#allocation1 + $0x21] ss:$2 sm:$0xff] %v3326_v1 }
  0x47   : > { %680 = vrot.lane.b32.xlu1 %v654_v37, %s3228_s15  ;;  %v3399_v46 = vld.sshfl [vmem:[#allocation1 + $0x30] sm:$0xff pattern:$0x75316420]  ;;  %v3401_v47 = vld.sshfl [vmem:[#allocation1 + $0x38] sm:$0xff pattern:$0x75316420] }
  0x48   : > { %649 = vst [vmem:[#allocation1 + $0x30] ss:$2 sm:$0xff] %v3333_v3  ;;  %v3404_v48 = vld.sshfl [vmem:[#allocation1 + $0x10] sm:$0xff pattern:$0x75316420]  ;;  %678 = vrot.lane.b32.xlu2 %v653_v40, %s3228_s15 }
  0x49   : > { %v3407_v49 = vld.sshfl [vmem:[#allocation1 + $0x18] sm:$0xff pattern:$0x75316420] }
  0x4a   : > { %758 = vst [vmem:[#allocation1 + $0x11] ss:$2 sm:$0xff] %v3329_v2  ;;  %v650_v50 = vld.sshfl [vmem:[#allocation1] sm:$0xff pattern:$0x75316420] }
  0x4b   : > { %v651_v51 = vld.sshfl [vmem:[#allocation1 + $0x8] sm:$0xff pattern:$0x75316420] }
  0x4c   : > { %658 = vst [vmem:[#allocation1] ss:$2 sm:$0xff] %v3338_v4  ;;  %v766_v52 = vld.sshfl [vmem:[#allocation1 + $0x20] sm:$0xff pattern:$0x75316420] }
  0x4d   : > { %v767_v53 = vld.sshfl [vmem:[#allocation1 + $0x28] sm:$0xff pattern:$0x75316420]  ;;  %803 = vst [vmem:[#allocation2 + $0x160] sm:$0xf0] %v766_v52 }
  0x4e   : > { %772 = vst [vmem:[#allocation1 + $0x21] ss:$2 sm:$0xff] %v3342_v7 }
  0x4f   : > { %v657_v54 = vld.sshfl [vmem:[#allocation1 + $0x38] sm:$0xff pattern:$0x75316420]  ;;  %v656_v55 = vld.sshfl [vmem:[#allocation1 + $0x30] sm:$0xff pattern:$0x75316420] }
  0x50   : > { %686 = vrot.lane.b32.xlu1 %v657_v54, %s3228_s15  ;;  %661 = vst [vmem:[#allocation1 + $0x30] ss:$2 sm:$0xff] %v3355_v22  ;;  %684 = vrot.lane.b32.xlu0 %v656_v55, %s3228_s15 }
  0x51   : > { %682 = vrot.lane.b32.xlu2 %v655_v38, %s3228_s15  ;;  %v764_v56 = vld.sshfl [vmem:[#allocation1 + $0x10] sm:$0xff pattern:$0x75316420]  ;;  %v765_v57 = vld.sshfl [vmem:[#allocation1 + $0x18] sm:$0xff pattern:$0x75316420] }
  0x52   : > { %771 = vst [vmem:[#allocation1 + $0x11] ss:$2 sm:$0xff] %v3346_v11 }
  0x53   : > { %801 = vst [vmem:[#allocation2 + $0x30] sm:$0xf0] %v764_v56  ;;  %v662_v58 = vld.sshfl [vmem:[#allocation1] sm:$0xff pattern:$0x75316420] }
  0x54   : > { %802 = vst [vmem:[#allocation2 + $0x10] sm:$0xf0] %v765_v57  ;;  %v3417_v59 = vld.sshfl [vmem:[#allocation1 + $0x8] sm:$0xff pattern:$0x75316420] }
  0x55   : > { %670 = vst [vmem:[#allocation1] ss:$2 sm:$0xff] %v3379_v35  ;;  %v778_v62 = vld.sshfl [vmem:[#allocation1 + $0x20] sm:$0xff pattern:$0x75316420] }
  0x56   : > { %804 = vst [vmem:[#allocation2 + $0x1d8] sm:$0xf0] %v767_v53  ;;  %v779_v6 = vld.sshfl [vmem:[#allocation1 + $0x28] sm:$0xff pattern:$0x75316420] }
  0x57   : > { %v3420_v60 = vld.sshfl [vmem:[#allocation1 + $0x30] sm:$0xff pattern:$0x75316420]  ;;  %v3422_v61 = vld.sshfl [vmem:[#allocation1 + $0x38] sm:$0xff pattern:$0x75316420] }
  0x58   : > { %762 = vst [vmem:[#allocation1 + $0x31] ss:$2 sm:$0xff] %v3333_v3  ;;  %672 = vrot.lane.b32.xlu1 %v650_v50, %s3228_s15 }
  0x59   : > { %v776_v63 = vld.sshfl [vmem:[#allocation1 + $0x10] sm:$0xff pattern:$0x75316420]  ;;  %v777_v5 = vld.sshfl [vmem:[#allocation1 + $0x18] sm:$0xff pattern:$0x75316420]  ;;  %674 = vrot.lane.b32.xlu2 %v651_v51, %s3228_s15 }
  0x5a   : > { %818 = vst [vmem:[#allocation1 + $0x10] ss:$2 sm:$0xff] %v3329_v2 }
  0x5b   : > { %809 = vst [vmem:[#allocation2 + $0x48] sm:$0xf0] %v776_v63 }
  0x5c   : > { %810 = vst [vmem:[#allocation2 + $0x68] sm:$0xf0] %v777_v5  ;;  %v3434_v13 = vld.sshfl [vmem:[#allocation1] sm:$0xff pattern:$0x75316420] }
  0x5d   : > { %820 = vst [vmem:[#allocation1 + $0x20] ss:$2 sm:$0xff] %v3326_v1 }
  0x5e   : > { %811 = vst [vmem:[#allocation2 + $0x238] sm:$0xf0] %v778_v62 }
  0x5f   : > { %812 = vst [vmem:[#allocation2 + $0x188] sm:$0xf0] %v779_v6  ;;  %v768_v8 = vld.sshfl [vmem:[#allocation1 + $0x30] sm:$0xff pattern:$0x75316420] }
  0x60   : > { %688 = vrot.lane.b32.xlu1 %v662_v58, %s3228_s15  ;;  %v769_v9 = vld.sshfl [vmem:[#allocation1 + $0x38] sm:$0xff pattern:$0x75316420]  ;;  %805 = vst [vmem:[#allocation2 + $0x1a0] sm:$0xf0] %v768_v8 }
  0x61   : > { %v825_v10 = vld.sshfl [vmem:[#allocation1 + $0x18] sm:$0xff pattern:$0x75316420]  ;;  %576 = vrot.lane.b32.xlu2 %v3374_v34, %s3227_s14  ;;  %v824_v12 = vld.sshfl [vmem:[#allocation1 + $0x10] sm:$0xff pattern:$0x75316420] }
  0x62   : > { %849 = vrot.lane.b32.xlu0 %v825_v10, %s3227_s14  ;;  %831 = vst [vmem:[#allocation1 + $0x10] ss:$2 sm:$0xff] %v3346_v11 }
  0x63   : > { %773 = vst [vmem:[#allocation1 + $0x31] ss:$2 sm:$0xff] %v3355_v22 }
  0x64   : > { %v827_v14 = vld.sshfl [vmem:[#allocation1 + $0x28] sm:$0xff pattern:$0x75316420]  ;;  %806 = vst [vmem:[#allocation2 + $0x248] sm:$0xf0] %v769_v9 }
  0x65   : > { %v826_v15 = vld.sshfl [vmem:[#allocation1 + $0x20] sm:$0xff pattern:$0x75316420]  ;;  %756 = vst [vmem:[#allocation1 + $0x1] ss:$2 sm:$0xff] %v3322_v0 }
  0x66   : > { %832 = vst [vmem:[#allocation1 + $0x20] ss:$2 sm:$0xff] %v3342_v7 }
  0x68   : > { %847 = vrot.lane.b32.xlu1 %v824_v12, %s3227_s14 }
  0x69   : > { %v836_v16 = vld.sshfl [vmem:[#allocation1 + $0x10] sm:$0xff pattern:$0x75316420]  ;;  %v3440_v17 = vld.sshfl [vmem:[#allocation1 + $0x18] sm:$0xff pattern:$0x75316420] }
  0x6a   : > { %853 = vrot.lane.b32.xlu0 %v827_v14, %s3227_s14  ;;  %930 = vst [vmem:[#allocation1 + $0x11] ss:$2 sm:$0xff] %v3329_v2  ;;  %v780_v18 = vld.sshfl [vmem:[#allocation1 + $0x30] sm:$0xff pattern:$0x75316420] }
  0x6b   : > { %v781_v19 = vld.sshfl [vmem:[#allocation1 + $0x38] sm:$0xff pattern:$0x75316420]  ;;  %813 = vst [vmem:[#allocation2 + $0x250] sm:$0xf0] %v780_v18 }
  0x6c   : > { %822 = vst [vmem:[#allocation1 + $0x30] ss:$2 sm:$0xff] %v3333_v3  ;;  %v763_v20 = vld.sshfl [vmem:[#allocation1 + $0x8] sm:$0xff pattern:$0x75316420] }
  0x6d   : > { %814 = vst [vmem:[#allocation2 + $0xb8] sm:$0xf0] %v781_v19  ;;  %v3445_v21 = vld.sshfl [vmem:[#allocation1 + $0x20] sm:$0xff pattern:$0x75316420] }
  0x6e   : > { %v3447_v23 = vld.sshfl [vmem:[#allocation1 + $0x28] sm:$0xff pattern:$0x75316420]  ;;  %770 = vst [vmem:[#allocation1 + $0x1] ss:$2 sm:$0xff] %v3338_v4 }
  0x6f   : > { %932 = vst [vmem:[#allocation1 + $0x21] ss:$2 sm:$0xff] %v3326_v1 }
  0x70   : > { %851 = vrot.lane.b32.xlu1 %v826_v15, %s3227_s14  ;;  %800 = vst [vmem:[#allocation2 + $0x80] sm:$0xf0] %v763_v20 }
  0x71   : > { %v936_v24 = vld.sshfl [vmem:[#allocation1 + $0x10] sm:$0xff pattern:$0x75316420]  ;;  %v937_v25 = vld.sshfl [vmem:[#allocation1 + $0x18] sm:$0xff pattern:$0x75316420] }
  0x72   : > { %959 = vrot.lane.b32.xlu0 %v936_v24, %s3228_s15  ;;  %943 = vst [vmem:[#allocation1 + $0x11] ss:$2 sm:$0xff] %v3346_v11 }
  0x73   : > { %v829_v26 = vld.sshfl [vmem:[#allocation1 + $0x38] sm:$0xff pattern:$0x75316420]  ;;  %v828_v27 = vld.sshfl [vmem:[#allocation1 + $0x30] sm:$0xff pattern:$0x75316420] }
  0x74   : > { %857 = vrot.lane.b32.xlu2 %v829_v26, %s3227_s14  ;;  %833 = vst [vmem:[#allocation1 + $0x30] ss:$2 sm:$0xff] %v3355_v22 }
  0x75   : > { %v774_v28 = vld.sshfl [vmem:[#allocation1] sm:$0xff pattern:$0x75316420]  ;;  %v775_v31 = vld.sshfl [vmem:[#allocation1 + $0x8] sm:$0xff pattern:$0x75316420] }
  0x76   : > { %782 = vst [vmem:[#allocation1 + $0x1] ss:$2 sm:$0xff] %v3379_v35  ;;  %v938_v34 = vld.sshfl [vmem:[#allocation1 + $0x20] sm:$0xff pattern:$0x75316420] }
  0x77   : > { %807 = vst [vmem:[#allocation2 + $0x218] sm:$0xf0] %v774_v28  ;;  %v939_v39 = vld.sshfl [vmem:[#allocation1 + $0x28] sm:$0xff pattern:$0x75316420] }
  0x78   : > { %855 = vrot.lane.b32.xlu1 %v828_v27, %s3227_s14  ;;  %808 = vst [vmem:[#allocation2 + $0x190] sm:$0xf0] %v775_v31 }
  0x79   : > { %v3458_v37 = vld.sshfl [vmem:[#allocation1 + $0x10] sm:$0xff pattern:$0x75316420]  ;;  %v3460_v38 = vld.sshfl [vmem:[#allocation1 + $0x18] sm:$0xff pattern:$0x75316420] }
  0x7a   : > { %963 = vrot.lane.b32.xlu0 %v938_v34, %s3228_s15  ;;  %1041 = vst [vmem:[#allocation1 + $0x10] ss:$2 sm:$0xff] %v3326_v1 }
  0x7b   : > { %v3464_v40 = vld.sshfl [vmem:[#allocation1 + $0x30] sm:$0xff pattern:$0x75316420]  ;;  %v3466_v41 = vld.sshfl [vmem:[#allocation1 + $0x38] sm:$0xff pattern:$0x75316420] }
  0x7c   : > { %961 = vrot.lane.b32.xlu2 %v937_v25, %s3228_s15  ;;  %934 = vst [vmem:[#allocation1 + $0x31] ss:$2 sm:$0xff] %v3333_v3 }
  0x7d   : > { %v783_v42 = vld.sshfl [vmem:[#allocation1] sm:$0xff pattern:$0x75316420]  ;;  %944 = vst [vmem:[#allocation1 + $0x21] ss:$2 sm:$0xff] %v3342_v7 }
  0x7e   : > { %816 = vst [vmem:[#allocation1] ss:$2 sm:$0xff] %v3322_v0 }
  0x7f   : > { %815 = vst [vmem:[#allocation2 + $0x268] sm:$0xf0] %v783_v42 }
  0x80   : > { %863 = vrot.lane.b32.xlu1 %v836_v16, %s3227_s14 }
  0x81   : > { %v1048_v50 = vld.sshfl [vmem:[#allocation1 + $0x10] sm:$0xff pattern:$0x75316420]  ;;  %v1049_v51 = vld.sshfl [vmem:[#allocation1 + $0x18] sm:$0xff pattern:$0x75316420] }
  0x82   : > { %1055 = vst [vmem:[#allocation1 + $0x10] ss:$2 sm:$0xff] %v3342_v7  ;;  %v3474_v52 = vpop.permute.xlu2 %560 }
  0x83   : > { %1084 = vst [vmem:[#allocation2 + $0xa0] sm:$0xf] %v1048_v50  ;;  %v941_v53 = vld.sshfl [vmem:[#allocation1 + $0x38] sm:$0xff pattern:$0x75316420] }
  0x84   : > { %1085 = vst [vmem:[#allocation2 + $0x1f8] sm:$0xf] %v1049_v51  ;;  %969 = vrot.lane.b32.xlu2 %v941_v53, %s3228_s15  ;;  %v3477_v54 = vld.sshfl [vmem:[#allocation1 + $0x20] sm:$0xff pattern:$0x75316420] }
  0x85   : > { %v823_v55 = vld.sshfl [vmem:[#allocation1 + $0x8] sm:$0xff pattern:$0x75316420]  ;;  %v940_v57 = vld.sshfl [vmem:[#allocation1 + $0x30] sm:$0xff pattern:$0x75316420] }
  0x86   : > { %v3479_v56 = vld.sshfl [vmem:[#allocation1 + $0x28] sm:$0xff pattern:$0x75316420]  ;;  %845 = vrot.lane.b32.xlu0 %v823_v55, %s3227_s14  ;;  %830 = vst [vmem:[#allocation1] ss:$2 sm:$0xff] %v3338_v4 }
  0x87   : > { %1043 = vst [vmem:[#allocation1 + $0x20] ss:$2 sm:$0xff] %v3333_v3 }
  0x88   : > { %965 = vrot.lane.b32.xlu1 %v939_v39, %s3228_s15  ;;  %945 = vst [vmem:[#allocation1 + $0x31] ss:$2 sm:$0xff] %v3355_v22 }
  0x89   : > { %v1060_v58 = vld.sshfl [vmem:[#allocation1 + $0x10] sm:$0xff pattern:$0x75316420]  ;;  %v1061_v62 = vld.sshfl [vmem:[#allocation1 + $0x18] sm:$0xff pattern:$0x75316420] }
  0x8a   : > { %v3486_v63 = vpop.permute.xlu2 %564  ;;  %1102 = vst [vmem:[#allocation1 + $0x11] ss:$2 sm:$0xff] %v3326_v1 }
  0x8b   : > { %1092 = vst [vmem:[#allocation2 + $0xd0] sm:$0xf] %v1060_v58 }
  0x8c   : > { %1093 = vst [vmem:[#allocation2 + $0x278] sm:$0xf] %v1061_v62 }
  0x8d   : > { %v835_v5 = vld.sshfl [vmem:[#allocation1 + $0x8] sm:$0xff pattern:$0x75316420]  ;;  %v834_v6 = vld.sshfl [vmem:[#allocation1] sm:$0xff pattern:$0x75316420] }
  0x8e   : > { %v1050_v8 = vld.sshfl [vmem:[#allocation1 + $0x20] sm:$0xff pattern:$0x75316420]  ;;  %v1051_v9 = vld.sshfl [vmem:[#allocation1 + $0x28] sm:$0xff pattern:$0x75316420]  ;;  %861 = vrot.lane.b32.xlu2 %v835_v5, %s3227_s14  ;;  %859 = vrot.lane.b32.xlu0 %v834_v6, %s3227_s14 }
  0x8f   : > { %1056 = vst [vmem:[#allocation1 + $0x20] ss:$2 sm:$0xff] %v3355_v22  ;;  %v3492_v10 = vld.sshfl [vmem:[#allocation1 + $0x30] sm:$0xff pattern:$0x75316420] }
  0x90   : > { %1086 = vst [vmem:[#allocation2 + $0x58] sm:$0xf] %v1050_v8  ;;  %v3494_v12 = vld.sshfl [vmem:[#allocation1 + $0x38] sm:$0xff pattern:$0x75316420]  ;;  %967 = vrot.lane.b32.xlu1 %v940_v57, %s3228_s15 }
  0x91   : > { %1087 = vst [vmem:[#allocation2 + $0x258] sm:$0xf] %v1051_v9  ;;  %v1109_v14 = vld.sshfl [vmem:[#allocation1 + $0x10] sm:$0xff pattern:$0x75316420] }
  0x92   : > { %842 = vst [vmem:[#allocation1] ss:$2 sm:$0xff] %v3379_v35  ;;  %v3498_v15 = vpop.permute.xlu2 %568  ;;  %v1110_v16 = vld.sshfl [vmem:[#allocation1 + $0x18] sm:$0xff pattern:$0x75316420] }
  0x93   : > { %1045 = vst [vmem:[#allocation1 + $0x30] ss:$2 sm:$0xff] %v3338_v4 }
  0x94   : > { %1116 = vst [vmem:[#allocation1 + $0x11] ss:$2 sm:$0xff] %v3342_v7 }
  0x96   : > { %v1062_v18 = vld.sshfl [vmem:[#allocation1 + $0x20] sm:$0xff pattern:$0x75316420]  ;;  %v1063_v19 = vld.sshfl [vmem:[#allocation1 + $0x28] sm:$0xff pattern:$0x75316420] }
  0x97   : > { %1104 = vst [vmem:[#allocation1 + $0x21] ss:$2 sm:$0xff] %v3333_v3 }
  0x98   : > { %1094 = vst [vmem:[#allocation2 + $0x210] sm:$0xf] %v1062_v18  ;;  %1133 = vrot.lane.b32.xlu1 %v1109_v14, %s3227_s14 }
  0x99   : > { %1095 = vst [vmem:[#allocation2 + $0x180] sm:$0xf] %v1063_v19  ;;  %v3504_v20 = vld.sshfl [vmem:[#allocation1] sm:$0xff pattern:$0x75316420] }
  0x9a   : > { %v1052_v24 = vld.sshfl [vmem:[#allocation1 + $0x30] sm:$0xff pattern:$0x75316420]  ;;  %v1053_v25 = vld.sshfl [vmem:[#allocation1 + $0x38] sm:$0xff pattern:$0x75316420]  ;;  %v3506_v26 = vpop.permute.xlu2 %572 }
  0x9b   : > { %1057 = vst [vmem:[#allocation1 + $0x30] ss:$2 sm:$0xff] %v3379_v35  ;;  %v3509_v27 = vld.sshfl [vmem:[#allocation1 + $0x8] sm:$0xff pattern:$0x75316420]  ;;  %v563_v57 = vpop.permute.xlu0 %562 }
  0x9c   : > { %1088 = vst [vmem:[#allocation2 + $0x260] sm:$0xf] %v1052_v24  ;;  %v3511_v28 = vld.sshfl [vmem:[#allocation1 + $0x18] sm:$0xff pattern:$0x75316420]  ;;  %v595_v9 = vsel %vm594_vm0, %v3474_v52, %v563_v57 }
  0x9d   : > { %1089 = vst [vmem:[#allocation2 + $0x100] sm:$0xf] %v1053_v25  ;;  %v1121_v39 = vld.sshfl [vmem:[#allocation1 + $0x10] sm:$0xff pattern:$0x75316420] }
  0x9e   : > { %v1112_v31 = vld.sshfl [vmem:[#allocation1 + $0x28] sm:$0xff pattern:$0x75316420]  ;;  %928 = vst [vmem:[#allocation1 + $0x1] ss:$2 sm:$0xff] %v3322_v0  ;;  %v571_v0 = vpop.permute.xlu1 %570 }
  0x9f   : > { %1139 = vrot.lane.b32.xlu0 %v1112_v31, %s3227_s14  ;;  %v1111_v34 = vld.sshfl [vmem:[#allocation1 + $0x20] sm:$0xff pattern:$0x75316420]  ;;  %1213 = vst [vmem:[#allocation1 + $0x10] ss:$2 sm:$0xff] %v3326_v1  ;;  %v599_v55 = vsel %vm594_vm0, %v3498_v15, %v571_v0  ;;  %v600_v62 = vsel %vm594_vm0, %v571_v0, %v3506_v26 }
  0xa0   : > { %1137 = vrot.lane.b32.xlu1 %v1111_v34, %s3227_s14  ;;  %1117 = vst [vmem:[#allocation1 + $0x21] ss:$2 sm:$0xff] %v3355_v22 }
  0xa1   : > { %631 = vst [vmem:[#allocation2 + $0xe8] sm:$0xf0] %v599_v55 }
  0xa2   : > { %v1064_v42 = vld.sshfl [vmem:[#allocation1 + $0x30] sm:$0xff pattern:$0x75316420]  ;;  %v1065_v50 = vld.sshfl [vmem:[#allocation1 + $0x38] sm:$0xff pattern:$0x75316420]  ;;  %v679_v51 = vpop.permute.xlu2 %678 }
  0xa3   : > { %1106 = vst [vmem:[#allocation1 + $0x31] ss:$2 sm:$0xff] %v3338_v4  ;;  %v567_v19 = vpop.permute.xlu0 %566 }
  0xa4   : > { %1096 = vst [vmem:[#allocation2 + $0x130] sm:$0xf] %v1064_v42  ;;  %v597_v25 = vsel %vm594_vm0, %v3486_v63, %v567_v19 }
  0xa5   : > { %v935_v53 = vld.sshfl [vmem:[#allocation1 + $0x8] sm:$0xff pattern:$0x75316420]  ;;  %1097 = vst [vmem:[#allocation2 + $0x110] sm:$0xf] %v1065_v50 }
  0xa6   : > { %957 = vrot.lane.b32.xlu2 %v935_v53, %s3228_s15  ;;  %942 = vst [vmem:[#allocation1 + $0x1] ss:$2 sm:$0xff] %v3338_v4  ;;  %v1220_v24 = vld.sshfl [vmem:[#allocation1 + $0x10] sm:$0xff pattern:$0x75316420] }
  0xa7   : > { %v3523_v58 = vld.sshfl [vmem:[#allocation1 + $0x20] sm:$0xff pattern:$0x75316420]  ;;  %v3525_v1 = vld.sshfl [vmem:[#allocation1 + $0x28] sm:$0xff pattern:$0x75316420] }
  0xa8   : > { %1215 = vst [vmem:[#allocation1 + $0x20] ss:$2 sm:$0xff] %v3333_v3  ;;  %v596_v3 = vsel %vm594_vm0, %v563_v57, %v3486_v63  ;;  %v3543_v52 = vld.sshfl [vmem:[#allocation1 + $0x18] sm:$0xff pattern:$0x75316420] }
  0xa9   : > { %632 = vst [vmem:[#allocation2 + $0xf0] sm:$0xf0] %v600_v62 }
  0xaa   : > { %v1114_v5 = vld.sshfl [vmem:[#allocation1 + $0x38] sm:$0xff pattern:$0x75316420]  ;;  %v1113_v6 = vld.sshfl [vmem:[#allocation1 + $0x30] sm:$0xff pattern:$0x75316420] }
  0xab   : > { %1141 = vrot.lane.b32.xlu1 %v1113_v6, %s3227_s14  ;;  %1118 = vst [vmem:[#allocation1 + $0x31] ss:$2 sm:$0xff] %v3379_v35  ;;  %v3532_v8 = vpop.permute.xlu2 %682 }
  0xac   : > { %627 = vst [vmem:[#allocation2 + $0xc8] sm:$0xf0] %v595_v9 }
  0xad   : > { %v946_v14 = vld.sshfl [vmem:[#allocation1] sm:$0xff pattern:$0x75316420]  ;;  %v947_v18 = vld.sshfl [vmem:[#allocation1 + $0x8] sm:$0xff pattern:$0x75316420] }
  0xae   : > { %1135 = vrot.lane.b32.xlu2 %v1110_v16, %s3227_s14  ;;  %971 = vrot.lane.b32.xlu0 %v946_v14, %s3228_s15  ;;  %954 = vst [vmem:[#allocation1 + $0x1] ss:$2 sm:$0xff] %v3379_v35  ;;  %v598_v16 = vsel %vm594_vm0, %v567_v19, %v3498_v15 }
  0xaf   : > { %628 = vst [vmem:[#allocation2 + $0x8] sm:$0xf0] %v596_v3  ;;  %v1223_v57 = vld.sshfl [vmem:[#allocation1 + $0x28] sm:$0xff pattern:$0x75316420] }
  0xb0   : > { %1227 = vst [vmem:[#allocation1 + $0x10] ss:$2 sm:$0xff] %v3342_v7 }
  0xb1   : > { %v677_v31 = vpop.permute.xlu1 %676  ;;  %629 = vst [vmem:[#allocation2 + $0x40] sm:$0xf0] %v597_v25 }
  0xb2   : > { %v709_v34 = vsel %vm706_vm1, %v677_v31, %v679_v51  ;;  %v3550_v50 = vld.sshfl [vmem:[#allocation1 + $0x30] sm:$0xff pattern:$0x75316420]  ;;  %630 = vst [vmem:[#allocation2 + $0x28] sm:$0xf0] %v598_v16  ;;  %v575_v15 = vpop.permute.xlu0 %574 }
  0xb3   : > { %1149 = vrot.lane.b32.xlu1 %v1121_v39, %s3227_s14  ;;  %741 = vst [vmem:[#allocation2 + $0x10] sm:$0xf] %v709_v34  ;;  %v675_v42 = vpop.permute.xlu2 %674  ;;  %v3553_v53 = vld.sshfl [vmem:[#allocation1 + $0x38] sm:$0xff pattern:$0x75316420]  ;;  %v601_v55 = vsel %vm594_vm0, %v3506_v26, %v575_v15 }
  0xb4   : > { %v708_v63 = vsel %vm706_vm1, %v675_v42, %v677_v31  ;;  %v1222_v39 = vld.sshfl [vmem:[#allocation1 + $0x20] sm:$0xff pattern:$0x75316420]  ;;  %1217 = vst [vmem:[#allocation1 + $0x30] ss:$2 sm:$0xff] %v3338_v4 }
  0xb5   : > { %v3555_v0 = vld.sshfl [vmem:[#allocation1] sm:$0xff pattern:$0x75316420]  ;;  %v3557_v7 = vld.sshfl [vmem:[#allocation1 + $0x8] sm:$0xff pattern:$0x75316420] }
  0xb6   : > { %1143 = vrot.lane.b32.xlu2 %v1114_v5, %s3227_s14  ;;  %973 = vrot.lane.b32.xlu0 %v947_v18, %s3228_s15  ;;  %1039 = vst [vmem:[#allocation1] ss:$2 sm:$0xff] %v3329_v2 }
  0xb7   : > { %740 = vst [vmem:[#allocation2 + $0x30] sm:$0xf] %v708_v63 }
  0xb8   : > { %1228 = vst [vmem:[#allocation1 + $0x20] ss:$2 sm:$0xff] %v3355_v22 }
  0xb9   : > { %v681_v62 = vpop.permute.xlu1 %680  ;;  %633 = vst [vmem:[#allocation2 + $0x70] sm:$0xf0] %v601_v55  ;;  %v1232_v55 = vld.sshfl [vmem:[#allocation1 + $0x10] sm:$0xff pattern:$0x75316420] }
  0xba   : > { %v710_v6 = vsel %vm706_vm1, %v679_v51, %v681_v62  ;;  %v711_v5 = vsel %vm706_vm1, %v681_v62, %v3532_v8 }
  0xbb   : > { %975 = vrot.lane.b32.xlu1 %v3458_v37, %s3228_s15  ;;  %742 = vst [vmem:[#allocation2 + $0x160] sm:$0xf] %v710_v6  ;;  %v3571_v9 = vpop.permute.xlu2 %576  ;;  %v1225_v4 = vld.sshfl [vmem:[#allocation1 + $0x38] sm:$0xff pattern:$0x75316420] }
  0xbc   : > { %743 = vst [vmem:[#allocation2 + $0x1d8] sm:$0xf] %v711_v5  ;;  %v602_v22 = vsel %vm594_vm0, %v575_v15, %v3571_v9  ;;  %v1224_v37 = vld.sshfl [vmem:[#allocation1 + $0x30] sm:$0xff pattern:$0x75316420] }
  0xbd   : > { %v1046_v26 = vld.sshfl [vmem:[#allocation1] sm:$0xff pattern:$0x75316420]  ;;  %v1047_v14 = vld.sshfl [vmem:[#allocation1 + $0x8] sm:$0xff pattern:$0x75316420] }
  0xbe   : > { %1054 = vst [vmem:[#allocation1] ss:$2 sm:$0xff] %v3346_v11  ;;  %1151 = vrot.lane.b32.xlu2 %v3511_v28, %s3227_s14  ;;  %1248 = vrot.lane.b32.xlu0 %v1222_v39, %s3228_s15 }
  0xbf   : > { %1082 = vst [vmem:[#allocation2 + $0x78] sm:$0xf] %v1046_v26  ;;  %v1234_v26 = vld.sshfl [vmem:[#allocation1 + $0x20] sm:$0xff pattern:$0x75316420] }
  0xc0   : > { %1083 = vst [vmem:[#allocation2 + $0x1f0] sm:$0xf] %v1047_v14 }
  0xc1   : > { %1229 = vst [vmem:[#allocation1 + $0x30] ss:$2 sm:$0xff] %v3379_v35  ;;  %v1233_v35 = vld.sshfl [vmem:[#allocation1 + $0x18] sm:$0xff pattern:$0x75316420] }
  0xc2   : > { %v687_v51 = vpop.permute.xlu1 %686  ;;  %634 = vst [vmem:[#allocation2 + $0x120] sm:$0xf0] %v602_v22  ;;  %v685_v18 = vpop.permute.xlu0 %684 }
  0xc3   : > { %1254 = vrot.lane.b32.xlu1 %v1225_v4, %s3228_s15  ;;  %v712_v3 = vsel %vm706_vm1, %v3532_v8, %v685_v18  ;;  %v713_v28 = vsel %vm706_vm1, %v685_v18, %v687_v51 }
  0xc4   : > { %744 = vst [vmem:[#allocation2 + $0x1a0] sm:$0xf] %v712_v3 }
  0xc5   : > { %745 = vst [vmem:[#allocation2 + $0x248] sm:$0xf] %v713_v28  ;;  %v1058_v19 = vld.sshfl [vmem:[#allocation1] sm:$0xff pattern:$0x75316420] }
  0xc6   : > { %1244 = vrot.lane.b32.xlu2 %v1220_v24, %s3228_s15  ;;  %867 = vrot.lane.b32.xlu0 %v3445_v21, %s3227_s14  ;;  %v1059_v25 = vld.sshfl [vmem:[#allocation1 + $0x8] sm:$0xff pattern:$0x75316420]  ;;  %1090 = vst [vmem:[#allocation2 + $0x1b8] sm:$0xf] %v1058_v19 }
  0xc7   : > { %1100 = vst [vmem:[#allocation1 + $0x1] ss:$2 sm:$0xff] %v3329_v2 }
  0xc8   : > { %1091 = vst [vmem:[#allocation2 + $0x168] sm:$0xf] %v1059_v25 }
  0xca   : > { %v673_v31 = vpop.permute.xlu1 %672 }
  0xcb   : > { %1262 = vrot.lane.b32.xlu1 %v1233_v35, %s3228_s15  ;;  %v707_v8 = vsel %vm706_vm1, %v673_v31, %v675_v42  ;;  %v3602_v42 = vld [vmem:[%s3319_s30 + $0x48] sm:$0xf]  ;;  %s451_s30 = scalar_lea.vmem %s4287_s13, %s3148_s27 }
  0xcc   : > { %739 = vst [vmem:[#allocation2 + $0x80] sm:$0xf] %v707_v8 }
  0xce   : > { %1246 = vrot.lane.b32.xlu2 %v3543_v52, %s3228_s15  ;;  %979 = vrot.lane.b32.xlu0 %v3477_v54, %s3228_s15  ;;  %v1107_v21 = vld.sshfl [vmem:[#allocation1] sm:$0xff pattern:$0x75316420]  ;;  %v1108_v24 = vld.sshfl [vmem:[#allocation1 + $0x8] sm:$0xff pattern:$0x75316420]  ;;  %v3604_v63 = vpop.permute.xlu2 %857 }
  0xcf   : > { %1115 = vst [vmem:[#allocation1 + $0x1] ss:$2 sm:$0xff] %v3346_v11 }
  0xd2   : > { %v3595_v16 = vpop.permute.xlu1 %688 }
  0xd3   : > { %1153 = vrot.lane.b32.xlu1 %v3523_v58, %s3227_s14  ;;  %v714_v34 = vsel %vm706_vm1, %v687_v51, %v3595_v16 }
  0xd4   : > { %v850_v52 = vpop.permute.xlu0 %849  ;;  %746 = vst [vmem:[#allocation2 + $0x218] sm:$0xf] %v714_v34 }
  0xd6   : > { %1250 = vrot.lane.b32.xlu2 %v1223_v57, %s3228_s15  ;;  %1252 = vrot.lane.b32.xlu0 %v1224_v37, %s3228_s15  ;;  %v1120_v54 = vld.sshfl [vmem:[#allocation1 + $0x8] sm:$0xff pattern:$0x75316420]  ;;  %v1119_v15 = vld.sshfl [vmem:[#allocation1] sm:$0xff pattern:$0x75316420]  ;;  %v962_v57 = vpop.permute.xlu2 %961 }
  0xd7   : > { %1127 = vst [vmem:[#allocation1 + $0x1] ss:$2 sm:$0xff] %v3602_v42 }
  0xda   : > { %v848_v39 = vpop.permute.xlu1 %847 }
  0xdb   : > { %1129 = vrot.lane.b32.xlu1 %v1107_v21, %s3227_s14  ;;  %v880_v58 = vsel %vm594_vm0, %v848_v39, %v850_v52 }
  0xdc   : > { %v854_v62 = vpop.permute.xlu0 %853  ;;  %912 = vst [vmem:[#allocation2 + $0x98] sm:$0xf] %v880_v58 }
  0xde   : > { %865 = vrot.lane.b32.xlu2 %v3440_v17, %s3227_s14  ;;  %1260 = vrot.lane.b32.xlu0 %v1232_v55, %s3228_s15  ;;  %v3614_v6 = vld.sshfl [vmem:[#allocation1] sm:$0xff pattern:$0x75316420]  ;;  %v3626_v51 = vpop.permute.xlu2 %969 }
  0xdf   : > { %1211 = vst [vmem:[#allocation1] ss:$2 sm:$0xff] %v3329_v2 }
  0xe2   : > { %v852_v5 = vpop.permute.xlu1 %851 }
  0xe3   : > { %1131 = vrot.lane.b32.xlu1 %v1108_v24, %s3227_s14  ;;  %v881_v14 = vsel %vm594_vm0, %v850_v52, %v852_v5  ;;  %v882_v4 = vsel %vm594_vm0, %v852_v5, %v854_v62 }
  0xe4   : > { %v960_v22 = vpop.permute.xlu0 %959  ;;  %913 = vst [vmem:[#allocation2 + $0xe0] sm:$0xf] %v881_v14 }
  0xe5   : > { %v992_v37 = vsel %vm706_vm1, %v960_v22, %v962_v57  ;;  %914 = vst [vmem:[#allocation2 + $0x198] sm:$0xf] %v882_v4 }
  0xe6   : > { %977 = vrot.lane.b32.xlu2 %v3460_v38, %s3228_s15  ;;  %1264 = vrot.lane.b32.xlu0 %v1234_v26, %s3228_s15  ;;  %1024 = vst [vmem:[#allocation2 + $0x98] sm:$0xf0] %v992_v37  ;;  %v1218_v2 = vld.sshfl [vmem:[#allocation1] sm:$0xff pattern:$0x75316420] }
  0xe7   : > { %v3624_v17 = vld.sshfl [vmem:[#allocation1 + $0x8] sm:$0xff pattern:$0x75316420] }
  0xe8   : > { %1226 = vst [vmem:[#allocation1] ss:$2 sm:$0xff] %v3346_v11  ;;  %v862_v11 = vpop.permute.xlu2 %861 }
  0xea   : > { %v856_v18 = vpop.permute.xlu1 %855 }
  0xeb   : > { %1145 = vrot.lane.b32.xlu1 %v1119_v15, %s3227_s14  ;;  %v883_v3 = vsel %vm594_vm0, %v854_v62, %v856_v18  ;;  %v884_v28 = vsel %vm594_vm0, %v856_v18, %v3604_v63  ;;  %v1235_v15 = vld.sshfl [vmem:[#allocation1 + $0x28] sm:$0xff pattern:$0x75316420]  ;;  %v1236_v62 = vld.sshfl [vmem:[#allocation1 + $0x30] sm:$0xff pattern:$0x75316420] }
  0xec   : > { %v964_v19 = vpop.permute.xlu0 %963  ;;  %915 = vst [vmem:[#allocation2 + $0x1d0] sm:$0xf] %v883_v3  ;;  %v1237_v3 = vld.sshfl [vmem:[#allocation1 + $0x38] sm:$0xff pattern:$0x75316420] }
  0xed   : > { %v993_v38 = vsel %vm706_vm1, %v962_v57, %v964_v19  ;;  %916 = vst [vmem:[#allocation2 + $0x1e0] sm:$0xf] %v884_v28 }
  0xee   : > { %690 = vrot.lane.b32.xlu2 %v3417_v59, %s3228_s15  ;;  %692 = vrot.lane.b32.xlu0 %v3404_v48, %s3228_s15  ;;  %1025 = vst [vmem:[#allocation2 + $0xe0] sm:$0xf0] %v993_v38 }
  0xef   : > { %v1231_v8 = vld.sshfl [vmem:[#allocation1 + $0x8] sm:$0xff pattern:$0x75316420]  ;;  %v1230_v21 = vld.sshfl [vmem:[#allocation1] sm:$0xff pattern:$0x75316420] }
  0xf0   : > { %1238 = vst [vmem:[#allocation1] ss:$2 sm:$0xff] %v3602_v42 }
  0xf2   : > { %v3638_v25 = vpop.permute.xlu1 %863 }
  0xf3   : > { %694 = vrot.lane.b32.xlu1 %v3407_v49, %s3228_s15  ;;  %v887_v35 = vsel %vm594_vm0, %v862_v11, %v3638_v25 }
  0xf4   : > { %919 = vst [vmem:[#allocation2] sm:$0xf] %v887_v35 }
  0xf6   : > { %869 = vrot.lane.b32.xlu2 %v3447_v23, %s3227_s14  ;;  %981 = vrot.lane.b32.xlu0 %v3479_v56, %s3228_s15 }
  0xf7   : > { %v1239_v55 = vld.sshfl [vmem:[#allocation1] sm:$0xff pattern:$0x75316420] }
  0xf8   : > { %v846_v59 = vpop.permute.xlu0 %845 }
  0xf9   : > { %v879_v48 = vsel %vm594_vm0, %v846_v59, %v848_v39 }
  0xfa   : > { %911 = vst [vmem:[#allocation2 + $0xf8] sm:$0xf] %v879_v48  ;;  %v966_v31 = vpop.permute.xlu1 %965  ;;  %v1341_v48 = vld [vmem:[#allocation2 + $0x10] sm:$0xff] }
  0xfb   : > { %578 = vrot.lane.b32.xlu1 %v3381_v36, %s3227_s14  ;;  %v994_v49 = vsel %vm706_vm1, %v964_v19, %v966_v31 }
  0xfc   : > { %1026 = vst [vmem:[#allocation2 + $0x198] sm:$0xf0] %v994_v49 }
  0xfe   : > { %580 = vrot.lane.b32.xlu2 %v3369_v32, %s3227_s14  ;;  %1147 = vrot.lane.b32.xlu0 %v1120_v54, %s3227_s14 }
 0x100   : > { %v958_v23 = vpop.permute.xlu2 %957  ;;  %v860_v56 = vpop.permute.xlu0 %859 }
 0x101   : > { %v991_v24 = vsel %vm706_vm1, %v958_v23, %v960_v22  ;;  %v885_v34 = vsel %vm594_vm0, %v3604_v63, %v860_v56  ;;  %v886_v36 = vsel %vm594_vm0, %v860_v56, %v862_v11 }
 0x102   : > { %1023 = vst [vmem:[#allocation2 + $0xf8] sm:$0xf0] %v991_v24  ;;  %v968_v52 = vpop.permute.xlu1 %967 }
 0x103   : > { %917 = vst [vmem:[#allocation2 + $0x1a8] sm:$0xf] %v885_v34  ;;  %696 = vrot.lane.b32.xlu1 %v3393_v44, %s3228_s15  ;;  %v995_v32 = vsel %vm706_vm1, %v966_v31, %v968_v52  ;;  %v996_v42 = vsel %vm706_vm1, %v968_v52, %v3626_v51  ;;  %v1358_v24 = vld [vmem:[#allocation2 + $0x198] sm:$0xff]  ;;  %v1342_v52 = vld [vmem:[#allocation2 + $0x160] sm:$0xff] }
 0x104   : > { %918 = vst [vmem:[#allocation2 + $0x228] sm:$0xf] %v886_v36 }
 0x105   : > { %1027 = vst [vmem:[#allocation2 + $0x1d0] sm:$0xf0] %v995_v32 }
 0x106   : > { %1266 = vrot.lane.b32.xlu2 %v1235_v15, %s3228_s15  ;;  %582 = vrot.lane.b32.xlu0 %v3371_v33, %s3227_s14  ;;  %1028 = vst [vmem:[#allocation2 + $0x1e0] sm:$0xf0] %v996_v42  ;;  %v1343_v15 = vld [vmem:[#allocation2 + $0x1d8] sm:$0xff] }
 0x108   : > { %v1136_v63 = vpop.permute.xlu2 %1135 }
 0x10a   : > { %v3668_v54 = vpop.permute.xlu1 %1133 }
 0x10b   : > { %1155 = vrot.lane.b32.xlu1 %v3525_v1, %s3227_s14  ;;  %v1165_v44 = vsel %vm594_vm0, %v3668_v54, %v1136_v63 }
 0x10c   : > { %1197 = vst [vmem:[#allocation2 + $0xa0] sm:$0xf0] %v1165_v44  ;;  %v1359_v36 = vld [vmem:[#allocation2 + $0x1d0] sm:$0xff]  ;;  %v1326_v44 = vld [vmem:[#allocation2 + $0x28] sm:$0xff] }
 0x10e   : > { %1240 = vrot.lane.b32.xlu0 %v1218_v2, %s3228_s15  ;;  %1258 = vrot.lane.b32.xlu2 %v1231_v8, %s3228_s15 }
 0x110   : > { %v3676_v39 = vpop.permute.xlu2 %1143 }
 0x111   : > { %v1140_v58 = vpop.permute.xlu0 %1139 }
 0x112   : > { %v1138_v33 = vpop.permute.xlu1 %1137 }
 0x113   : > { %1272 = vrot.lane.b32.xlu1 %v1239_v55, %s3228_s15  ;;  %v1166_v57 = vsel %vm594_vm0, %v1136_v63, %v1138_v33  ;;  %v1167_v1 = vsel %vm594_vm0, %v1138_v33, %v1140_v58 }
 0x114   : > { %1198 = vst [vmem:[#allocation2 + $0x1f8] sm:$0xf0] %v1166_v57 }
 0x115   : > { %1199 = vst [vmem:[#allocation2 + $0x58] sm:$0xf0] %v1167_v1 }
 0x116   : > { %1242 = vrot.lane.b32.xlu0 %v3624_v17, %s3228_s15  ;;  %1268 = vrot.lane.b32.xlu2 %v1236_v62, %s3228_s15 }
 0x118   : > { %v3684_v5 = vpop.permute.xlu2 %1151 }
 0x11b   : > { %1157 = vrot.lane.b32.xlu1 %v3550_v50, %s3227_s14 }
 0x11c   : > { %v1375_v56 = vld [vmem:[#allocation2 + $0x58] sm:$0xff] }
 0x11d   : > { %v1142_v26 = vpop.permute.xlu1 %1141 }
 0x11e   : > { %871 = vrot.lane.b32.xlu2 %v3464_v40, %s3227_s14  ;;  %1256 = vrot.lane.b32.xlu0 %v1230_v21, %s3228_s15  ;;  %v1168_v14 = vsel %vm594_vm0, %v1140_v58, %v1142_v26  ;;  %v1169_v4 = vsel %vm594_vm0, %v1142_v26, %v3676_v39  ;;  %v1325_v21 = vld [vmem:[#allocation2 + $0x40] sm:$0xff] }
 0x11f   : > { %1200 = vst [vmem:[#allocation2 + $0x258] sm:$0xf0] %v1168_v14 }
 0x120   : > { %v3694_v22 = vpop.permute.xlu2 %1244  ;;  %v972_v37 = vpop.permute.xlu0 %971  ;;  %1201 = vst [vmem:[#allocation2 + $0x260] sm:$0xf0] %v1169_v4 }
 0x121   : > { %v997_v2 = vsel %vm706_vm1, %v3626_v51, %v972_v37 }
 0x122   : > { %1029 = vst [vmem:[#allocation2 + $0x1a8] sm:$0xf0] %v997_v2 }
 0x123   : > { %698 = vrot.lane.b32.xlu1 %v3395_v45, %s3228_s15 }
 0x125   : > { %v3700_v40 = vpop.permute.xlu1 %1149 }
 0x126   : > { %1159 = vrot.lane.b32.xlu2 %v3553_v53, %s3227_s14  ;;  %584 = vrot.lane.b32.xlu0 %v3364_v29, %s3227_s14  ;;  %v1173_v50 = vsel %vm594_vm0, %v3700_v40, %v3684_v5 }
 0x127   : > { %1205 = vst [vmem:[#allocation2 + $0xd0] sm:$0xf0] %v1173_v50  ;;  %v1377_v4 = vld [vmem:[#allocation2 + $0x260] sm:$0xff] }
 0x128   : > { %v1247_v17 = vpop.permute.xlu2 %1246  ;;  %v974_v18 = vpop.permute.xlu0 %973 }
 0x129   : > { %v1276_v51 = vsel %vm706_vm1, %v3694_v22, %v1247_v17  ;;  %v998_v45 = vsel %vm706_vm1, %v972_v37, %v974_v18  ;;  %v1361_v2 = vld [vmem:[#allocation2 + $0x1a8] sm:$0xff] }
 0x12a   : > { %1308 = vst [vmem:[#allocation2 + $0x138] sm:$0xf] %v1276_v51 }
 0x12b   : > { %1030 = vst [vmem:[#allocation2 + $0x228] sm:$0xf0] %v998_v45  ;;  %877 = vrot.lane.b32.xlu1 %v3509_v27, %s3227_s14  ;;  %v1357_v27 = vld [vmem:[#allocation2 + $0xe0] sm:$0xff] }
 0x12d   : > { %v976_v53 = vpop.permute.xlu1 %975 }
 0x12e   : > { %873 = vrot.lane.b32.xlu2 %v3466_v41, %s3227_s14  ;;  %1270 = vrot.lane.b32.xlu0 %v1237_v3, %s3228_s15  ;;  %v999_v29 = vsel %vm706_vm1, %v974_v18, %v976_v53  ;;  %v1373_v41 = vld [vmem:[#allocation2 + $0xa0] sm:$0xff]  ;;  %v1345_v18 = vld [vmem:[#allocation2 + $0x248] sm:$0xff]  ;;  %v1329_v3 = vld [vmem:[#allocation2 + $0x70] sm:$0xff] }
 0x12f   : > { %1031 = vst [vmem:[#allocation2] sm:$0xf0] %v999_v29 }
 0x130   : > { %v3718_v28 = vpop.permute.xlu2 %1250  ;;  %v1249_v19 = vpop.permute.xlu0 %1248 }
 0x131   : > { %v1277_v38 = vsel %vm706_vm1, %v1247_v17, %v1249_v19  ;;  %v1278_v11 = vsel %vm706_vm1, %v1249_v19, %v3718_v28  ;;  %v1389_v35 = vld [vmem:[#allocation2 + $0x138] sm:$0xf] }
 0x132   : > { %1309 = vst [vmem:[#allocation2 + $0x208] sm:$0xf] %v1277_v38  ;;  %3079 = vmatpush.msk.msra.mxu2 %vm1413_vm2, %v1389_v35 }
 0x133   : > { %1310 = vst [vmem:[#allocation2 + $0x240] sm:$0xf] %v1278_v11  ;;  %989 = vrot.lane.b32.xlu1 %v3557_v7, %s3228_s15 }
 0x134   : > { %1514 = vmatpush.msra.mxu2 %v1373_v41 }
 0x135   : > { %v3726_v59 = vpop.permute.xlu1 %1254 }
 0x136   : > { %1515 = vmatpush.msra.mxu2 %v1357_v27  ;;  %985 = vrot.lane.b32.xlu2 %v3494_v12, %s3228_s15  ;;  %v3741_v12 = vld [vmem:[%s4275_s1] sm:$0xff] }
 0x137   : > { %983 = vrot.lane.b32.xlu0 %v3492_v10, %s3228_s15 }
 0x138   : > { %1516 = vmatpush.msra.mxu2 %v1341_v48  ;;  %v866_v31 = vpop.permute.xlu2 %865  ;;  %v3732_v49 = vpop.permute.xlu0 %867 }
 0x139   : > { %v888_v8 = vsel %vm594_vm0, %v3638_v25, %v866_v31  ;;  %v889_v7 = vsel %vm594_vm0, %v866_v31, %v3732_v49  ;;  %v1390_v23 = vld [vmem:[#allocation2 + $0x208] sm:$0xf]  ;;  %v1374_v25 = vld [vmem:[#allocation2 + $0x1f8] sm:$0xff] }
 0x13a   : > { %920 = vst [vmem:[#allocation2 + $0x1b0] sm:$0xf] %v888_v8  ;;  %1517 = vmatpush.msra.mxu2 %v1325_v21  ;;  %3081 = vmatpush.msk.msra.mxu3 %vm1413_vm2, %v1390_v23  ;;  %v1391_v10 = vld [vmem:[#allocation2 + $0x240] sm:$0xf] }
 0x13b   : > { %921 = vst [vmem:[#allocation2 + $0x90] sm:$0xf] %v889_v7  ;;  %3083 = vmatpush.msk.msra.mxu0 %vm1413_vm2, %v1391_v10  ;;  %702 = vrot.lane.b32.xlu1 %v3422_v61, %s3228_s15 }
 0x13c   : > { %1534 = vmatpush.msra.mxu3 %v1374_v25  ;;  %3080 = vmatmul.msk.f32.vlgmr.msra.gmra.mxu2 %vm1409_vm3, %v3741_v12 }
 0x13d   : > { %1554 = vmatpush.msra.mxu0 %v1375_v56  ;;  %v3749_v34 = vpop.permute.xlu1 %1262 }
 0x13e   : > { %1535 = vmatpush.msra.mxu3 %v1358_v24  ;;  %586 = vrot.lane.b32.xlu2 %v3366_v30, %s3227_s14  ;;  %v1327_v30 = vld [vmem:[#allocation2 + $0xe8] sm:$0xff] }
 0x13f   : > { %1555 = vmatpush.msra.mxu0 %v1359_v36  ;;  %1161 = vrot.lane.b32.xlu0 %v3614_v6, %s3227_s14  ;;  %v3229_v6 = vmov 0  }
 0x140   : > { %v978_v61 = vpop.permute.xlu2 %977  ;;  %1536 = vmatpush.msra.mxu3 %v1342_v52  ;;  %v3755_v32 = vpop.permute.xlu0 %979  ;;  %3166 = vset.pattern.permute.xlu0 %v3229_v6 }
 0x141   : > { %v1000_v42 = vsel %vm706_vm1, %v976_v53, %v978_v61  ;;  %1556 = vmatpush.msra.mxu0 %v1343_v15  ;;  %v1001_v63 = vsel %vm706_vm1, %v978_v61, %v3755_v32  ;;  %3217 = vset.pattern.permute.xlu1 %v3229_v6  ;;  %v1381_v53 = vld [vmem:[#allocation2 + $0xd0] sm:$0xff] }
 0x142   : > { %1032 = vst [vmem:[#allocation2 + $0x1b0] sm:$0xf0] %v1000_v42  ;;  %1537 = vmatpush.msra.mxu3 %v1326_v44  ;;  %3218 = vset.pattern.permute.xlu2 %v3229_v6 }
 0x143   : > { %1033 = vst [vmem:[#allocation2 + $0x90] sm:$0xf0] %v1001_v63  ;;  %1557 = vmatpush.msra.mxu0 %v1327_v30  ;;  %3082 = vmatmul.msk.f32.vlgmr.msra.gmra.mxu3 %vm1409_vm3, %v3741_v12 }
 0x144   : > { %590 = vrot.lane.b32.xlu1 %v3401_v47, %s3227_s14  ;;  %3084 = vmatmul.msk.f32.vlgmr.msra.gmra.mxu0 %vm1409_vm3, %v3741_v12 }
 0x145   : > { %v3764_v55 = vpop.permute.xlu1 %1153 }
 0x146   : > { %v1174_v58 = vsel %vm594_vm0, %v3684_v5, %v3764_v55  ;;  %704 = vrot.lane.b32.xlu2 %v3434_v13, %s3228_s15 }
 0x147   : > { %875 = vrot.lane.b32.xlu0 %v3504_v20, %s3227_s14  ;;  %1206 = vst [vmem:[#allocation2 + $0x278] sm:$0xf0] %v1174_v58 }
 0x148   : > { %v691_v47 = vpop.permute.xlu2 %690  ;;  %v1253_v33 = vpop.permute.xlu0 %1252 }
 0x149   : > { %v715_v62 = vsel %vm706_vm1, %v3595_v16, %v691_v47  ;;  %v1279_v57 = vsel %vm706_vm1, %v3718_v28, %v1253_v33  ;;  %v1280_v1 = vsel %vm706_vm1, %v1253_v33, %v3726_v59 }
 0x14a   : > { %747 = vst [vmem:[#allocation2 + $0x190] sm:$0xf] %v715_v62  ;;  %v1365_v29 = vld [vmem:[#allocation2 + $0x90] sm:$0xff] }
 0x14b   : > { %1311 = vst [vmem:[#allocation2 + $0x88] sm:$0xf] %v1279_v57 }
 0x14c   : > { %1312 = vst [vmem:[#allocation2 + $0x118] sm:$0xf] %v1280_v1 }
 0x14d   : > { %v1130_v13 = vpop.permute.xlu1 %1129 }
 0x14e   : > { %592 = vrot.lane.b32.xlu2 %v3390_v43, %s3227_s14 }
 0x14f   : > { %987 = vrot.lane.b32.xlu0 %v3555_v0, %s3228_s15 }
 0x150   : > { %v3785_v20 = vpop.permute.xlu2 %869  ;;  %v1261_v5 = vpop.permute.xlu0 %1260 }
 0x151   : > { %v890_v16 = vsel %vm594_vm0, %v3732_v49, %v3785_v20  ;;  %v1284_v26 = vsel %vm706_vm1, %v1261_v5, %v3749_v34 }
 0x152   : > { %922 = vst [vmem:[#allocation2 + $0x270] sm:$0xf] %v890_v16 }
 0x153   : > { %1316 = vst [vmem:[#allocation2 + $0x170] sm:$0xf] %v1284_v26  ;;  %v1393_v14 = vld [vmem:[#allocation2 + $0x118] sm:$0xf] }
 0x154   : > { %3087 = vmatpush.msk.msrb.mxu2 %vm1413_vm2, %v1393_v14  ;;  %v1355_v14 = vld [vmem:[#allocation2 + $0xf8] sm:$0xff] }
 0x155   : > { %v1132_v43 = vpop.permute.xlu1 %1131 }
 0x156   : > { %1594 = vmatpush.msrb.mxu2 %v1377_v4  ;;  %v1163_v0 = vsel %vm594_vm0, %v1130_v13, %v1132_v43  ;;  %v1164_v37 = vsel %vm594_vm0, %v1132_v43, %v3668_v54 }
 0x157   : > { %700 = vrot.lane.b32.xlu0 %v3420_v60, %s3228_s15  ;;  %1195 = vst [vmem:[#allocation2 + $0x78] sm:$0xf0] %v1163_v0  ;;  %v1339_v0 = vld [vmem:[#allocation2 + $0x80] sm:$0xff] }
 0x158   : > { %1595 = vmatpush.msrb.mxu2 %v1361_v2  ;;  %v581_v50 = vpop.permute.xlu2 %580  ;;  %v1265_v17 = vpop.permute.xlu0 %1264  ;;  %1196 = vst [vmem:[#allocation2 + $0x1f0] sm:$0xf0] %v1164_v37 }
 0x159   : > { %v1285_v51 = vsel %vm706_vm1, %v3749_v34, %v1265_v17 }
 0x15a   : > { %1596 = vmatpush.msrb.mxu2 %v1345_v18  ;;  %1317 = vst [vmem:[#allocation2 + $0x150] sm:$0xf] %v1285_v51  ;;  %v1397_v45 = vld [vmem:[#allocation2 + $0x170] sm:$0xf] }
 0x15c   : > { %1597 = vmatpush.msrb.mxu2 %v1329_v3 }
 0x15d   : > { %v1146_v54 = vpop.permute.xlu1 %1145  ;;  %3088 = vmatmul.msk.f32.vlgmr.msrb.gmra.mxu2 %vm1409_vm3, %v3741_v12 }
 0x15e   : > { %3095 = vmatpush.msk.msra.mxu2 %vm1413_vm2, %v1397_v45  ;;  %v1170_v60 = vsel %vm594_vm0, %v3676_v39, %v1146_v54  ;;  %v1403_v39 = vld [vmem:[%s4276_s2] sm:$0xff] }
 0x15f   : > { %588 = vrot.lane.b32.xlu0 %v3399_v46, %s3227_s14  ;;  %1202 = vst [vmem:[#allocation2 + $0x100] sm:$0xf0] %v1170_v60  ;;  %v1371_v26 = vld [vmem:[#allocation2 + $0x78] sm:$0xff]  ;;  %v1362_v60 = vld [vmem:[#allocation2 + $0x228] sm:$0xff] }
 0x160   : > { %1674 = vmatpush.msra.mxu2 %v1381_v53  ;;  %v1267_v28 = vpop.permute.xlu2 %1266  ;;  %v693_v19 = vpop.permute.xlu0 %692  ;;  %v1372_v53 = vld [vmem:[#allocation2 + $0x1f0] sm:$0xff] }
 0x161   : > { %v1286_v38 = vsel %vm706_vm1, %v1265_v17, %v1267_v28  ;;  %v716_v11 = vsel %vm706_vm1, %v691_v47, %v693_v19  ;;  %v1323_v17 = vld [vmem:[#allocation2 + $0xc8] sm:$0xff] }
 0x162   : > { %1675 = vmatpush.msra.mxu2 %v1365_v29  ;;  %1318 = vst [vmem:[#allocation2 + $0x20] sm:$0xf] %v1286_v38  ;;  %v1346_v38 = vld [vmem:[#allocation2 + $0x218] sm:$0xff] }
 0x163   : > { %748 = vst [vmem:[#allocation2 + $0x48] sm:$0xf] %v716_v11 }
 0x165   : > { %v695_v35 = vpop.permute.xlu1 %694 }
 0x166   : > { %v717_v41 = vsel %vm706_vm1, %v693_v19, %v695_v35  ;;  %v1378_v3 = vld [vmem:[#allocation2 + $0x100] sm:$0xff]  ;;  %v1356_v19 = vld [vmem:[#allocation2 + $0x98] sm:$0xff] }
 0x167   : > { %1406 = vperm.xlu0 %3166, %v1403_v39   ;;  %749 = vst [vmem:[#allocation2 + $0x68] sm:$0xf] %v717_v41  ;;  %v1347_v39 = vld [vmem:[#allocation2 + $0x190] sm:$0xff] }
 0x168   : > { %v3813_v46 = vpop.permute.xlu0 %981  ;;  %v1259_v27 = vpop.permute.xlu2 %1258 }
 0x169   : > { %v1002_v48 = vsel %vm706_vm1, %v3755_v32, %v3813_v46  ;;  %v1283_v31 = vsel %vm706_vm1, %v1259_v27, %v1261_v5 }
 0x16a   : > { %1034 = vst [vmem:[#allocation2 + $0x270] sm:$0xf0] %v1002_v48  ;;  %v1330_v48 = vld [vmem:[#allocation2 + $0x120] sm:$0xff] }
 0x16b   : > { %1315 = vst [vmem:[#allocation2 + $0x230] sm:$0xf] %v1283_v31 }
 0x16d   : > { %v579_v49 = vpop.permute.xlu1 %578 }
 0x16e   : > { %v603_v8 = vsel %vm594_vm0, %v3571_v9, %v579_v49  ;;  %v604_v7 = vsel %vm594_vm0, %v579_v49, %v581_v50  ;;  %v1349_v21 = vld [vmem:[#allocation2 + $0x68] sm:$0xff] }
 0x16f   : > { %635 = vst [vmem:[#allocation2 + $0xd8] sm:$0xf0] %v603_v8  ;;  %1676 = vmatpush.msra.mxu2 %v1349_v21  ;;  %v1324_v49 = vld [vmem:[#allocation2 + $0x8] sm:$0xff]  ;;  %v1399_v8 = vld [vmem:[#allocation2 + $0x20] sm:$0xf] }
 0x170   : > { %v1148_v23 = vpop.permute.xlu0 %1147  ;;  %v3822_v10 = vpop.permute.xlu2 %1268  ;;  %636 = vst [vmem:[#allocation2 + $0x148] sm:$0xf0] %v604_v7  ;;  %v1398_v7 = vld [vmem:[#allocation2 + $0x150] sm:$0xf]  ;;  %v1392_v21 = vld [vmem:[#allocation2 + $0x88] sm:$0xf] }
 0x171   : > { %v1172_v25 = vsel %vm594_vm0, %v1148_v23, %v3700_v40  ;;  %v1171_v56 = vsel %vm594_vm0, %v1146_v54, %v1148_v23  ;;  %v1287_v24 = vsel %vm706_vm1, %v1267_v28, %v3822_v10  ;;  %v1363_v28 = vld [vmem:[#allocation2] sm:$0xff] }
 0x172   : > { %1204 = vst [vmem:[#allocation2 + $0x168] sm:$0xf0] %v1172_v25  ;;  %v1382_v25 = vld [vmem:[#allocation2 + $0x278] sm:$0xff] }
 0x173   : > { %1203 = vst [vmem:[#allocation2 + $0x1b8] sm:$0xf0] %v1171_v56  ;;  %v1376_v56 = vld [vmem:[#allocation2 + $0x258] sm:$0xff] }
 0x174   : > { %1319 = vst [vmem:[#allocation2 + $0x178] sm:$0xf] %v1287_v24  ;;  %v1366_v24 = vld [vmem:[#allocation2 + $0x270] sm:$0xff] }
 0x175   : > { %v697_v9 = vpop.permute.xlu1 %696 }
 0x176   : > { %v718_v34 = vsel %vm706_vm1, %v695_v35, %v697_v9  ;;  %v1340_v35 = vld [vmem:[#allocation2 + $0x30] sm:$0xff]  ;;  %v1331_v31 = vld [vmem:[#allocation2 + $0xd8] sm:$0xff] }
 0x177   : > { %750 = vst [vmem:[#allocation2 + $0x238] sm:$0xf] %v718_v34 }
 0x178   : > { %v583_v36 = vpop.permute.xlu0 %582  ;;  %v872_v52 = vpop.permute.xlu2 %871 }
 0x179   : > { %v605_v61 = vsel %vm594_vm0, %v581_v50, %v583_v36  ;;  %v891_v15 = vsel %vm594_vm0, %v3785_v20, %v872_v52 }
 0x17a   : > { %637 = vst [vmem:[#allocation2 + $0x158] sm:$0xf0] %v605_v61  ;;  %v1379_v54 = vld [vmem:[#allocation2 + $0x1b8] sm:$0xff] }
 0x17b   : > { %923 = vst [vmem:[#allocation2 + $0x1e8] sm:$0xf] %v891_v15 }
 0x17d   : > { %v1156_v40 = vpop.permute.xlu1 %1155 }
 0x17e   : > { %v1175_v32 = vsel %vm594_vm0, %v3764_v55, %v1156_v40 }
 0x17f   : > { %1207 = vst [vmem:[#allocation2 + $0x210] sm:$0xf0] %v1175_v32 }
 0x180   : > { %v1241_v42 = vpop.permute.xlu0 %1240  ;;  %v3835_v63 = vpop.permute.xlu2 %1159 }
 0x181   : > { %v1333_v44 = vld [vmem:[#allocation2 + $0x158] sm:$0xff] }
 0x182   : > { %1677 = vmatpush.msra.mxu2 %v1333_v44 }
 0x183   : > { %3096 = vmatmul.msk.f32.vlgmr.msra.gmra.mxu2 %vm1409_vm3, %v3741_v12 }
 0x185   : > { %v3839_v30 = vpop.permute.xlu1 %1272 }
 0x186   : > { %v1383_v23 = vld [vmem:[#allocation2 + $0x210] sm:$0xff] }
 0x188   : > { %v1243_v6 = vpop.permute.xlu0 %1242  ;;  %v3841_v58 = vpop.permute.xlu2 %873 }
 0x189   : > { %v1274_v47 = vsel %vm706_vm1, %v1241_v42, %v1243_v6  ;;  %v1275_v33 = vsel %vm706_vm1, %v1243_v6, %v3694_v22  ;;  %v892_v55 = vsel %vm594_vm0, %v872_v52, %v3841_v58  ;;  %v1344_v42 = vld [vmem:[#allocation2 + $0x1a0] sm:$0xff] }
 0x18a   : > { %1306 = vst [vmem:[#allocation2 + $0xa8] sm:$0xf] %v1274_v47 }
 0x18b   : > { %1307 = vst [vmem:[#allocation2 + $0x60] sm:$0xf] %v1275_v33  ;;  %v1396_v33 = vld [vmem:[#allocation2 + $0x230] sm:$0xf] }
 0x18c   : > { %924 = vst [vmem:[#allocation2 + $0x38] sm:$0xf] %v892_v55  ;;  %v1380_v55 = vld [vmem:[#allocation2 + $0x168] sm:$0xff] }
 0x18d   : > { %v1158_v62 = vpop.permute.xlu1 %1157 }
 0x18e   : > { %v1176_v57 = vsel %vm594_vm0, %v1156_v40, %v1158_v62  ;;  %v1177_v1 = vsel %vm594_vm0, %v1158_v62, %v3835_v63  ;;  %v1350_v40 = vld [vmem:[#allocation2 + $0x238] sm:$0xff] }
 0x18f   : > { %1208 = vst [vmem:[#allocation2 + $0x180] sm:$0xf0] %v1176_v57 }
 0x190   : > { %v3851_v13 = vpop.permute.xlu2 %985  ;;  %v1257_v20 = vpop.permute.xlu0 %1256  ;;  %1209 = vst [vmem:[#allocation2 + $0x130] sm:$0xf0] %v1177_v1 }
 0x191   : > { %v1281_v22 = vsel %vm706_vm1, %v3726_v59, %v1257_v20  ;;  %v1282_v5 = vsel %vm706_vm1, %v1257_v20, %v1259_v27  ;;  %v1387_v16 = vld [vmem:[#allocation2 + $0xa8] sm:$0xf]  ;;  %v1364_v20 = vld [vmem:[#allocation2 + $0x1b0] sm:$0xff] }
 0x192   : > { %1313 = vst [vmem:[#allocation2 + $0x128] sm:$0xf] %v1281_v22  ;;  %3075 = vmatpush.msk.msra.mxu1 %vm1413_vm2, %v1387_v16  ;;  %v1388_v45 = vld [vmem:[#allocation2 + $0x60] sm:$0xf]  ;;  %v1348_v16 = vld [vmem:[#allocation2 + $0x48] sm:$0xff] }
 0x193   : > { %1314 = vst [vmem:[#allocation2 + $0x1c0] sm:$0xf] %v1282_v5 }
 0x194   : > { %1474 = vmatpush.msra.mxu1 %v1371_v26 }
 0x195   : > { %v3857_v4 = vpop.permute.xlu1 %698 }
 0x196   : > { %1475 = vmatpush.msra.mxu1 %v1355_v14  ;;  %v719_v43 = vsel %vm706_vm1, %v697_v9, %v3857_v4  ;;  %v1360_v9 = vld [vmem:[#allocation2 + $0x1e0] sm:$0xff] }
 0x197   : > { %751 = vst [vmem:[#allocation2 + $0x188] sm:$0xf] %v719_v43  ;;  %v1385_v52 = vld [vmem:[#allocation2 + $0x130] sm:$0xff]  ;;  %v1332_v43 = vld [vmem:[#allocation2 + $0x148] sm:$0xff] }
 0x198   : > { %1476 = vmatpush.msra.mxu1 %v1339_v0  ;;  %v3861_v59 = vpop.permute.xlu2 %586  ;;  %v585_v37 = vpop.permute.xlu0 %584 }
 0x199   : > { %v606_v2 = vsel %vm594_vm0, %v583_v36, %v585_v37  ;;  %v607_v50 = vsel %vm594_vm0, %v585_v37, %v3861_v59  ;;  %v1394_v18 = vld [vmem:[#allocation2 + $0x128] sm:$0xf] }
 0x19a   : > { %638 = vst [vmem:[#allocation2 + $0x108] sm:$0xf0] %v606_v2  ;;  %1477 = vmatpush.msra.mxu1 %v1323_v17  ;;  %3089 = vmatpush.msk.msrb.mxu3 %vm1413_vm2, %v1394_v18  ;;  %v1395_v51 = vld [vmem:[#allocation2 + $0x1c0] sm:$0xf] }
 0x19b   : > { %639 = vst [vmem:[#allocation2 + $0x220] sm:$0xf0] %v607_v50  ;;  %3091 = vmatpush.msk.msrb.mxu0 %vm1413_vm2, %v1395_v51  ;;  %3076 = vmatmul.msk.f32.vlgmr.msra.gmra.mxu1 %vm1409_vm3, %v3741_v12  ;;  %v1384_v18 = vld [vmem:[#allocation2 + $0x180] sm:$0xff] }
 0x19c   : > { %3077 = vmatpush.msk.msrb.mxu1 %vm1413_vm2, %v1388_v45  ;;  %1614 = vmatpush.msrb.mxu3 %v1378_v3 }
 0x19d   : > { %1634 = vmatpush.msrb.mxu0 %v1379_v54  ;;  %v3871_v29 = vpop.permute.xlu1 %877 }
 0x19e   : > { %1494 = vmatpush.msrb.mxu1 %v1372_v53  ;;  %1615 = vmatpush.msrb.mxu3 %v1362_v60  ;;  %v1351_v22 = vld [vmem:[#allocation2 + $0x188] sm:$0xff] }
 0x19f   : > { %1635 = vmatpush.msrb.mxu0 %v1363_v28 }
 0x1a0   : > { %1495 = vmatpush.msrb.mxu1 %v1356_v19  ;;  %1616 = vmatpush.msrb.mxu3 %v1346_v38  ;;  %v1271_v11 = vpop.permute.xlu0 %1270  ;;  %v705_v32 = vpop.permute.xlu2 %704 }
 0x1a1   : > { %v1288_v41 = vsel %vm706_vm1, %v3822_v10, %v1271_v11  ;;  %v1289_v27 = vsel %vm706_vm1, %v1271_v11, %v3839_v30  ;;  %1636 = vmatpush.msrb.mxu0 %v1347_v39  ;;  %v1334_v44 = vld [vmem:[#allocation2 + $0x108] sm:$0xff]  ;;  %v1328_v30 = vld [vmem:[#allocation2 + $0xf0] sm:$0xff] }
 0x1a2   : > { %1496 = vmatpush.msrb.mxu1 %v1340_v35  ;;  %1320 = vst [vmem:[#allocation2 + $0x50] sm:$0xf] %v1288_v41  ;;  %1617 = vmatpush.msrb.mxu3 %v1330_v48  ;;  %v1335_v26 = vld [vmem:[#allocation2 + $0x220] sm:$0xff] }
 0x1a3   : > { %1321 = vst [vmem:[#allocation2 + $0xb0] sm:$0xf] %v1289_v27  ;;  %1637 = vmatpush.msrb.mxu0 %v1331_v31  ;;  %3090 = vmatmul.msk.f32.vlgmr.msrb.gmra.mxu3 %vm1409_vm3, %v3741_v12 }
 0x1a4   : > { %1497 = vmatpush.msrb.mxu1 %v1324_v49  ;;  %3097 = vmatpush.msk.msra.mxu3 %vm1413_vm2, %v1398_v7 }
 0x1a5   : > { %3099 = vmatpush.msk.msra.mxu0 %vm1413_vm2, %v1399_v8  ;;  %3078 = vmatmul.msk.f32.vlgmr.msrb.gmra.mxu1 %vm1409_vm3, %v3741_v12  ;;  %v3883_v10 = vpop.permute.xlu1 %989 }
 0x1a6   : > { %3085 = vmatpush.msk.msra.mxu1 %vm1413_vm2, %v1392_v21  ;;  %1694 = vmatpush.msra.mxu3 %v1382_v25 }
 0x1a7   : > { %1714 = vmatpush.msra.mxu0 %v1383_v23 }
 0x1a8   : > { %3092 = vmatmul.msk.f32.vlgmr.msrb.gmra.mxu0 %vm1409_vm3, %v3741_v12  ;;  %1574 = vmatpush.msra.mxu1 %v1376_v56  ;;  %v593_v5 = vpop.permute.xlu2 %592 }
 0x1a9   : > { %1695 = vmatpush.msra.mxu3 %v1366_v24  ;;  %v984_v34 = vpop.permute.xlu0 %983  ;;  %v1401_v36 = vld [vmem:[#allocation2 + $0x50] sm:$0xf] }
 0x1aa   : > { %1575 = vmatpush.msra.mxu1 %v1360_v9  ;;  %v1003_v61 = vsel %vm706_vm1, %v3813_v46, %v984_v34  ;;  %v1004_v15 = vsel %vm706_vm1, %v984_v34, %v3851_v13  ;;  %3103 = vmatpush.msk.msrb.mxu2 %vm1413_vm2, %v1401_v36  ;;  %v1402_v46 = vld [vmem:[#allocation2 + $0xb0] sm:$0xf] }
 0x1ab   : > { %1035 = vst [vmem:[#allocation2 + $0x1e8] sm:$0xf0] %v1003_v61  ;;  %1696 = vmatpush.msra.mxu3 %v1350_v40 }
 0x1ac   : > { %1036 = vst [vmem:[#allocation2 + $0x38] sm:$0xf0] %v1004_v15  ;;  %1576 = vmatpush.msra.mxu1 %v1344_v42  ;;  %1754 = vmatpush.msrb.mxu2 %v1385_v52 }
 0x1ad   : > { %1697 = vmatpush.msra.mxu3 %v1334_v44  ;;  %v703_v6 = vpop.permute.xlu1 %702 }
 0x1ae   : > { %1577 = vmatpush.msra.mxu1 %v1328_v30  ;;  %3098 = vmatmul.msk.f32.vlgmr.msra.gmra.mxu3 %vm1409_vm3, %v3741_v12  ;;  %v722_v47 = vsel %vm706_vm1, %v703_v6, %v705_v32 }
 0x1af   : > { %3105 = vmatpush.msk.msrb.mxu3 %vm1413_vm2, %v1402_v46  ;;  %3086 = vmatmul.msk.f32.vlgmr.msra.gmra.mxu1 %vm1409_vm3, %v3741_v12  ;;  %754 = vst [vmem:[#allocation2 + $0x268] sm:$0xf] %v722_v47 }
 0x1b0   : > { %3093 = vmatpush.msk.msrb.mxu1 %vm1413_vm2, %v1396_v33 }
 0x1b1   : > { %v1162_v62 = vpop.permute.xlu0 %1161 }
 0x1b2   : > { %1654 = vmatpush.msrb.mxu1 %v1380_v55  ;;  %v1178_v57 = vsel %vm594_vm0, %v3835_v63, %v1162_v62  ;;  %v1367_v1 = vld [vmem:[#allocation2 + $0x1e8] sm:$0xff]  ;;  %v1400_v63 = vld [vmem:[#allocation2 + $0x178] sm:$0xf] }
 0x1b3   : > { %1210 = vst [vmem:[#allocation2 + $0x110] sm:$0xf0] %v1178_v57  ;;  %1715 = vmatpush.msra.mxu0 %v1367_v1  ;;  %v1368_v51 = vld [vmem:[#allocation2 + $0x38] sm:$0xff] }
 0x1b4   : > { %1655 = vmatpush.msrb.mxu1 %v1364_v20 }
 0x1b5   : > { %1716 = vmatpush.msra.mxu0 %v1351_v22 }
 0x1b6   : > { %1656 = vmatpush.msrb.mxu1 %v1348_v16  ;;  %v591_v14 = vpop.permute.xlu1 %590  ;;  %v1354_v19 = vld [vmem:[#allocation2 + $0x268] sm:$0xff] }
 0x1b7   : > { %1717 = vmatpush.msra.mxu0 %v1335_v26  ;;  %v610_v0 = vsel %vm594_vm0, %v591_v14, %v593_v5 }
 0x1b8   : > { %1657 = vmatpush.msrb.mxu1 %v1332_v43  ;;  %3100 = vmatmul.msk.f32.vlgmr.msra.gmra.mxu0 %vm1409_vm3, %v3741_v12  ;;  %642 = vst [vmem:[#allocation2 + $0x200] sm:$0xf0] %v610_v0  ;;  %v1893_v0 = vld [vmem:[%s4283_s9 + $0x8] sm:$0xff] }
 0x1b9   : > { %3094 = vmatmul.msk.f32.vlgmr.msrb.gmra.mxu1 %vm1409_vm3, %v3741_v12  ;;  %v876_v37 = vpop.permute.xlu0 %875  ;;  %2025 = vmatpush.msrb.mxu0 %v1893_v0 }
 0x1ba   : > { %3101 = vmatpush.msk.msra.mxu1 %vm1413_vm2, %v1400_v63  ;;  %v893_v2 = vsel %vm594_vm0, %v3841_v58, %v876_v37  ;;  %v894_v50 = vsel %vm594_vm0, %v876_v37, %v3871_v29  ;;  %v1386_v17 = vld [vmem:[#allocation2 + $0x110] sm:$0xff]  ;;  %v1892_v63 = vld [vmem:[%s4283_s9] sm:$0xff] }
 0x1bb   : > { %925 = vst [vmem:[#allocation2 + $0x1c8] sm:$0xf] %v893_v2  ;;  %1774 = vmatpush.msrb.mxu3 %v1386_v17  ;;  %2026 = vmatpush.msrb.mxu0 %v1892_v63 }
 0x1bc   : > { %926 = vst [vmem:[#allocation2 + $0x18] sm:$0xf] %v894_v50  ;;  %1734 = vmatpush.msra.mxu1 %v1384_v18 }
 0x1be   : > { %1735 = vmatpush.msra.mxu1 %v1368_v51 }
 0x1bf   : > { %v1338_v38 = vld [vmem:[#allocation2 + $0x200] sm:$0xff]  ;;  %v1519_v41 = vpop.f32.mrf.mxu2 }
 0x1c1   : > { %v988_v45 = vpop.permute.xlu0 %987  ;;  %v1559_v48 = vpop.f32.mrf.mxu0 }
 0x1c2   : > { %v1005_v3 = vsel %vm706_vm1, %v3851_v13, %v988_v45  ;;  %v1006_v54 = vsel %vm706_vm1, %v988_v45, %v3883_v10 }
 0x1c3   : > { %1037 = vst [vmem:[#allocation2 + $0x1c8] sm:$0xf0] %v1005_v3 }
 0x1c4   : > { %1038 = vst [vmem:[#allocation2 + $0x18] sm:$0xf0] %v1006_v54 }
 0x1c6   : > { %v1539_v27 = vpop.f32.mrf.mxu3 }
 0x1c9   : > { %v701_v58 = vpop.permute.xlu0 %700 }
 0x1ca   : > { %v720_v53 = vsel %vm706_vm1, %v3857_v4, %v701_v58  ;;  %v721_v60 = vsel %vm706_vm1, %v701_v58, %v703_v6  ;;  %v1369_v29 = vld [vmem:[#allocation2 + $0x1c8] sm:$0xff] }
 0x1cb   : > { %752 = vst [vmem:[#allocation2 + $0x250] sm:$0xf] %v720_v53  ;;  %1755 = vmatpush.msrb.mxu2 %v1369_v29  ;;  %v1370_v28 = vld [vmem:[#allocation2 + $0x18] sm:$0xff] }
 0x1cc   : > { %753 = vst [vmem:[#allocation2 + $0xb8] sm:$0xf] %v721_v60  ;;  %1775 = vmatpush.msrb.mxu3 %v1370_v28 }
 0x1ce   : > { %1776 = vmatpush.msrb.mxu3 %v1354_v19 }
 0x1d0   : > { %1777 = vmatpush.msrb.mxu3 %v1338_v38 }
 0x1d1   : > { %v589_v13 = vpop.permute.xlu0 %588  ;;  %3106 = vmatmul.msk.f32.vlgmr.msrb.gmra.mxu3 %vm1409_vm3, %v3741_v12 }
 0x1d2   : > { %v608_v11 = vsel %vm594_vm0, %v3861_v59, %v589_v13  ;;  %v609_v4 = vsel %vm594_vm0, %v589_v13, %v591_v14  ;;  %v1352_v39 = vld [vmem:[#allocation2 + $0x250] sm:$0xff]  ;;  %1941 = vmatpush.msra.mxu3 %v1893_v0 }
 0x1d3   : > { %640 = vst [vmem:[#allocation2 + $0xc0] sm:$0xf0] %v608_v11  ;;  %1736 = vmatpush.msra.mxu1 %v1352_v39  ;;  %v1353_v35 = vld [vmem:[#allocation2 + $0xb8] sm:$0xff] }
 0x1d4   : > { %641 = vst [vmem:[#allocation2 + $0x140] sm:$0xf0] %v609_v4  ;;  %1756 = vmatpush.msrb.mxu2 %v1353_v35  ;;  %1942 = vmatpush.msra.mxu3 %v1892_v63 }
 0x1d6   : > { %1997 = vmatpush.msrb.mxu3 %v1893_v0 }
 0x1d8   : > { %1998 = vmatpush.msrb.mxu3 %v1892_v63 }
 0x1d9   : > { %v3924_v31 = vpop.permute.xlu0 %1406 }
 0x1da   : > { %v1336_v49 = vld [vmem:[#allocation2 + $0xc0] sm:$0xff]  ;;  %v1520_v8 = vadd.f32 %v1519_v41, %v3924_v31  ;;  %v1540_v7 = vadd.f32 %v1539_v27, %v3924_v31  ;;  %v1560_v59 = vadd.f32 %v1559_v48, %v3924_v31 }
 0x1db   : > { %1737 = vmatpush.msra.mxu1 %v1336_v49  ;;  %v1337_v21 = vld [vmem:[#allocation2 + $0x140] sm:$0xff] }
 0x1dc   : > { %1757 = vmatpush.msrb.mxu2 %v1337_v21  ;;  %3102 = vmatmul.msk.f32.vlgmr.msra.gmra.mxu1 %vm1409_vm3, %v3741_v12  ;;  %v1784_v23 = vmax.f32 %v1520_v8, 0.0  ;;  %v1785_v10 = vmax.f32 %v1540_v7, 0.0  ;;  %v1786_v25 = vmax.f32 %v1560_v59, 0.0 }
 0x1dd   : > { %3104 = vmatmul.msk.f32.vlgmr.msrb.gmra.mxu2 %vm1409_vm3, %v3741_v12  ;;  %2053 = vmatpush.msrb.mxu1 %v1893_v0 }
 0x1de   : > { %v3933_v56 = vmax.f32 %v1784_v23, %v1785_v10  ;;  %v1812_v24 = vmax.f32 %v1785_v10, %v1786_v25  ;;  %1912 = vmatpush.msra.mxu2 %v1893_v0 }
 0x1df   : > { %2054 = vmatpush.msrb.mxu1 %v1892_v63 }
 0x1e0   : > { %1843 = vrot.lane.b32.xlu1 %v3933_v56, %s3227_s14  ;;  %1845 = vrot.lane.b32.xlu2 %v1812_v24, %s3227_s14  ;;  %v1599_v61 = vpop.f32.mrf.mxu2 }
 0x1e1   : > { %v1600_v40 = vadd.f32 %v1599_v61, %v3924_v31  ;;  %1913 = vmatpush.msra.mxu2 %v1892_v63 }
 0x1e3   : > { %v1788_v46 = vmax.f32 %v1600_v40, 0.0  ;;  %1969 = vmatpush.msrb.mxu2 %v1893_v0 }
 0x1e5   : > { %1970 = vmatpush.msrb.mxu2 %v1892_v63 }
 0x206   : > { %v1679_v26 = vpop.f32.mrf.mxu2 }
 0x207   : > { %v1680_v37 = vadd.f32 %v1679_v26, %v3924_v31 }
 0x209   : > { %v1792_v51 = vmax.f32 %v1680_v37, 0.0 }
 0x218   : > { %v1479_v9 = vpop.f32.mrf.mxu1 }
 0x219   : > { %v1480_v34 = vadd.f32 %v1479_v9, %v3924_v31 }
 0x21b   : > { %v1782_v52 = vmax.f32 %v1480_v34, 0.0 }
 0x222   : > { %v1499_v36 = vpop.f32.mrf.mxu1 }
 0x223   : > { %v1500_v15 = vadd.f32 %v1499_v36, %v3924_v31 }
 0x225   : > { %v1639_v32 = vpop.f32.mrf.mxu0  ;;  %v1783_v12 = vmax.f32 %v1500_v15, 0.0 }
 0x226   : > { %v1619_v30 = vpop.f32.mrf.mxu3  ;;  %v1640_v6 = vadd.f32 %v1639_v32, %v3924_v31 }
 0x227   : > { %v3941_v42 = vmax.f32 %v1782_v52, %v1783_v12  ;;  %v1810_v44 = vmax.f32 %v1783_v12, %v1784_v23  ;;  %v1620_v47 = vadd.f32 %v1619_v30, %v3924_v31 }
 0x228   : > { %v1790_v55 = vmax.f32 %v1640_v6, 0.0 }
 0x229   : > { %1839 = vrot.lane.b32.xlu1 %v3941_v42, %s3227_s14  ;;  %1841 = vrot.lane.b32.xlu2 %v1810_v44, %s3227_s14  ;;  %v1789_v33 = vmax.f32 %v1620_v47, 0.0 }
 0x22b   : > { %v3948_v62 = vmax.f32 %v1788_v46, %v1789_v33  ;;  %v1816_v20 = vmax.f32 %v1789_v33, %v1790_v55 }
 0x22c   : > { %v1579_v57 = vpop.f32.mrf.mxu1 }
 0x22d   : > { %v1580_v1 = vadd.f32 %v1579_v57, %v3924_v31  ;;  %1851 = vrot.lane.b32.xlu0 %v3948_v62, %s3227_s14 }
 0x22f   : > { %v1787_v22 = vmax.f32 %v1580_v1, 0.0 }
 0x231   : > { %v3953_v5 = vmax.f32 %v1786_v25, %v1787_v22  ;;  %v1699_v16 = vpop.f32.mrf.mxu3  ;;  %1853 = vrot.lane.b32.xlu1 %v1816_v20, %s3227_s14  ;;  %v1814_v14 = vmax.f32 %v1787_v22, %v1788_v46 }
 0x232   : > { %v1700_v43 = vadd.f32 %v1699_v16, %v3924_v31 }
 0x233   : > { %1847 = vrot.lane.b32.xlu2 %v3953_v5, %s3227_s14 }
 0x234   : > { %v1793_v17 = vmax.f32 %v1700_v43, 0.0  ;;  %v3231_v43 = vmov 0.0  }
 0x235   : > { %1849 = vrot.lane.b32.xlu0 %v1814_v14, %s3227_s14  ;;  %v1719_v18 = vpop.f32.mrf.mxu0  ;;  %1802 = vst [vmem:[#allocation3 + $0x20] sm:$0xff] %v3231_v43 }
 0x236   : > { %v1659_v2 = vpop.f32.mrf.mxu1  ;;  %v1720_v58 = vadd.f32 %v1719_v18, %v3924_v31  ;;  %v1819_v53 = vmax.f32 %v1792_v51, %v1793_v17  ;;  %1799 = vst [vmem:[#allocation3 + $0x8] sm:$0xff] %v3231_v43 }
 0x237   : > { %v1660_v50 = vadd.f32 %v1659_v2, %v3924_v31  ;;  %1800 = vst [vmem:[#allocation3 + $0x10] sm:$0xff] %v3231_v43 }
 0x238   : > { %v1794_v60 = vmax.f32 %v1720_v58, 0.0  ;;  %1801 = vst [vmem:[#allocation3 + $0x18] sm:$0xff] %v3231_v43 }
 0x239   : > { %v1791_v45 = vmax.f32 %v1660_v50, 0.0  ;;  %1803 = vst [vmem:[#allocation3 + $0x28] sm:$0xff] %v3231_v43 }
 0x23a   : > { %v1820_v29 = vmax.f32 %v1793_v17, %v1794_v60  ;;  %v1846_v28 = vpop.permute.xlu2 %1845  ;;  %1804 = vst [vmem:[#allocation3 + $0x30] sm:$0xff] %v3231_v43 }
 0x23b   : > { %v1817_v3 = vmax.f32 %v1790_v55, %v1791_v45  ;;  %v1818_v54 = vmax.f32 %v1791_v45, %v1792_v51  ;;  %1805 = vst [vmem:[#allocation3 + $0x38] sm:$0xff] %v3231_v43 }
 0x23c   : > { %1806 = vst [vmem:[#allocation3 + $0x40] sm:$0xff] %v3231_v43 }
 0x23d   : > { %1857 = vrot.lane.b32.xlu2 %v1818_v54, %s3227_s14  ;;  %1855 = vrot.lane.b32.xlu1 %v1817_v3, %s3227_s14 }
 0x23e   : > { %1859 = vrot.lane.b32.xlu0 %v1819_v53, %s3227_s14 }
 0x245   : > { %1861 = vrot.lane.b32.xlu1 %v1820_v29, %s3227_s14 }
 0x252   : > { %v1844_v19 = vpop.permute.xlu1 %1843 }
 0x253   : > { %v1870_v38 = vsel %vm594_vm0, %v1844_v19, %v1846_v28 }
 0x254   : > { %v1885_v13 = vmax.f32 %v3933_v56, %v1870_v38  ;;  %v1779_v39 = vpop.f32.mrf.mxu3 }
 0x255   : > { %v1780_v27 = vadd.f32 %v1779_v39, %v3924_v31 }
 0x256   : > { %3108 = vmatmul.msk.f32.vlgmr.msra.gmra.mxu3 %vm1894_vm4, %v1885_v13 }
 0x257   : > { %2109 = vmatpush.msra.mxu3 %v1893_v0  ;;  %v1797_v8 = vmax.f32 %v1780_v27, 0.0 }
 0x259   : > { %v1739_v11 = vpop.f32.mrf.mxu1  ;;  %2110 = vmatpush.msra.mxu3 %v1892_v63 }
 0x25a   : > { %v1740_v4 = vadd.f32 %v1739_v11, %v3924_v31 }
 0x25c   : > { %v1795_v35 = vmax.f32 %v1740_v4, 0.0 }
 0x25e   : > { %v1821_v41 = vmax.f32 %v1794_v60, %v1795_v35 }
 0x260   : > { %v1759_v48 = vpop.f32.mrf.mxu2  ;;  %1863 = vrot.lane.b32.xlu0 %v1821_v41, %s3227_s14 }
 0x261   : > { %v1760_v49 = vadd.f32 %v1759_v48, %v3924_v31 }
 0x263   : > { %v1796_v7 = vmax.f32 %v1760_v49, 0.0 }
 0x265   : > { %v1822_v59 = vmax.f32 %v1795_v35, %v1796_v7  ;;  %v1823_v21 = vmax.f32 %v1796_v7, %v1797_v8 }
 0x267   : > { %1867 = vrot.lane.b32.xlu2 %v1823_v21, %s3227_s14  ;;  %1865 = vrot.lane.b32.xlu1 %v1822_v59, %s3227_s14 }
 0x283   : > { %v1842_v23 = vpop.permute.xlu2 %1841 }
 0x28d   : > { %v1848_v34 = vpop.permute.xlu2 %1847 }
 0x297   : > { %v1858_v40 = vpop.permute.xlu2 %1857 }
 0x29b   : > { %v1840_v10 = vpop.permute.xlu1 %1839 }
 0x29c   : > { %v1869_v25 = vsel %vm594_vm0, %v1840_v10, %v1842_v23 }
 0x29d   : > { %v1884_v56 = vmax.f32 %v3941_v42, %v1869_v25 }
 0x29f   : > { %3107 = vmatmul.msk.f32.vlgmr.msra.gmra.mxu2 %vm1894_vm4, %v1884_v56  ;;  %v1852_v24 = vpop.permute.xlu0 %1851 }
 0x2a0   : > { %2081 = vmatpush.msra.mxu2 %v1893_v0 }
 0x2a2   : > { %2082 = vmatpush.msra.mxu2 %v1892_v63 }
 0x2a3   : > { %v1854_v31 = vpop.permute.xlu1 %1853 }
 0x2a4   : > { %v1872_v9 = vsel %vm594_vm0, %v1852_v24, %v1854_v31 }
 0x2a5   : > { %v1887_v36 = vmax.f32 %v3948_v62, %v1872_v9 }
 0x2a7   : > { %3110 = vmatmul.msk.f32.vlgmr.msrb.gmra.mxu3 %vm1894_vm4, %v1887_v36  ;;  %v1850_v52 = vpop.permute.xlu0 %1849 }
 0x2a8   : > { %v1871_v61 = vsel %vm594_vm0, %v1848_v34, %v1850_v52 }
 0x2a9   : > { %v1886_v15 = vmax.f32 %v3953_v5, %v1871_v61 }
 0x2ab   : > { %3109 = vmatmul.msk.f32.vlgmr.msrb.gmra.mxu2 %vm1894_vm4, %v1886_v15 }
 0x2af   : > { %v1856_v32 = vpop.permute.xlu1 %1855 }
 0x2b0   : > { %v1873_v12 = vsel %vm594_vm0, %v1856_v32, %v1858_v40  ;;  %v1860_v44 = vpop.permute.xlu0 %1859 }
 0x2b1   : > { %v1888_v42 = vmax.f32 %v1817_v3, %v1873_v12 }
 0x2b3   : > { %3111 = vmatmul.msk.f32.vlgmr.msrb.gmra.mxu0 %vm1894_vm4, %v1888_v42 }
 0x2b7   : > { %v1862_v30 = vpop.permute.xlu1 %1861 }
 0x2b8   : > { %v1874_v6 = vsel %vm594_vm0, %v1860_v44, %v1862_v30 }
 0x2b9   : > { %v1889_v46 = vmax.f32 %v1819_v53, %v1874_v6 }
 0x2bb   : > { %3112 = vmatmul.msk.f32.vlgmr.msrb.gmra.mxu1 %vm1894_vm4, %v1889_v46 }
 0x2c1   : > { %v1868_v47 = vpop.permute.xlu2 %1867 }
 0x2c2   : > { %v1891_v33 = vmax.f32 %v1823_v21, %v1868_v47 }
 0x2c4   : > { %3114 = vmatmul.msk.f32.vlgmr.msra.gmra.mxu3 %vm1894_vm4, %v1891_v33 }
 0x2d2   : > { %v1864_v55 = vpop.permute.xlu0 %1863 }
 0x2d9   : > { %v1866_v62 = vpop.permute.xlu1 %1865  ;;  %v1944_v20 = vpop.f32.mrf.mxu3 }
 0x2da   : > { %v1875_v57 = vsel %vm594_vm0, %v1864_v55, %v1866_v62 }
 0x2db   : > { %v1890_v1 = vmax.f32 %v1821_v41, %v1875_v57 }
 0x2dd   : > { %3113 = vmatmul.msk.f32.vlgmr.msra.gmra.mxu2 %vm1894_vm4, %v1890_v1 }
 0x322   : > { %v1915_v5 = vpop.f32.mrf.mxu2 }
 0x32a   : > { %v2000_v22 = vpop.f32.mrf.mxu3 }
 0x32b   : > { %2004 = vrot.lane.b32.xlu2 %v2000_v22, %s3230_s24 }
 0x32e   : > { %v1972_v26 = vpop.f32.mrf.mxu2 }
 0x330   : > { %v2028_v16 = vpop.f32.mrf.mxu0 }
 0x331   : > { %2032 = vrot.lane.b32.xlu0 %v2028_v16, %s3230_s24 }
 0x333   : > { %1948 = vrot.lane.b32.xlu2 %v1944_v20, %s3230_s24 }
 0x338   : > { %v2056_v14 = vpop.f32.mrf.mxu1 }
 0x339   : > { %1976 = vrot.lane.b32.xlu0 %v1972_v26, %s3230_s24  ;;  %2060 = vrot.lane.b32.xlu1 %v2056_v14, %s3230_s24 }
 0x341   : > { %1919 = vrot.lane.b32.xlu1 %v1915_v5, %s3230_s24 }
 0x347   : > { %v2112_v0 = vpop.f32.mrf.mxu3 }
 0x348   : > { %2116 = vrot.lane.b32.xlu2 %v2112_v0, %s3230_s24 }
 0x360   : > { %v2084_v63 = vpop.f32.mrf.mxu2 }
 0x361   : > { %2088 = vrot.lane.b32.xlu0 %v2084_v63, %s3230_s24 }
 0x385   : > { %v2005_v37 = vpop.permute.xlu2 %2004 }
 0x386   : > { %2007 = vst.msk [vmem:[#allocation3 + $0x20] sm:$0xff] %vm1922_vm5, %v2005_v37 }
 0x38d   : > { %v1949_v2 = vpop.permute.xlu2 %1948  ;;  %v4010_v45 = vld [vmem:[#allocation3 + $0x20] sm:$0xff] }
 0x38e   : > { %1951 = vst.msk [vmem:[#allocation3 + $0x10] sm:$0xff] %vm1922_vm5, %v1949_v2 }
 0x395   : > { %v4021_v53 = vld [vmem:[#allocation3 + $0x10] sm:$0xff] }
 0x3a2   : > { %v2117_v50 = vpop.permute.xlu2 %2116 }
 0x3a3   : > { %2119 = vst.msk [vmem:[#allocation3 + $0x40] sm:$0xff] %vm1922_vm5, %v2117_v50  ;;  %v2033_v17 = vpop.permute.xlu0 %2032 }
 0x3a4   : > { %2035 = vst.msk [vmem:[#allocation3 + $0x28] sm:$0xff] %vm1922_vm5, %v2033_v17 }
 0x3aa   : > { %v4029_v28 = vld [vmem:[#allocation3 + $0x40] sm:$0xff] }
 0x3ab   : > { %v1977_v18 = vpop.permute.xlu0 %1976  ;;  %v2061_v51 = vpop.permute.xlu1 %2060  ;;  %v4012_v3 = vld [vmem:[#allocation3 + $0x28] sm:$0xff]  ;;  %v3202_v11 = vpack.i.bf16 0.0, %v4029_v28 }
 0x3ac   : > { %1979 = vst.msk [vmem:[#allocation3 + $0x18] sm:$0xff] %vm1922_vm5, %v1977_v18  ;;  %v3182_v54 = vpack.i.bf16 %v4012_v3, %v4010_v45 }
 0x3ad   : > { %2063 = vst.msk [vmem:[#allocation3 + $0x30] sm:$0xff] %vm1922_vm5, %v2061_v51 }
 0x3ae   : > { %3183 = vrot.lane.b32.xlu2 %v3182_v54, %s3227_s14  ;;  %3173 = vrot.lane.b32.xlu1 %v3182_v54, %s3228_s15  ;;  %v2298_v54 = vld [vmem:[%s4277_s3] sm:$0xff] }
 0x3b3   : > { %v1920_v58 = vpop.permute.xlu1 %1919  ;;  %v4033_v38 = vld [vmem:[#allocation3 + $0x18] sm:$0xff] }
 0x3b4   : > { %1923 = vst.msk [vmem:[#allocation3 + $0x8] sm:$0xff] %vm1922_vm5, %v1920_v58  ;;  %v4023_v60 = vld [vmem:[#allocation3 + $0x30] sm:$0xff]  ;;  %v2372_v58 = vld [vmem:[%s4278_s4] sm:$0xff] }
 0x3b5   : > { %v3177_v29 = vpack.i.bf16 %v4021_v53, %v4023_v60 }
 0x3b7   : > { %3178 = vrot.lane.b32.xlu1 %v3177_v29, %s3227_s14  ;;  %3168 = vrot.lane.b32.xlu0 %v3177_v29, %s3228_s15 }
 0x3bb   : > { %v4031_v19 = vld [vmem:[#allocation3 + $0x8] sm:$0xff] }
 0x3bc   : > { %v3192_v13 = vpack.i.bf16 %v4031_v19, %v4033_v38 }
 0x3be   : > { %3188 = vrot.lane.b32.xlu2 %v3192_v13, %s3228_s15 }
 0x3bf   : > { %3203 = vrot.lane.b32.xlu1 %v3202_v11, %s3228_s15  ;;  %3193 = vrot.lane.b32.xlu0 %v3192_v13, %s3227_s14 }
 0x3c6   : > { %3213 = vrot.lane.b32.xlu2 %v3202_v11, %s3227_s14 }
 0x3c7   : > { %3208 = vrot.lane.b32.xlu1 %v3231_v43, %s3227_s14  ;;  %3198 = vrot.lane.b32.xlu0 %v3231_v43, %s3228_s15 }
 0x3cf   : > { %2376 = vperm.xlu1 %3217, %v2372_v58  }
 0x3d3   : > { %v2089_v4 = vpop.permute.xlu0 %2088 }
 0x3d4   : > { %2091 = vst.msk [vmem:[#allocation3 + $0x38] sm:$0xff] %vm1922_vm5, %v2089_v4 }
 0x3db   : > { %v4047_v39 = vld [vmem:[#allocation3 + $0x38] sm:$0xff] }
 0x3dc   : > { %2162 = vrot.lane.b32.xlu0 %v4047_v39, %s3227_s14  ;;  %2204 = vrot.lane.b32.xlu2 %v4047_v39, %s3228_s15 }
 0x408   : > { %v3184_v35 = vpop.permute.xlu2 %3183 }
 0x409   : > { %v3186_v27 = vunpack.i.h.bf16 %v3184_v35  ;;  %v3185_v49 = vunpack.i.l.bf16 %v3184_v35 }
 0x40b   : > { %v4062_v10 = vsel %vm594_vm0, %v3185_v49, %v3186_v27 }
 0x418   : > { %v4053_v41 = vpop.permute.xlu2 %3188 }
 0x419   : > { %v3190_v8 = vunpack.i.l.bf16 %v4053_v41  ;;  %v3191_v44 = vunpack.i.h.bf16 %v4053_v41 }
 0x420   : > { %v3174_v48 = vpop.permute.xlu1 %3173  ;;  %v4095_v6 = vpop.permute.xlu2 %3213 }
 0x421   : > { %v3176_v7 = vunpack.i.h.bf16 %v3174_v48  ;;  %v3175_v59 = vunpack.i.l.bf16 %v3174_v48  ;;  %v3216_v22 = vunpack.i.h.bf16 %v4095_v6  ;;  %v3215_v5 = vunpack.i.l.bf16 %v4095_v6 }
 0x423   : > { %v2211_v21 = vsel %vm706_vm1, %v3190_v8, %v3175_v59  ;;  %v4058_v23 = vsel %vm706_vm1, %v3175_v59, %v3176_v7  ;;  %v2243_v37 = vsel %vm594_vm0, %v3215_v5, %v3216_v22 }
 0x424   : > { %2421 = vmatpush.msra.mxu1 %v2211_v21  ;;  %2444 = vmatpush.msrb.mxu2 %v4058_v23 }
 0x426   : > { %2445 = vmatpush.msrb.mxu2 %v4062_v10 }
 0x428   : > { %2446 = vmatpush.msrb.mxu2 %v4010_v45 }
 0x429   : > { %v4066_v25 = vpop.permute.xlu0 %3168  ;;  %v4068_v56 = vpop.permute.xlu1 %3178 }
 0x42a   : > { %v3171_v24 = vunpack.i.h.bf16 %v4066_v25  ;;  %v3170_v31 = vunpack.i.l.bf16 %v4066_v25  ;;  %v3180_v9 = vunpack.i.l.bf16 %v4068_v56  ;;  %2447 = vmatpush.msrb.mxu2 %v2211_v21  ;;  %v3181_v40 = vunpack.i.h.bf16 %v4068_v56 }
 0x42c   : > { %v2210_v34 = vsel %vm706_vm1, %v3171_v24, %v3190_v8  ;;  %v4077_v36 = vsel %vm706_vm1, %v3176_v7, %v3170_v31  ;;  %v4083_v52 = vsel %vm594_vm0, %v3186_v27, %v3180_v9  ;;  %v2209_v46 = vsel %vm706_vm1, %v3191_v44, %v3171_v24 }
 0x42d   : > { %2398 = vmatpush.msra.mxu0 %v2210_v34  ;;  %2467 = vmatpush.msrb.mxu3 %v4077_v36 }
 0x42f   : > { %2468 = vmatpush.msrb.mxu3 %v4083_v52 }
 0x431   : > { %v3194_v61 = vpop.permute.xlu0 %3193  ;;  %v3204_v15 = vpop.permute.xlu1 %3203  ;;  %2469 = vmatpush.msrb.mxu3 %v4012_v3 }
 0x432   : > { %v3195_v32 = vunpack.i.l.bf16 %v3194_v61  ;;  %v3196_v30 = vunpack.i.h.bf16 %v3194_v61  ;;  %v3206_v55 = vunpack.i.h.bf16 %v3204_v15  ;;  %v3205_v62 = vunpack.i.l.bf16 %v3204_v15 }
 0x433   : > { %2470 = vmatpush.msrb.mxu3 %v4058_v23 }
 0x434   : > { %v2168_v12 = vsel %vm594_vm0, %v3181_v40, %v3195_v32  ;;  %v2169_v42 = vsel %vm594_vm0, %v3195_v32, %v3185_v49  ;;  %v2167_v1 = vsel %vm594_vm0, %v3196_v30, %v3181_v40  ;;  %v2255_v0 = vsel %vm706_vm1, %v3205_v62, %v3206_v55 }
 0x435   : > { %2399 = vmatpush.msra.mxu0 %v2168_v12  ;;  %2422 = vmatpush.msra.mxu1 %v2169_v42 }
 0x436   : > { %2448 = vmatpush.msrb.mxu2 %v2169_v42  ;;  %2471 = vmatpush.msrb.mxu3 %v4062_v10  ;;  %v2205_v50 = vpop.permute.xlu2 %2204 }
 0x437   : > { %2400 = vmatpush.msra.mxu0 %v4021_v53  ;;  %2423 = vmatpush.msra.mxu1 %v4033_v38  ;;  %v2214_v18 = vsel %vm706_vm1, %v3170_v31, %v2205_v50  ;;  %v2215_v51 = vsel %vm706_vm1, %v2205_v50, %v3205_v62 }
 0x438   : > { %2449 = vmatpush.msrb.mxu2 %v4033_v38  ;;  %2472 = vmatpush.msrb.mxu3 %v4010_v45 }
 0x439   : > { %v3199_v47 = vpop.permute.xlu0 %3198  ;;  %v3209_v33 = vpop.permute.xlu1 %3208  ;;  %2401 = vmatpush.msra.mxu0 %v2209_v46  ;;  %2424 = vmatpush.msra.mxu1 %v2210_v34 }
 0x43a   : > { %v3201_v57 = vunpack.i.h.bf16 %v3199_v47  ;;  %2450 = vmatpush.msrb.mxu2 %v2210_v34  ;;  %2473 = vmatpush.msrb.mxu3 %v2211_v21  ;;  %v3200_v20 = vunpack.i.l.bf16 %v3199_v47  ;;  %v3211_v16 = vunpack.i.h.bf16 %v3209_v33  ;;  %v3210_v14 = vunpack.i.l.bf16 %v3209_v33 }
 0x43b   : > { %2402 = vmatpush.msra.mxu0 %v2167_v1  ;;  %2425 = vmatpush.msra.mxu1 %v2168_v12 }
 0x43c   : > { %2451 = vmatpush.msrb.mxu2 %v2168_v12  ;;  %2474 = vmatpush.msrb.mxu3 %v2169_v42  ;;  %v2288_v26 = vsel %vm706_vm1, %v3206_v55, %v3201_v57  ;;  %v2208_v63 = vsel %vm706_vm1, %v3200_v20, %v3191_v44  ;;  %v2276_v2 = vsel %vm594_vm0, %v3216_v22, %v3211_v16 }
 0x43d   : > { %2403 = vmatpush.msra.mxu0 %v4031_v19  ;;  %2426 = vmatpush.msra.mxu1 %v4021_v53  ;;  %v2166_v17 = vsel %vm594_vm0, %v3210_v14, %v3196_v30 }
 0x43e   : > { %2452 = vmatpush.msrb.mxu2 %v4021_v53  ;;  %2475 = vmatpush.msrb.mxu3 %v4033_v38  ;;  %v2299_v53 = vld [vmem:[%s4277_s3 + $0x8] sm:$0xff] }
 0x43f   : > { %2404 = vmatpush.msra.mxu0 %v2208_v63  ;;  %2427 = vmatpush.msra.mxu1 %v2209_v46 }
 0x440   : > { %2536 = vmatpush.msra.mxu2 %v2255_v0  ;;  %2559 = vmatpush.msra.mxu3 %v2288_v26 }
 0x441   : > { %2405 = vmatpush.msra.mxu0 %v2166_v17  ;;  %2428 = vmatpush.msra.mxu1 %v2167_v1 }
 0x442   : > { %2537 = vmatpush.msra.mxu2 %v2243_v37  ;;  %2560 = vmatpush.msra.mxu3 %v2276_v2 }
 0x443   : > { %2406 = vmatpush.msra.mxu0 %v3231_v43  ;;  %2429 = vmatpush.msra.mxu1 %v4031_v19 }
 0x444   : > { %2538 = vmatpush.msra.mxu2 %v4029_v28  ;;  %2561 = vmatpush.msra.mxu3 %v3231_v43  ;;  %v2373_v43 = vld [vmem:[%s4278_s4 + $0x8] sm:$0xff] }
 0x445   : > { %2490 = vmatpush.msrb.mxu0 %v2214_v18  ;;  %2513 = vmatpush.msrb.mxu1 %v2215_v51 }
 0x446   : > { %2539 = vmatpush.msra.mxu2 %v2215_v51  ;;  %2562 = vmatpush.msra.mxu3 %v2255_v0 }
 0x447   : > { %3121 = vmatmul.msk.f32.vlgmr.msrb.gmra.mxu3 %vm2384_vm6, %v2298_v54  ;;  %3119 = vmatmul.msk.f32.vlgmr.msrb.gmra.mxu2 %vm2384_vm6, %v2298_v54 }
 0x448   : > { %2563 = vmatpush.msra.mxu3 %v2243_v37  ;;  %3115 = vmatmul.msk.f32.vlgmr.msra.gmra.mxu0 %vm2384_vm6, %v2298_v54 }
 0x449   : > { %3117 = vmatmul.msk.f32.vlgmr.msra.gmra.mxu1 %vm2384_vm6, %v2298_v54  ;;  %2381 = vperm.xlu2 %3218, %v2373_v43  }
 0x44a   : > { %2564 = vmatpush.msra.mxu3 %v4029_v28 }
 0x44c   : > { %2565 = vmatpush.msra.mxu3 %v2215_v51 }
 0x44e   : > { %v2163_v29 = vpop.permute.xlu0 %2162 }
 0x44f   : > { %3122 = vmatmul.msk.f32.gmra.mxu3 %vm2384_vm6, %v2299_v53  ;;  %v2172_v19 = vsel %vm594_vm0, %v3180_v9, %v2163_v29  ;;  %v2173_v38 = vsel %vm594_vm0, %v2163_v29, %v3215_v5  ;;  %3120 = vmatmul.msk.f32.gmra.mxu2 %vm2384_vm6, %v2299_v53 }
 0x450   : > { %2491 = vmatpush.msrb.mxu0 %v2172_v19  ;;  %2514 = vmatpush.msrb.mxu1 %v2173_v38 }
 0x451   : > { %2540 = vmatpush.msra.mxu2 %v2173_v38  ;;  %2566 = vmatpush.msra.mxu3 %v2173_v38 }
 0x452   : > { %2492 = vmatpush.msrb.mxu0 %v4023_v60  ;;  %2515 = vmatpush.msrb.mxu1 %v4047_v39 }
 0x453   : > { %2541 = vmatpush.msra.mxu2 %v4047_v39  ;;  %2567 = vmatpush.msra.mxu3 %v4047_v39 }
 0x454   : > { %2493 = vmatpush.msrb.mxu0 %v4077_v36  ;;  %2516 = vmatpush.msrb.mxu1 %v2214_v18 }
 0x455   : > { %2542 = vmatpush.msra.mxu2 %v2214_v18  ;;  %3116 = vmatmul.msk.f32.gmra.mxu0 %vm2384_vm6, %v2299_v53 }
 0x456   : > { %2494 = vmatpush.msrb.mxu0 %v4083_v52  ;;  %2517 = vmatpush.msrb.mxu1 %v2172_v19 }
 0x457   : > { %3129 = vmatmul.msk.f32.vlgmr.msra.gmra.mxu3 %vm2384_vm6, %v2298_v54  ;;  %2543 = vmatpush.msra.mxu2 %v2172_v19 }
 0x458   : > { %3118 = vmatmul.msk.f32.gmra.mxu1 %vm2384_vm6, %v2299_v53  ;;  %2495 = vmatpush.msrb.mxu0 %v4012_v3 }
 0x459   : > { %2518 = vmatpush.msrb.mxu1 %v4023_v60  ;;  %2544 = vmatpush.msra.mxu2 %v4023_v60  ;;  %v2377_v60 = vpop.permute.xlu1 %2376 }
 0x45a   : > { %3127 = vmatmul.msk.f32.vlgmr.msra.gmra.mxu2 %vm2384_vm6, %v2298_v54  ;;  %2496 = vmatpush.msrb.mxu0 %v4058_v23 }
 0x45b   : > { %2519 = vmatpush.msrb.mxu1 %v4077_v36 }
 0x45c   : > { %2497 = vmatpush.msrb.mxu0 %v4062_v10 }
 0x45d   : > { %2520 = vmatpush.msrb.mxu1 %v4083_v52 }
 0x45e   : > { %2498 = vmatpush.msrb.mxu0 %v4010_v45 }
 0x45f   : > { %2521 = vmatpush.msrb.mxu1 %v4012_v3  ;;  %3123 = vmatmul.msk.f32.vlgmr.msrb.gmra.mxu0 %vm2384_vm6, %v2298_v54 }
 0x460   : > { %3125 = vmatmul.msk.f32.vlgmr.msrb.gmra.mxu1 %vm2384_vm6, %v2298_v54  ;;  %3130 = vmatmul.msk.f32.gmra.mxu3 %vm2384_vm6, %v2299_v53 }
 0x462   : > { %3128 = vmatmul.msk.f32.gmra.mxu2 %vm2384_vm6, %v2299_v53 }
 0x467   : > { %3124 = vmatmul.msk.f32.gmra.mxu0 %vm2384_vm6, %v2299_v53 }
 0x468   : > { %3126 = vmatmul.msk.f32.gmra.mxu1 %vm2384_vm6, %v2299_v53 }
 0x4a3   : > { %v2382_v40 = vpop.permute.xlu2 %2381 }
 0x4c5   : > { %v2408_v28 = vpop.f32.mrf.mxu0 }
 0x4c6   : > { %v2431_v4 = vpop.f32.mrf.mxu1  ;;  %v2409_v0 = vadd.f32 %v2408_v28, %v2377_v60 }
 0x4c7   : > { %v2432_v63 = vadd.f32 %v2431_v4, %v2377_v60 }
 0x4c8   : > { %v2575_v51 = vmax.f32 %v2409_v0, 0.0  ;;  %v2823_v0 = vld [vmem:[%s4279_s5] sm:$0xff] }
 0x4c9   : > { %v2576_v54 = vmax.f32 %v2432_v63, 0.0 }
 0x4ca   : > { %v2477_v13 = vpop.f32.mrf.mxu3  ;;  %v2454_v11 = vpop.f32.mrf.mxu2 }
 0x4cb   : > { %v4169_v45 = vadd.f32 %v2454_v11, %v2377_v60  ;;  %v2478_v3 = vadd.f32 %v2477_v13, %v2377_v60  ;;  %v2591_v53 = vmax.f32 %v2575_v51, %v2576_v54  ;;  %v2934_v51 = vld [vmem:[%s4285_s11 + $0x18] sm:$0xff] }
 0x4cd   : > { %v2577_v39 = vmax.f32 %v4169_v45, 0.0  ;;  %v2578_v35 = vmax.f32 %v2478_v3, 0.0 }
 0x4cf   : > { %v4174_v41 = vmax.f32 %v2577_v39, %v2578_v35  ;;  %v2592_v29 = vmax.f32 %v2576_v54, %v2577_v39 }
 0x4d1   : > { %2623 = vrot.lane.b32.xlu0 %v4174_v41, %s3227_s14 }
 0x4d2   : > { %v2480_v27 = vpop.f32.mrf.mxu3  ;;  %v2411_v48 = vpop.f32.mrf.mxu0 }
 0x4d3   : > { %v2457_v49 = vpop.f32.mrf.mxu2  ;;  %v2481_v57 = vadd.f32 %v2480_v27, %v2382_v40  ;;  %v2412_v50 = vadd.f32 %v2411_v48, %v2382_v40 }
 0x4d4   : > { %v2458_v62 = vadd.f32 %v2457_v49, %v2382_v40 }
 0x4d5   : > { %v2434_v8 = vpop.f32.mrf.mxu1  ;;  %v2586_v26 = vmax.f32 %v2481_v57, 0.0  ;;  %v2583_v58 = vmax.f32 %v2412_v50, 0.0  ;;  %v2829_v57 = vld [vmem:[%s4280_s6] sm:$0xff]  ;;  %v2826_v50 = vld [vmem:[%s4279_s5 + $0x18] sm:$0xff] }
 0x4d6   : > { %v2585_v16 = vmax.f32 %v2458_v62, 0.0  ;;  %v2435_v17 = vadd.f32 %v2434_v8, %v2382_v40  ;;  %v2899_v62 = vld [vmem:[%s4282_s8] sm:$0x1f] }
 0x4d8   : > { %v2600_v37 = vmax.f32 %v2585_v16, %v2586_v26  ;;  %v2584_v43 = vmax.f32 %v2435_v17, 0.0 }
 0x4da   : > { %v2569_v7 = vpop.f32.mrf.mxu3  ;;  %v2598_v19 = vmax.f32 %v2583_v58, %v2584_v43  ;;  %v2599_v38 = vmax.f32 %v2584_v43, %v2585_v16 }
 0x4db   : > { %v2570_v59 = vadd.f32 %v2569_v7, %v2377_v60 }
 0x4dc   : > { %v2500_v21 = vpop.f32.mrf.mxu0 }
 0x4dd   : > { %v2501_v23 = vadd.f32 %v2500_v21, %v2377_v60  ;;  %v2523_v10 = vpop.f32.mrf.mxu1  ;;  %v2546_v25 = vpop.f32.mrf.mxu2  ;;  %v2582_v9 = vmax.f32 %v2570_v59, 0.0 }
 0x4de   : > { %v2524_v56 = vadd.f32 %v2523_v10, %v2377_v60  ;;  %v2547_v24 = vadd.f32 %v2546_v25, %v2377_v60  ;;  %v2669_v60 = vld [vmem:[%s4284_s10] sm:$0xff] }
 0x4df   : > { %v2579_v31 = vmax.f32 %v2501_v23, 0.0  ;;  %2804 = vmatpush.msrb.mxu3 %v2669_v60  ;;  %2764 = vmatpush.msrb.mxu2 %v2669_v60 }
 0x4e0   : > { %v2580_v34 = vmax.f32 %v2524_v56, 0.0  ;;  %v2581_v36 = vmax.f32 %v2547_v24, 0.0  ;;  %2724 = vmatpush.msra.mxu1 %v2669_v60  ;;  %2692 = vmatpush.msra.mxu0 %v2669_v60 }
 0x4e1   : > { %v2594_v1 = vmax.f32 %v2578_v35, %v2579_v31  ;;  %2972 = vmatpush.msra.mxu3 %v2934_v51 }
 0x4e2   : > { %v4178_v52 = vmax.f32 %v2579_v31, %v2580_v34  ;;  %v2596_v61 = vmax.f32 %v2580_v34, %v2581_v36  ;;  %v2597_v15 = vmax.f32 %v2581_v36, %v2582_v9 }
 0x4e3   : > { %v2572_v47 = vpop.f32.mrf.mxu3 }
 0x4e4   : > { %2631 = vrot.lane.b32.xlu2 %v2597_v15, %s3227_s14  ;;  %2629 = vrot.lane.b32.xlu1 %v2596_v61, %s3227_s14  ;;  %v2503_v32 = vpop.f32.mrf.mxu0  ;;  %v2573_v5 = vadd.f32 %v2572_v47, %v2382_v40  ;;  %v2831_v47 = vld [vmem:[%s4280_s6 + $0x10] sm:$0xff] }
 0x4e5   : > { %2627 = vrot.lane.b32.xlu0 %v4178_v52, %s3227_s14  ;;  %v2504_v12 = vadd.f32 %v2503_v32, %v2382_v40  ;;  %v2526_v42 = vpop.f32.mrf.mxu1  ;;  %v2549_v44 = vpop.f32.mrf.mxu2 }
 0x4e6   : > { %v2527_v30 = vadd.f32 %v2526_v42, %v2382_v40  ;;  %v2550_v6 = vadd.f32 %v2549_v44, %v2382_v40  ;;  %v2590_v14 = vmax.f32 %v2573_v5, 0.0 }
 0x4e7   : > { %v2587_v46 = vmax.f32 %v2504_v12, 0.0 }
 0x4e8   : > { %v2588_v33 = vmax.f32 %v2527_v30, 0.0  ;;  %v2589_v55 = vmax.f32 %v2550_v6, 0.0  ;;  %v2830_v30 = vld [vmem:[%s4280_s6 + $0x8] sm:$0xff] }
 0x4e9   : > { %v2601_v18 = vmax.f32 %v2586_v26, %v2587_v46 }
 0x4ea   : > { %v2602_v20 = vmax.f32 %v2587_v46, %v2588_v33  ;;  %v2603_v22 = vmax.f32 %v2588_v33, %v2589_v55  ;;  %v2604_v2 = vmax.f32 %v2589_v55, %v2590_v14  ;;  %v2832_v33 = vld [vmem:[%s4280_s6 + $0x18] sm:$0xff] }
 0x4ec   : > { %2641 = vrot.lane.b32.xlu2 %v2602_v20, %s3227_s14  ;;  %2625 = vrot.lane.b32.xlu1 %v2594_v1, %s3227_s14 }
 0x4ed   : > { %2643 = vrot.lane.b32.xlu0 %v2603_v22, %s3227_s14 }
 0x4f4   : > { %2637 = vrot.lane.b32.xlu2 %v2600_v37, %s3227_s14  ;;  %2645 = vrot.lane.b32.xlu1 %v2604_v2, %s3227_s14 }
 0x4f5   : > { %2639 = vrot.lane.b32.xlu0 %v2601_v18, %s3227_s14  ;;  %v2933_v18 = vld [vmem:[%s4285_s11 + $0x10] sm:$0xff] }
 0x4f6   : > { %2952 = vmatpush.msra.mxu2 %v2933_v18 }
 0x4fc   : > { %2621 = vrot.lane.b32.xlu2 %v2592_v29, %s3227_s14  ;;  %2619 = vrot.lane.b32.xlu1 %v2591_v53, %s3227_s14 }
 0x4fd   : > { %2633 = vrot.lane.b32.xlu0 %v2598_v19, %s3227_s14 }
 0x504   : > { %2635 = vrot.lane.b32.xlu1 %v2599_v38, %s3227_s14  ;;  %s3232_s14 = smov 4  }
 0x53e   : > { %v2632_v28 = vpop.permute.xlu2 %2631 }
 0x53f   : > { %v2664_v13 = vmax.f32 %v2597_v15, %v2632_v28 }
 0x541   : > { %3137 = vmatmul.msk.f32.vlgmr.msrb.gmra.mxu3 %vm2670_vm7, %v2664_v13 }
 0x543   : > { %v2624_v11 = vpop.permute.xlu0 %2623 }
 0x546   : > { %v2642_v35 = vpop.permute.xlu2 %2641 }
 0x54e   : > { %v2638_v21 = vpop.permute.xlu2 %2637 }
 0x556   : > { %v2630_v4 = vpop.permute.xlu1 %2629  ;;  %v2622_v31 = vpop.permute.xlu2 %2621 }
 0x557   : > { %v2628_v45 = vpop.permute.xlu0 %2627 }
 0x558   : > { %v2649_v3 = vsel %vm594_vm0, %v2628_v45, %v2630_v4 }
 0x559   : > { %v2663_v39 = vmax.f32 %v4178_v52, %v2649_v3 }
 0x55b   : > { %3135 = vmatmul.msk.f32.vlgmr.msrb.gmra.mxu2 %vm2670_vm7, %v2663_v39 }
 0x55e   : > { %v2626_v27 = vpop.permute.xlu1 %2625 }
 0x55f   : > { %v2648_v48 = vsel %vm594_vm0, %v2624_v11, %v2626_v27  ;;  %v2644_v49 = vpop.permute.xlu0 %2643  ;;  %v2931_v27 = vld [vmem:[%s4285_s11] sm:$0xff] }
 0x560   : > { %v2662_v8 = vmax.f32 %v4174_v41, %v2648_v48  ;;  %v2652_v7 = vsel %vm594_vm0, %v2642_v35, %v2644_v49  ;;  %v2898_v35 = vld [vmem:[%s4281_s7] sm:$0x1f]  ;;  %v2932_v48 = vld [vmem:[%s4285_s11 + $0x8] sm:$0xff]  ;;  %2953 = vmatpush.msra.mxu2 %v2931_v27 }
 0x561   : > { %v2667_v59 = vmax.f32 %v2602_v20, %v2652_v7  ;;  %2973 = vmatpush.msra.mxu3 %v2932_v48 }
 0x562   : > { %3133 = vmatmul.msk.f32.vlgmr.msra.gmra.mxu1 %vm2670_vm7, %v2662_v8 }
 0x563   : > { %3136 = vmatmul.msk.f32.gmra.mxu2 %vm2670_vm7, %v2667_v59 }
 0x566   : > { %v2646_v23 = vpop.permute.xlu1 %2645 }
 0x567   : > { %v2668_v10 = vmax.f32 %v2604_v2, %v2646_v23  ;;  %v2640_v25 = vpop.permute.xlu0 %2639  ;;  %v2825_v2 = vld [vmem:[%s4279_s5 + $0x10] sm:$0xff] }
 0x568   : > { %v2651_v56 = vsel %vm594_vm0, %v2638_v21, %v2640_v25 }
 0x569   : > { %v2666_v24 = vmax.f32 %v2600_v37, %v2651_v56  ;;  %3138 = vmatmul.msk.f32.gmra.mxu3 %vm2670_vm7, %v2668_v10  ;;  %v2824_v37 = vld [vmem:[%s4279_s5 + $0x8] sm:$0xff] }
 0x56b   : > { %3134 = vmatmul.msk.f32.gmra.mxu1 %vm2670_vm7, %v2666_v24 }
 0x56e   : > { %v2620_v41 = vpop.permute.xlu1 %2619 }
 0x56f   : > { %v2647_v9 = vsel %vm594_vm0, %v2620_v41, %v2622_v31  ;;  %v2634_v36 = vpop.permute.xlu0 %2633 }
 0x570   : > { %v2661_v34 = vmax.f32 %v2591_v53, %v2647_v9 }
 0x572   : > { %3131 = vmatmul.msk.f32.vlgmr.msra.gmra.mxu0 %vm2670_vm7, %v2661_v34 }
 0x576   : > { %v2636_v52 = vpop.permute.xlu1 %2635 }
 0x577   : > { %v2650_v61 = vsel %vm594_vm0, %v2634_v36, %v2636_v52 }
 0x578   : > { %v2665_v15 = vmax.f32 %v2598_v19, %v2650_v61 }
 0x57a   : > { %3132 = vmatmul.msk.f32.gmra.mxu0 %vm2670_vm7, %v2665_v15 }
 0x5c4   : > { %v2806_v42 = vpop.f32.mrf.mxu3 }
 0x5de   : > { %v2766_v40 = vpop.f32.mrf.mxu2 }
 0x5df   : > { %v2726_v32 = vpop.f32.mrf.mxu1 }
 0x5e0   : > { %2734 = vrot.lane.b32.xlu1 %v2726_v32, %s3232_s14 }
 0x5e6   : > { %v2769_v12 = vpop.f32.mrf.mxu2 }
 0x5e7   : > { %2776 = vrot.lane.b32.xlu0 %v2769_v12, %s3233_s21 }
 0x5e8   : > { %v2729_v44 = vpop.f32.mrf.mxu1  ;;  %2814 = vrot.lane.b32.xlu1 %v2806_v42, %s3234_s22 }
 0x5e9   : > { %2736 = vrot.lane.b32.xlu2 %v2729_v44, %s3232_s14 }
 0x5ec   : > { %v2809_v46 = vpop.f32.mrf.mxu3 }
 0x5ef   : > { %2774 = vrot.lane.b32.xlu0 %v2766_v40, %s3233_s21  ;;  %v2694_v6 = vpop.f32.mrf.mxu0  ;;  %s3072_s21 = sshll.u32 %s4289_s26, 3 }
 0x5f0   : > { %2701 = vst.msk [vmem:[#allocation5] sm:$0xff] %vm2700_vm8, %v2694_v6  ;;  %2840 = vperm.xlu1 %3217, %v2830_v30   ;;  %s446_s24 = scalar_lea.vmem %s4286_s12, %s3072_s21 }
 0x5f1   : > { %2816 = vrot.lane.b32.xlu2 %v2809_v46, %s3234_s22 }
 0x5f7   : > { %2845 = vperm.xlu0 %3166, %v2831_v47   ;;  %v2697_v55 = vpop.f32.mrf.mxu0 }
 0x5f8   : > { %2702 = vst.msk [vmem:[#allocation5 + $0x8] sm:$0xff] %vm2700_vm8, %v2697_v55 }
 0x5f9   : > { %2850 = vperm.xlu2 %3218, %v2832_v33  }
 0x5ff   : > { %2902 = vperm.xlu0 %3166, %v2899_v62  }
 0x601   : > { %2835 = vperm.xlu2 %3218, %v2829_v57  }
 0x643   : > { %v2737_v1 = vpop.permute.xlu2 %2736 }
 0x644   : > { %2742 = vst.msk [vmem:[#allocation5 + $0x8] sm:$0xff] %vm2740_vm9, %v2737_v1 }
 0x64b   : > { %v2817_v5 = vpop.permute.xlu2 %2816 }
 0x652   : > { %v2735_v20 = vpop.permute.xlu1 %2734 }
 0x653   : > { %2741 = vst.msk [vmem:[#allocation5] sm:$0xff] %vm2740_vm9, %v2735_v20  ;;  %v2851_v43 = vpop.permute.xlu2 %2850 }
 0x659   : > { %v2777_v22 = vpop.permute.xlu0 %2776 }
 0x65a   : > { %2782 = vst.msk [vmem:[#allocation5 + $0x8] sm:$0xff] %vm2780_vm10, %v2777_v22  ;;  %v2815_v26 = vpop.permute.xlu1 %2814 }
 0x65b   : > { %2822 = vst.msk [vmem:[#allocation5 + $0x8] sm:$0xff] %vm2820_vm11, %v2817_v5  ;;  %v2836_v11 = vpop.permute.xlu2 %2835 }
 0x661   : > { %v2775_v16 = vpop.permute.xlu0 %2774 }
 0x662   : > { %2781 = vst.msk [vmem:[#allocation5] sm:$0xff] %vm2780_vm10, %v2775_v16  ;;  %v2828_v14 = vld [vmem:[#allocation5 + $0x8] sm:$0xff]  ;;  %v2841_v60 = vpop.permute.xlu1 %2840 }
 0x663   : > { %2821 = vst.msk [vmem:[#allocation5] sm:$0xff] %vm2820_vm11, %v2815_v26  ;;  %2879 = vmatpush.msrb.mxu0 %v2828_v14 }
 0x669   : > { %v2846_v53 = vpop.permute.xlu0 %2845 }
 0x66a   : > { %v2827_v63 = vld [vmem:[#allocation5] sm:$0xff] }
 0x66b   : > { %2880 = vmatpush.msrb.mxu0 %v2827_v63 }
 0x66c   : > { %3139 = vmatmul.msk.f32.vlgmr.msrb.gmra.mxu0 %vm1894_vm4, %v2823_v0 }
 0x671   : > { %v2903_v49 = vpop.permute.xlu0 %2902 }
 0x674   : > { %3140 = vmatmul.msk.f32.gmra.mxu0 %vm1894_vm4, %v2824_v37 }
 0x67c   : > { %3141 = vmatmul.msk.f32.gmra.mxu0 %vm1894_vm4, %v2825_v2 }
 0x684   : > { %3142 = vmatmul.msk.f32.gmra.mxu0 %vm1894_vm4, %v2826_v50 }
 0x6e9   : > { %v2882_v17 = vpop.f32.mrf.mxu0 }
 0x6ea   : > { %v2883_v4 = vadd.f32 %v2882_v17, %v2836_v11 }
 0x6ec   : > { %v2894_v39 = vmax.f32 %v2883_v4, 0.0 }
 0x6f1   : > { %v2885_v54 = vpop.f32.mrf.mxu0 }
 0x6f2   : > { %v2886_v28 = vadd.f32 %v2885_v54, %v2841_v60 }
 0x6f4   : > { %v2895_v3 = vmax.f32 %v2886_v28, 0.0 }
 0x6f9   : > { %v2888_v58 = vpop.f32.mrf.mxu0 }
 0x6fa   : > { %v2889_v19 = vadd.f32 %v2888_v58, %v2846_v53 }
 0x6fc   : > { %v2896_v45 = vmax.f32 %v2889_v19, 0.0 }
 0x701   : > { %v2891_v29 = vpop.f32.mrf.mxu0 }
 0x702   : > { %v2892_v38 = vadd.f32 %v2891_v29, %v2851_v43 }
 0x704   : > { %v2897_v13 = vmax.f32 %v2892_v38, 0.0 }
 0x706   : > { %2921 = vmatpush.msrb.mxu1 %v2897_v13 }
 0x708   : > { %2922 = vmatpush.msrb.mxu1 %v2896_v45 }
 0x70a   : > { %2923 = vmatpush.msrb.mxu1 %v2895_v3 }
 0x70c   : > { %2924 = vmatpush.msrb.mxu1 %v2894_v39 }
 0x70d   : > { %3143 = vmatmul.msk.f32.vlgmr.msrb.gmra.mxu1 %vm2905_vm12, %v2898_v35 }
 0x78a   : > { %v2926_v8 = vpop.f32.mrf.mxu1 }
 0x78b   : > { %v2927_v7 = vadd.f32 %v2926_v8, %v2903_v49 }
 0x78d   : > { %2930 = vst.msk [vmem:[%s446_s24] sm:$0x1f] %vm2929_vm13, %v2927_v7  ;;  %3144 = vmatmul.msk.f32.vlgmr.msra.gmra.mxu2 %vm1894_vm4, %v2927_v7  ;;  %3145 = vmatmul.msk.f32.vlgmr.msra.gmra.mxu3 %vm1894_vm4, %v2927_v7 }
 0x810   : > { %v2955_v59 = vpop.f32.mrf.mxu2  ;;  %v2975_v21 = vpop.f32.mrf.mxu3 }
 0x811   : > { %2978 = vst [vmem:[%s451_s30] sm:$0x1f] %v2955_v59 }
 0x812   : > { %2979 = vst [vmem:[%s451_s30 + $0x8] sm:$0x1f] %v2975_v21 }
 0x813 PF: > { %s24_s25 = sadd.s32 1, %s3225_s25  }
 0x814   : > { %p21_p4 = scmp.ge.s32.totalorder %s24_s25, 4  }
 0x816   :  { %23 = sbr.rel (!%p21_p4) target bundleno = 1 (0x1), region = 141 }

</bundles_post_ra>
